<compile_context>
chip_gen: v6e
topology: v6e:2x2x1
jax: 0.10.0
libtpu: 0.0.40
codegen_flags: <defaults>
</compile_context>

<pallas_src>
import math

import jax
import jax.numpy as jnp
import numpy as np
from jax.experimental import pallas as pl
from jax.experimental.pallas import tpu as pltpu

# ----------------------------- model hyper-params -----------------------------
D_MODEL = 32
HEADS = 4
DIM_PER_HEAD = D_MODEL // HEADS
D_FF = 64
EPS = 1e-6

BATCH = 2
TGT_LEN = 8     # decoder (query) length
SRC_LEN = 16    # encoder memory length

NEG_INF = -1e18  # plain Python float (never becomes a captured traced constant)


# ----------------------------- shared math (kernel + reference) ----------------
def _layer_norm(x, w, b):
    # x: (N, D) f32; w, b: (1, D) f32
    mu = jnp.mean(x, axis=-1, keepdims=True)
    var = jnp.mean(jnp.square(x - mu), axis=-1, keepdims=True)
    return (x - mu) * jax.lax.rsqrt(var + EPS) * w + b


def _decoder_layer_math(x, mem, dec_bias, src_bias, params, recip):
    """Whole-batch decoder layer.

    x: (B, T, D) f32, mem: (B, S, D) f32,
    dec_bias: (B, T, T) f32 additive mask, src_bias: (B, 1, S) f32 additive mask.
    Returns ((B, T, D) output, (B, T, S) head-0 context attention).
    """
    (w_sa_qkv, b_sa_qkv, w_sa_o,
     w_ca_q, b_ca_q, w_ca_kv, b_ca_kv, w_ca_o,
     ff_w1, ff_b1, ff_w2, vecs) = params

    B, T, D = x.shape
    S = mem.shape[1]
    H, dh = HEADS, DIM_PER_HEAD

    ln1_w, ln1_b = vecs[0:1], vecs[1:2]
    ln2_w, ln2_b = vecs[2:3], vecs[3:4]
    ff_ln_w, ff_ln_b = vecs[4:5], vecs[5:6]
    sa_bo, ca_bo, ff_b2 = vecs[6:7], vecs[7:8], vecs[8:9]

    x2 = x.reshape(B * T, D)
    mem2 = mem.reshape(B * S, D)

    def project(y, w, b):
        # one wide MXU matmul; bf16 operands, f32 accumulation
        return jnp.dot(y.astype(jnp.bfloat16), w,
                       preferred_element_type=jnp.float32) + b

    def split_heads(y, L):
        # (B*L, H*dh) -> (B, H, L, dh)
        return jnp.transpose(y.reshape(B, L, H, dh), (0, 2, 1, 3))

    def attend(q, k, v, wo, bo, bias):
        # q: (B, H, Lq, dh), k/v: (B, H, Lk, dh); bias broadcastable to (B, H, Lq, Lk)
        Lq, Lk = q.shape[2], k.shape[2]
        s = jnp.einsum('bqd,bkd->bqk',
                       q.reshape(B * H, Lq, dh).astype(jnp.bfloat16),
                       k.reshape(B * H, Lk, dh).astype(jnp.bfloat16),
                       preferred_element_type=jnp.float32).reshape(B, H, Lq, Lk)
        s = s + bias                                    # additive -1e18 mask
        m = jnp.max(s, axis=-1, keepdims=True)
        e = jnp.exp(s - m)
        p = e * recip(jnp.sum(e, axis=-1, keepdims=True))   # EUP reciprocal in-kernel
        ctx = jnp.einsum('bqk,bkd->bqd',
                         p.reshape(B * H, Lq, Lk).astype(jnp.bfloat16),
                         v.reshape(B * H, Lk, dh).astype(jnp.bfloat16),
                         preferred_element_type=jnp.float32)  # (B*H, Lq, dh)
        # one (B*H,Lq,dh)->(B*Lq,H*dh) relayout, then a single output-proj matmul
        ctx2 = jnp.transpose(ctx.reshape(B, H, Lq, dh),
                             (0, 2, 1, 3)).reshape(B * Lq, H * dh)
        out = project(ctx2, wo, bo)
        return out, p[:, 0]                              # head-0 attention (B, Lq, Lk)

    # --- self-attention sub-layer (fused QKV projection, scale pre-folded in Q) ---
    in_norm = _layer_norm(x2, ln1_w, ln1_b)
    qkv = project(in_norm, w_sa_qkv, b_sa_qkv)           # (B*T, 3D): [q | k | v]
    qh = split_heads(qkv[:, 0:D], T)
    kh = split_heads(qkv[:, D:2 * D], T)
    vh = split_heads(qkv[:, 2 * D:3 * D], T)
    sa_out, _ = attend(qh, kh, vh, w_sa_o, sa_bo, dec_bias[:, None, :, :])
    query = sa_out + x2                                  # dropout == identity (eval)

    # --- context attention sub-layer (fused KV projection) ---
    q_norm = _layer_norm(query, ln2_w, ln2_b)
    qc = split_heads(project(q_norm, w_ca_q, b_ca_q), T)
    kv = project(mem2, w_ca_kv, b_ca_kv)                 # (B*S, 2D): [k | v]
    kc = split_heads(kv[:, 0:D], S)
    vc = split_heads(kv[:, D:2 * D], S)
    ca_out, top_attn = attend(qc, kc, vc, w_ca_o, ca_bo, src_bias[:, None, :, :])
    ff_in = ca_out + query                               # dropout == identity (eval)

    # --- position-wise feed forward: w2(relu(w1(LN(x)))) + x ---
    y = _layer_norm(ff_in, ff_ln_w, ff_ln_b)
    h = jnp.maximum(project(y, ff_w1, ff_b1), 0.0)
    out = project(h, ff_w2, ff_b2) + ff_in
    return out.reshape(B, T, D), top_attn


# ----------------------------- Pallas kernel -----------------------------------
def decoder_layer_kernel(inp_ref, mem_ref, dec_bias_ref, src_bias_ref,
                         w_sa_qkv_ref, b_sa_qkv_ref, w_sa_o_ref,
                         w_ca_q_ref, b_ca_q_ref, w_ca_kv_ref, b_ca_kv_ref, w_ca_o_ref,
                         ff_w1_ref, ff_b1_ref, ff_w2_ref, vecs_ref,
                         out_ref, attn_ref):
    params = (w_sa_qkv_ref[...], b_sa_qkv_ref[...], w_sa_o_ref[...],
              w_ca_q_ref[...], b_ca_q_ref[...], w_ca_kv_ref[...], b_ca_kv_ref[...],
              w_ca_o_ref[...], ff_w1_ref[...], ff_b1_ref[...], ff_w2_ref[...],
              vecs_ref[...])
    out, top_attn = _decoder_layer_math(
        inp_ref[...], mem_ref[...], dec_bias_ref[...], src_bias_ref[...], params,
        recip=lambda v: pl.reciprocal(v, approx=True))   # EUP vrcp slot (off VPU path)
    out_ref[...] = out.astype(out_ref.dtype)
    attn_ref[...] = top_attn.astype(attn_ref.dtype)


def _make_attn_biases(src_pad_mask, tgt_pad_mask):
    """Host-side additive masks (review item): nonzero pad -> -1e18 bias."""
    B, _, T = tgt_pad_mask.shape
    rows = jax.lax.broadcasted_iota(jnp.int32, (T, T), 0)
    cols = jax.lax.broadcasted_iota(jnp.int32, (T, T), 1)
    future = (cols > rows)[None]                                      # (1, T, T)
    dec_mask = jnp.logical_or(tgt_pad_mask > 0, future)               # (B, T, T)
    dec_bias = jnp.where(dec_mask, NEG_INF, 0.0).astype(jnp.float32)
    src_bias = jnp.where(src_pad_mask > 0, NEG_INF, 0.0).astype(jnp.float32)  # (B,1,S)
    return dec_bias, src_bias


def transformer_decoder_layer(inputs, memory_bank, src_pad_mask, tgt_pad_mask,
                              packed_params, *, batch_block=None):
    B, T, D = inputs.shape
    S = memory_bank.shape[1]
    dec_bias, src_bias = _make_attn_biases(src_pad_mask, tgt_pad_mask)

    # Default: one grid step for the whole batch (best on single-TC v5e/v6e; the
    # working set is a few tens of KB).  For large production batches on v7x, pass
    # batch_block=B//2 to re-introduce a batch grid sharded across the two cores.
    if batch_block is None:
        batch_block = B
    assert B % batch_block == 0
    grid = (B // batch_block,)

    def _const_spec(p):
        nd = p.ndim
        return pl.BlockSpec(p.shape, lambda i, _nd=nd: (0,) * _nd)

    in_specs = [
        pl.BlockSpec((batch_block, T, D), lambda i: (i, 0, 0)),   # inputs
        pl.BlockSpec((batch_block, S, D), lambda i: (i, 0, 0)),   # memory_bank
        pl.BlockSpec((batch_block, T, T), lambda i: (i, 0, 0)),   # dec_bias
        pl.BlockSpec((batch_block, 1, S), lambda i: (i, 0, 0)),   # src_bias
    ] + [_const_spec(p) for p in packed_params]

    out_shape = (
        jax.ShapeDtypeStruct((B, T, D), jnp.float32),   # output
        jax.ShapeDtypeStruct((B, T, S), jnp.float32),   # context attn (head 0)
    )
    out_specs = (
        pl.BlockSpec((batch_block, T, D), lambda i: (i, 0, 0)),
        pl.BlockSpec((batch_block, T, S), lambda i: (i, 0, 0)),
    )

    return pl.pallas_call(
        decoder_layer_kernel,
        grid=grid,
        in_specs=in_specs,
        out_specs=out_specs,
        out_shape=out_shape,
        compiler_params=pltpu.CompilerParams(
            dimension_semantics=("parallel",)),
    )(inputs, memory_bank, dec_bias, src_bias, *packed_params)


# ----------------------------- deterministic param init ------------------------
def init_params(key):
    keys = jax.random.split(key, 16)
    kit = iter(keys)

    def linear(k, din, dout):
        k1, k2 = jax.random.split(k)
        w = jax.random.normal(k1, (din, dout), jnp.float32) * 0.05
        b = jax.random.normal(k2, (1, dout), jnp.float32) * 0.05
        return w, b

    def layernorm(k, d):
        k1, k2 = jax.random.split(k)
        w = 1.0 + jax.random.normal(k1, (1, d), jnp.float32) * 0.1
        b = jax.random.normal(k2, (1, d), jnp.float32) * 0.05
        return w, b

    ln1_w, ln1_b = layernorm(next(kit), D_MODEL)
    sa_wq, sa_bq = linear(next(kit), D_MODEL, D_MODEL)
    sa_wk, sa_bk = linear(next(kit), D_MODEL, D_MODEL)
    sa_wv, sa_bv = linear(next(kit), D_MODEL, D_MODEL)
    sa_wo, sa_bo = linear(next(kit), D_MODEL, D_MODEL)
    ln2_w, ln2_b = layernorm(next(kit), D_MODEL)
    ca_wq, ca_bq = linear(next(kit), D_MODEL, D_MODEL)
    ca_wk, ca_bk = linear(next(kit), D_MODEL, D_MODEL)
    ca_wv, ca_bv = linear(next(kit), D_MODEL, D_MODEL)
    ca_wo, ca_bo = linear(next(kit), D_MODEL, D_MODEL)
    ff_ln_w, ff_ln_b = layernorm(next(kit), D_MODEL)
    ff_w1, ff_b1 = linear(next(kit), D_MODEL, D_FF)
    ff_w2, ff_b2 = linear(next(kit), D_FF, D_MODEL)

    return (ln1_w, ln1_b,
            sa_wq, sa_bq, sa_wk, sa_bk, sa_wv, sa_bv, sa_wo, sa_bo,
            ln2_w, ln2_b,
            ca_wq, ca_bq, ca_wk, ca_bk, ca_wv, ca_bv, ca_wo, ca_bo,
            ff_ln_w, ff_ln_b, ff_w1, ff_b1, ff_w2, ff_b2)


def pack_params(p):
    """Pack the 26 OpenNMT-layout tensors into 12 kernel arrays.

    Weights go to bf16 (MXU-native), biases / LayerNorm rows stay f32.
    The 1/sqrt(dim_per_head) softmax scale is folded into the Q columns host-side.
    """
    (ln1_w, ln1_b,
     sa_wq, sa_bq, sa_wk, sa_bk, sa_wv, sa_bv, sa_wo, sa_bo,
     ln2_w, ln2_b,
     ca_wq, ca_bq, ca_wk, ca_bk, ca_wv, ca_bv, ca_wo, ca_bo,
     ff_ln_w, ff_ln_b, ff_w1, ff_b1, ff_w2, ff_b2) = p

    scale = 1.0 / math.sqrt(DIM_PER_HEAD)

    w_sa_qkv = jnp.concatenate([sa_wq * scale, sa_wk, sa_wv], axis=1).astype(jnp.bfloat16)
    b_sa_qkv = jnp.concatenate([sa_bq * scale, sa_bk, sa_bv], axis=1)          # (1, 3D) f32
    w_ca_q = (ca_wq * scale).astype(jnp.bfloat16)
    b_ca_q = ca_bq * scale                                                     # (1, D) f32
    w_ca_kv = jnp.concatenate([ca_wk, ca_wv], axis=1).astype(jnp.bfloat16)     # (D, 2D)
    b_ca_kv = jnp.concatenate([ca_bk, ca_bv], axis=1)                          # (1, 2D) f32
    vecs = jnp.concatenate([ln1_w, ln1_b, ln2_w, ln2_b, ff_ln_w, ff_ln_b,
                            sa_bo, ca_bo, ff_b2], axis=0)                      # (9, D) f32

    return (w_sa_qkv, b_sa_qkv, sa_wo.astype(jnp.bfloat16),
            w_ca_q, b_ca_q, w_ca_kv, b_ca_kv, ca_wo.astype(jnp.bfloat16),
            ff_w1.astype(jnp.bfloat16), ff_b1, ff_w2.astype(jnp.bfloat16), vecs)


# ----------------------------- main ---------------------------------------------
if __name__ == "__main__":
    key = jax.random.PRNGKey(0)
    k_inp, k_mem, k_par = jax.random.split(key, 3)

    inputs = jax.random.normal(k_inp, (BATCH, TGT_LEN, D_MODEL), jnp.float32)
    memory_bank = jax.random.normal(k_mem, (BATCH, SRC_LEN, D_MODEL), jnp.float32)

    # masks: nonzero == padded/masked. Leave tgt unpadded; pad tail of src for batch 1.
    src_pad_mask = np.zeros((BATCH, 1, SRC_LEN), np.int32)
    src_pad_mask[1, 0, SRC_LEN - 3:] = 1
    src_pad_mask = jnp.asarray(src_pad_mask)
    tgt_pad_mask = jnp.zeros((BATCH, 1, TGT_LEN), jnp.int32)

    packed = pack_params(init_params(k_par))

    output, attn = transformer_decoder_layer(
        inputs, memory_bank, src_pad_mask, tgt_pad_mask, packed)
    output = jax.block_until_ready(output)
    attn = jax.block_until_ready(attn)

    # pure-JAX reference: identical packed params and matmul math (exact reciprocal).
    dec_bias, src_bias = _make_attn_biases(src_pad_mask, tgt_pad_mask)
    ref_out, ref_attn = _decoder_layer_math(
        inputs, memory_bank, dec_bias, src_bias, packed, recip=lambda v: 1.0 / v)

    assert output.shape == (BATCH, TGT_LEN, D_MODEL)
    assert attn.shape == (BATCH, TGT_LEN, SRC_LEN)
    np.testing.assert_allclose(np.asarray(output), np.asarray(ref_out), rtol=1e-3, atol=1e-3)
    np.testing.assert_allclose(np.asarray(attn), np.asarray(ref_attn), rtol=1e-3, atol=1e-3)

    print("KERNEL_OK")
</pallas_src>

<mosaic_0001>
module attributes {stable_mosaic.version = 11 : i64} {
  func.func @decoder_layer_kernel(%arg0: i32, %arg1: memref<2x8x32xf32, #tpu.memory_space<vmem>>, %arg2: memref<2x16x32xf32, #tpu.memory_space<vmem>>, %arg3: memref<2x8x8xf32, #tpu.memory_space<vmem>>, %arg4: memref<2x1x16xf32, #tpu.memory_space<vmem>>, %arg5: memref<32x96xbf16, #tpu.memory_space<vmem>>, %arg6: memref<1x96xf32, #tpu.memory_space<vmem>>, %arg7: memref<32x32xbf16, #tpu.memory_space<vmem>>, %arg8: memref<32x32xbf16, #tpu.memory_space<vmem>>, %arg9: memref<1x32xf32, #tpu.memory_space<vmem>>, %arg10: memref<32x64xbf16, #tpu.memory_space<vmem>>, %arg11: memref<1x64xf32, #tpu.memory_space<vmem>>, %arg12: memref<32x32xbf16, #tpu.memory_space<vmem>>, %arg13: memref<32x64xbf16, #tpu.memory_space<vmem>>, %arg14: memref<1x64xf32, #tpu.memory_space<vmem>>, %arg15: memref<64x32xbf16, #tpu.memory_space<vmem>>, %arg16: memref<9x32xf32, #tpu.memory_space<vmem>>, %arg17: memref<2x8x32xf32, #tpu.memory_space<vmem>>, %arg18: memref<2x8x16xf32, #tpu.memory_space<vmem>>) attributes {dimension_semantics = [#tpu.dimension_semantics<parallel>], iteration_bounds = array<i64: 1>, scalar_prefetch = 0 : i64, scratch_operands = 0 : i64, tpu.core_type = #tpu.core_type<tc>, window_params = [{transform_indices = @transform_0, window_bounds = array<i64: 2, 8, 32>}, {transform_indices = @transform_1, window_bounds = array<i64: 2, 16, 32>}, {transform_indices = @transform_2, window_bounds = array<i64: 2, 8, 8>}, {transform_indices = @transform_3, window_bounds = array<i64: 2, 1, 16>}, {pipeline_mode = #tpu.pipeline_mode<synchronous>, transform_indices = @transform_4, window_bounds = array<i64: 32, 96>}, {pipeline_mode = #tpu.pipeline_mode<synchronous>, transform_indices = @transform_5, window_bounds = array<i64: 1, 96>}, {pipeline_mode = #tpu.pipeline_mode<synchronous>, transform_indices = @transform_6, window_bounds = array<i64: 32, 32>}, {pipeline_mode = #tpu.pipeline_mode<synchronous>, transform_indices = @transform_7, window_bounds = array<i64: 32, 32>}, {pipeline_mode = #tpu.pipeline_mode<synchronous>, transform_indices = @transform_8, window_bounds = array<i64: 1, 32>}, {pipeline_mode = #tpu.pipeline_mode<synchronous>, transform_indices = @transform_9, window_bounds = array<i64: 32, 64>}, {pipeline_mode = #tpu.pipeline_mode<synchronous>, transform_indices = @transform_10, window_bounds = array<i64: 1, 64>}, {pipeline_mode = #tpu.pipeline_mode<synchronous>, transform_indices = @transform_11, window_bounds = array<i64: 32, 32>}, {pipeline_mode = #tpu.pipeline_mode<synchronous>, transform_indices = @transform_12, window_bounds = array<i64: 32, 64>}, {pipeline_mode = #tpu.pipeline_mode<synchronous>, transform_indices = @transform_13, window_bounds = array<i64: 1, 64>}, {pipeline_mode = #tpu.pipeline_mode<synchronous>, transform_indices = @transform_14, window_bounds = array<i64: 64, 32>}, {pipeline_mode = #tpu.pipeline_mode<synchronous>, transform_indices = @transform_15, window_bounds = array<i64: 9, 32>}, {transform_indices = @transform_16, window_bounds = array<i64: 2, 8, 32>}, {transform_indices = @transform_17, window_bounds = array<i64: 2, 8, 16>}]} {
    %c0 = arith.constant 0 : index
    %c0_0 = arith.constant 0 : index
    %0 = vector.load %arg5[%c0, %c0_0] : memref<32x96xbf16, #tpu.memory_space<vmem>>, vector<32x96xbf16>
    %c0_1 = arith.constant 0 : index
    %c0_2 = arith.constant 0 : index
    %1 = vector.load %arg6[%c0_1, %c0_2] : memref<1x96xf32, #tpu.memory_space<vmem>>, vector<1x96xf32>
    %c0_3 = arith.constant 0 : index
    %c0_4 = arith.constant 0 : index
    %2 = vector.load %arg7[%c0_3, %c0_4] : memref<32x32xbf16, #tpu.memory_space<vmem>>, vector<32x32xbf16>
    %c0_5 = arith.constant 0 : index
    %c0_6 = arith.constant 0 : index
    %3 = vector.load %arg8[%c0_5, %c0_6] : memref<32x32xbf16, #tpu.memory_space<vmem>>, vector<32x32xbf16>
    %c0_7 = arith.constant 0 : index
    %c0_8 = arith.constant 0 : index
    %4 = vector.load %arg9[%c0_7, %c0_8] : memref<1x32xf32, #tpu.memory_space<vmem>>, vector<1x32xf32>
    %c0_9 = arith.constant 0 : index
    %c0_10 = arith.constant 0 : index
    %5 = vector.load %arg10[%c0_9, %c0_10] : memref<32x64xbf16, #tpu.memory_space<vmem>>, vector<32x64xbf16>
    %c0_11 = arith.constant 0 : index
    %c0_12 = arith.constant 0 : index
    %6 = vector.load %arg11[%c0_11, %c0_12] : memref<1x64xf32, #tpu.memory_space<vmem>>, vector<1x64xf32>
    %c0_13 = arith.constant 0 : index
    %c0_14 = arith.constant 0 : index
    %7 = vector.load %arg12[%c0_13, %c0_14] : memref<32x32xbf16, #tpu.memory_space<vmem>>, vector<32x32xbf16>
    %c0_15 = arith.constant 0 : index
    %c0_16 = arith.constant 0 : index
    %8 = vector.load %arg13[%c0_15, %c0_16] : memref<32x64xbf16, #tpu.memory_space<vmem>>, vector<32x64xbf16>
    %c0_17 = arith.constant 0 : index
    %c0_18 = arith.constant 0 : index
    %9 = vector.load %arg14[%c0_17, %c0_18] : memref<1x64xf32, #tpu.memory_space<vmem>>, vector<1x64xf32>
    %c0_19 = arith.constant 0 : index
    %c0_20 = arith.constant 0 : index
    %10 = vector.load %arg15[%c0_19, %c0_20] : memref<64x32xbf16, #tpu.memory_space<vmem>>, vector<64x32xbf16>
    %c0_21 = arith.constant 0 : index
    %c0_22 = arith.constant 0 : index
    %11 = vector.load %arg16[%c0_21, %c0_22] : memref<9x32xf32, #tpu.memory_space<vmem>>, vector<9x32xf32>
    %c0_23 = arith.constant 0 : index
    %c0_24 = arith.constant 0 : index
    %c0_25 = arith.constant 0 : index
    %12 = vector.load %arg1[%c0_23, %c0_24, %c0_25] : memref<2x8x32xf32, #tpu.memory_space<vmem>>, vector<2x8x32xf32>
    %c0_26 = arith.constant 0 : index
    %c0_27 = arith.constant 0 : index
    %c0_28 = arith.constant 0 : index
    %13 = vector.load %arg2[%c0_26, %c0_27, %c0_28] : memref<2x16x32xf32, #tpu.memory_space<vmem>>, vector<2x16x32xf32>
    %c0_29 = arith.constant 0 : index
    %c0_30 = arith.constant 0 : index
    %c0_31 = arith.constant 0 : index
    %14 = vector.load %arg3[%c0_29, %c0_30, %c0_31] : memref<2x8x8xf32, #tpu.memory_space<vmem>>, vector<2x8x8xf32>
    %c0_32 = arith.constant 0 : index
    %c0_33 = arith.constant 0 : index
    %c0_34 = arith.constant 0 : index
    %15 = vector.load %arg4[%c0_32, %c0_33, %c0_34] : memref<2x1x16xf32, #tpu.memory_space<vmem>>, vector<2x1x16xf32>
    %16 = vector.extract_strided_slice %11 {offsets = [0, 0], sizes = [1, 32], strides = [1, 1]} : vector<9x32xf32> to vector<1x32xf32>
    %17 = vector.extract_strided_slice %11 {offsets = [1, 0], sizes = [1, 32], strides = [1, 1]} : vector<9x32xf32> to vector<1x32xf32>
    %18 = vector.extract_strided_slice %11 {offsets = [2, 0], sizes = [1, 32], strides = [1, 1]} : vector<9x32xf32> to vector<1x32xf32>
    %19 = vector.extract_strided_slice %11 {offsets = [3, 0], sizes = [1, 32], strides = [1, 1]} : vector<9x32xf32> to vector<1x32xf32>
    %20 = vector.extract_strided_slice %11 {offsets = [4, 0], sizes = [1, 32], strides = [1, 1]} : vector<9x32xf32> to vector<1x32xf32>
    %21 = vector.extract_strided_slice %11 {offsets = [5, 0], sizes = [1, 32], strides = [1, 1]} : vector<9x32xf32> to vector<1x32xf32>
    %22 = vector.extract_strided_slice %11 {offsets = [6, 0], sizes = [1, 32], strides = [1, 1]} : vector<9x32xf32> to vector<1x32xf32>
    %23 = vector.extract_strided_slice %11 {offsets = [7, 0], sizes = [1, 32], strides = [1, 1]} : vector<9x32xf32> to vector<1x32xf32>
    %24 = vector.extract_strided_slice %11 {offsets = [8, 0], sizes = [1, 32], strides = [1, 1]} : vector<9x32xf32> to vector<1x32xf32>
    %25 = vector.shape_cast %12 : vector<2x8x32xf32> to vector<16x32xf32>
    %26 = vector.shape_cast %13 : vector<2x16x32xf32> to vector<32x32xf32>
    %cst = arith.constant dense<0.000000e+00> : vector<16xf32>
    %27 = vector.multi_reduction <add>, %25, %cst [1] : vector<16x32xf32> to vector<16xf32>
    %28 = vector.shape_cast %27 : vector<16xf32> to vector<16x1xf32>
    %cst_35 = arith.constant 3.200000e+01 : f32
    %29 = vector.broadcast %cst_35 : f32 to vector<16x1xf32>
    %30 = arith.divf %28, %29 : vector<16x1xf32>
    %31 = vector.broadcast %30 : vector<16x1xf32> to vector<16x32xf32>
    %32 = arith.subf %25, %31 : vector<16x32xf32>
    %33 = arith.mulf %32, %32 : vector<16x32xf32>
    %cst_36 = arith.constant dense<0.000000e+00> : vector<16xf32>
    %34 = vector.multi_reduction <add>, %33, %cst_36 [1] : vector<16x32xf32> to vector<16xf32>
    %35 = vector.shape_cast %34 : vector<16xf32> to vector<16x1xf32>
    %cst_37 = arith.constant 3.200000e+01 : f32
    %36 = vector.broadcast %cst_37 : f32 to vector<16x1xf32>
    %37 = arith.divf %35, %36 : vector<16x1xf32>
    %38 = vector.broadcast %30 : vector<16x1xf32> to vector<16x32xf32>
    %39 = arith.subf %25, %38 : vector<16x32xf32>
    %cst_38 = arith.constant 9.99999997E-7 : f32
    %40 = vector.broadcast %cst_38 : f32 to vector<16x1xf32>
    %41 = arith.addf %37, %40 : vector<16x1xf32>
    %42 = math.rsqrt %41 : vector<16x1xf32>
    %43 = vector.broadcast %42 : vector<16x1xf32> to vector<16x32xf32>
    %44 = arith.mulf %39, %43 : vector<16x32xf32>
    %45 = vector.broadcast %16 : vector<1x32xf32> to vector<16x32xf32>
    %46 = arith.mulf %44, %45 : vector<16x32xf32>
    %47 = vector.broadcast %17 : vector<1x32xf32> to vector<16x32xf32>
    %48 = arith.addf %46, %47 : vector<16x32xf32>
    %49 = arith.truncf %48 : vector<16x32xf32> to vector<16x32xbf16>
    %cst_39 = arith.constant dense<0.000000e+00> : vector<16x96xf32>
    %50 = tpu.matmul %49, %0, %cst_39 {dimension_numbers = #tpu.dot_dimension_numbers<[1], [0], [0], [1], [0, 0, 1, 1], [], []>} : vector<16x32xbf16>, vector<32x96xbf16>, vector<16x96xf32> -> vector<16x96xf32>
    %51 = vector.broadcast %1 : vector<1x96xf32> to vector<16x96xf32>
    %52 = arith.addf %50, %51 : vector<16x96xf32>
    %53 = vector.extract_strided_slice %52 {offsets = [0, 0], sizes = [16, 32], strides = [1, 1]} : vector<16x96xf32> to vector<16x32xf32>
    %54 = vector.shape_cast %53 : vector<16x32xf32> to vector<2x8x4x8xf32>
    %55 = tpu.transpose %54, [0, 2, 1, 3] : vector<2x8x4x8xf32> -> vector<2x4x8x8xf32>
    %56 = vector.extract_strided_slice %52 {offsets = [0, 32], sizes = [16, 32], strides = [1, 1]} : vector<16x96xf32> to vector<16x32xf32>
    %57 = vector.shape_cast %56 : vector<16x32xf32> to vector<2x8x4x8xf32>
    %58 = tpu.transpose %57, [0, 2, 1, 3] : vector<2x8x4x8xf32> -> vector<2x4x8x8xf32>
    %59 = vector.extract_strided_slice %52 {offsets = [0, 64], sizes = [16, 32], strides = [1, 1]} : vector<16x96xf32> to vector<16x32xf32>
    %60 = vector.shape_cast %59 : vector<16x32xf32> to vector<2x8x4x8xf32>
    %61 = tpu.transpose %60, [0, 2, 1, 3] : vector<2x8x4x8xf32> -> vector<2x4x8x8xf32>
    %62 = vector.shape_cast %14 : vector<2x8x8xf32> to vector<2x1x8x8xf32>
    %63 = vector.shape_cast %55 : vector<2x4x8x8xf32> to vector<8x8x8xf32>
    %64 = arith.truncf %63 : vector<8x8x8xf32> to vector<8x8x8xbf16>
    %65 = vector.shape_cast %58 : vector<2x4x8x8xf32> to vector<8x8x8xf32>
    %66 = arith.truncf %65 : vector<8x8x8xf32> to vector<8x8x8xbf16>
    "tpu.trace_start"() <{level = 10 : i32, message = "bqd,bkd->bqk"}> : () -> ()
    %cst_40 = arith.constant dense<0.000000e+00> : vector<8x8x8xf32>
    %67 = tpu.matmul %64, %66, %cst_40 {dimension_numbers = #tpu.dot_dimension_numbers<[2], [2], [1], [1], [0, 0, 0, 1, 1, 1], [0], [0]>} : vector<8x8x8xbf16>, vector<8x8x8xbf16>, vector<8x8x8xf32> -> vector<8x8x8xf32>
    "tpu.trace_stop"() : () -> ()
    %68 = vector.shape_cast %67 : vector<8x8x8xf32> to vector<2x4x8x8xf32>
    %69 = vector.broadcast %62 : vector<2x1x8x8xf32> to vector<2x4x8x8xf32>
    %70 = arith.addf %68, %69 : vector<2x4x8x8xf32>
    %cst_41 = arith.constant dense<0xFF800000> : vector<2x4x8xf32>
    %71 = vector.multi_reduction <maximumf>, %70, %cst_41 [3] : vector<2x4x8x8xf32> to vector<2x4x8xf32>
    %72 = vector.shape_cast %71 : vector<2x4x8xf32> to vector<2x4x8x1xf32>
    %73 = vector.broadcast %72 : vector<2x4x8x1xf32> to vector<2x4x8x8xf32>
    %74 = arith.subf %70, %73 : vector<2x4x8x8xf32>
    %75 = math.exp %74 : vector<2x4x8x8xf32>
    %cst_42 = arith.constant dense<0.000000e+00> : vector<2x4x8xf32>
    %76 = vector.multi_reduction <add>, %75, %cst_42 [3] : vector<2x4x8x8xf32> to vector<2x4x8xf32>
    %77 = vector.shape_cast %76 : vector<2x4x8xf32> to vector<2x4x8x1xf32>
    %78 = tpu.reciprocal %77 {approx = true} : vector<2x4x8x1xf32> -> vector<2x4x8x1xf32>
    %79 = vector.broadcast %78 : vector<2x4x8x1xf32> to vector<2x4x8x8xf32>
    %80 = arith.mulf %75, %79 : vector<2x4x8x8xf32>
    %81 = vector.shape_cast %80 : vector<2x4x8x8xf32> to vector<8x8x8xf32>
    %82 = arith.truncf %81 : vector<8x8x8xf32> to vector<8x8x8xbf16>
    %83 = vector.shape_cast %61 : vector<2x4x8x8xf32> to vector<8x8x8xf32>
    %84 = arith.truncf %83 : vector<8x8x8xf32> to vector<8x8x8xbf16>
    "tpu.trace_start"() <{level = 10 : i32, message = "bqk,bkd->bqd"}> : () -> ()
    %cst_43 = arith.constant dense<0.000000e+00> : vector<8x8x8xf32>
    %85 = tpu.matmul %82, %84, %cst_43 {dimension_numbers = #tpu.dot_dimension_numbers<[2], [1], [1], [2], [0, 0, 0, 1, 1, 2], [0], [0]>} : vector<8x8x8xbf16>, vector<8x8x8xbf16>, vector<8x8x8xf32> -> vector<8x8x8xf32>
    "tpu.trace_stop"() : () -> ()
    %86 = vector.shape_cast %85 : vector<8x8x8xf32> to vector<2x4x8x8xf32>
    %87 = tpu.transpose %86, [0, 2, 1, 3] : vector<2x4x8x8xf32> -> vector<2x8x4x8xf32>
    %88 = vector.shape_cast %87 : vector<2x8x4x8xf32> to vector<16x32xf32>
    %89 = arith.truncf %88 : vector<16x32xf32> to vector<16x32xbf16>
    %cst_44 = arith.constant dense<0.000000e+00> : vector<16x32xf32>
    %90 = tpu.matmul %89, %2, %cst_44 {dimension_numbers = #tpu.dot_dimension_numbers<[1], [0], [0], [1], [0, 0, 1, 1], [], []>} : vector<16x32xbf16>, vector<32x32xbf16>, vector<16x32xf32> -> vector<16x32xf32>
    %91 = vector.broadcast %22 : vector<1x32xf32> to vector<16x32xf32>
    %92 = arith.addf %90, %91 : vector<16x32xf32>
    %93 = arith.addf %92, %25 : vector<16x32xf32>
    %cst_45 = arith.constant dense<0.000000e+00> : vector<16xf32>
    %94 = vector.multi_reduction <add>, %93, %cst_45 [1] : vector<16x32xf32> to vector<16xf32>
    %95 = vector.shape_cast %94 : vector<16xf32> to vector<16x1xf32>
    %cst_46 = arith.constant 3.200000e+01 : f32
    %96 = vector.broadcast %cst_46 : f32 to vector<16x1xf32>
    %97 = arith.divf %95, %96 : vector<16x1xf32>
    %98 = vector.broadcast %97 : vector<16x1xf32> to vector<16x32xf32>
    %99 = arith.subf %93, %98 : vector<16x32xf32>
    %100 = arith.mulf %99, %99 : vector<16x32xf32>
    %cst_47 = arith.constant dense<0.000000e+00> : vector<16xf32>
    %101 = vector.multi_reduction <add>, %100, %cst_47 [1] : vector<16x32xf32> to vector<16xf32>
    %102 = vector.shape_cast %101 : vector<16xf32> to vector<16x1xf32>
    %cst_48 = arith.constant 3.200000e+01 : f32
    %103 = vector.broadcast %cst_48 : f32 to vector<16x1xf32>
    %104 = arith.divf %102, %103 : vector<16x1xf32>
    %105 = vector.broadcast %97 : vector<16x1xf32> to vector<16x32xf32>
    %106 = arith.subf %93, %105 : vector<16x32xf32>
    %cst_49 = arith.constant 9.99999997E-7 : f32
    %107 = vector.broadcast %cst_49 : f32 to vector<16x1xf32>
    %108 = arith.addf %104, %107 : vector<16x1xf32>
    %109 = math.rsqrt %108 : vector<16x1xf32>
    %110 = vector.broadcast %109 : vector<16x1xf32> to vector<16x32xf32>
    %111 = arith.mulf %106, %110 : vector<16x32xf32>
    %112 = vector.broadcast %18 : vector<1x32xf32> to vector<16x32xf32>
    %113 = arith.mulf %111, %112 : vector<16x32xf32>
    %114 = vector.broadcast %19 : vector<1x32xf32> to vector<16x32xf32>
    %115 = arith.addf %113, %114 : vector<16x32xf32>
    %116 = arith.truncf %115 : vector<16x32xf32> to vector<16x32xbf16>
    %cst_50 = arith.constant dense<0.000000e+00> : vector<16x32xf32>
    %117 = tpu.matmul %116, %3, %cst_50 {dimension_numbers = #tpu.dot_dimension_numbers<[1], [0], [0], [1], [0, 0, 1, 1], [], []>} : vector<16x32xbf16>, vector<32x32xbf16>, vector<16x32xf32> -> vector<16x32xf32>
    %118 = vector.broadcast %4 : vector<1x32xf32> to vector<16x32xf32>
    %119 = arith.addf %117, %118 : vector<16x32xf32>
    %120 = vector.shape_cast %119 : vector<16x32xf32> to vector<2x8x4x8xf32>
    %121 = tpu.transpose %120, [0, 2, 1, 3] : vector<2x8x4x8xf32> -> vector<2x4x8x8xf32>
    %122 = arith.truncf %26 : vector<32x32xf32> to vector<32x32xbf16>
    %cst_51 = arith.constant dense<0.000000e+00> : vector<32x64xf32>
    %123 = tpu.matmul %122, %5, %cst_51 {dimension_numbers = #tpu.dot_dimension_numbers<[1], [0], [0], [1], [0, 0, 1, 1], [], []>} : vector<32x32xbf16>, vector<32x64xbf16>, vector<32x64xf32> -> vector<32x64xf32>
    %124 = vector.broadcast %6 : vector<1x64xf32> to vector<32x64xf32>
    %125 = arith.addf %123, %124 : vector<32x64xf32>
    %126 = vector.extract_strided_slice %125 {offsets = [0, 0], sizes = [32, 32], strides = [1, 1]} : vector<32x64xf32> to vector<32x32xf32>
    %127 = vector.shape_cast %126 : vector<32x32xf32> to vector<2x16x4x8xf32>
    %128 = tpu.transpose %127, [0, 2, 1, 3] : vector<2x16x4x8xf32> -> vector<2x4x16x8xf32>
    %129 = vector.extract_strided_slice %125 {offsets = [0, 32], sizes = [32, 32], strides = [1, 1]} : vector<32x64xf32> to vector<32x32xf32>
    %130 = vector.shape_cast %129 : vector<32x32xf32> to vector<2x16x4x8xf32>
    %131 = tpu.transpose %130, [0, 2, 1, 3] : vector<2x16x4x8xf32> -> vector<2x4x16x8xf32>
    %132 = vector.shape_cast %15 : vector<2x1x16xf32> to vector<2x1x1x16xf32>
    %133 = vector.shape_cast %121 : vector<2x4x8x8xf32> to vector<8x8x8xf32>
    %134 = arith.truncf %133 : vector<8x8x8xf32> to vector<8x8x8xbf16>
    %135 = vector.shape_cast %128 : vector<2x4x16x8xf32> to vector<8x16x8xf32>
    %136 = arith.truncf %135 : vector<8x16x8xf32> to vector<8x16x8xbf16>
    "tpu.trace_start"() <{level = 10 : i32, message = "bqd,bkd->bqk"}> : () -> ()
    %cst_52 = arith.constant dense<0.000000e+00> : vector<8x8x16xf32>
    %137 = tpu.matmul %134, %136, %cst_52 {dimension_numbers = #tpu.dot_dimension_numbers<[2], [2], [1], [1], [0, 0, 0, 1, 1, 1], [0], [0]>} : vector<8x8x8xbf16>, vector<8x16x8xbf16>, vector<8x8x16xf32> -> vector<8x8x16xf32>
    "tpu.trace_stop"() : () -> ()
    %138 = vector.shape_cast %137 : vector<8x8x16xf32> to vector<2x4x8x16xf32>
    %139 = vector.broadcast %132 : vector<2x1x1x16xf32> to vector<2x4x8x16xf32>
    %140 = arith.addf %138, %139 : vector<2x4x8x16xf32>
    %cst_53 = arith.constant dense<0xFF800000> : vector<2x4x8xf32>
    %141 = vector.multi_reduction <maximumf>, %140, %cst_53 [3] : vector<2x4x8x16xf32> to vector<2x4x8xf32>
    %142 = vector.shape_cast %141 : vector<2x4x8xf32> to vector<2x4x8x1xf32>
    %143 = vector.broadcast %142 : vector<2x4x8x1xf32> to vector<2x4x8x16xf32>
    %144 = arith.subf %140, %143 : vector<2x4x8x16xf32>
    %145 = math.exp %144 : vector<2x4x8x16xf32>
    %cst_54 = arith.constant dense<0.000000e+00> : vector<2x4x8xf32>
    %146 = vector.multi_reduction <add>, %145, %cst_54 [3] : vector<2x4x8x16xf32> to vector<2x4x8xf32>
    %147 = vector.shape_cast %146 : vector<2x4x8xf32> to vector<2x4x8x1xf32>
    %148 = tpu.reciprocal %147 {approx = true} : vector<2x4x8x1xf32> -> vector<2x4x8x1xf32>
    %149 = vector.broadcast %148 : vector<2x4x8x1xf32> to vector<2x4x8x16xf32>
    %150 = arith.mulf %145, %149 : vector<2x4x8x16xf32>
    %151 = vector.shape_cast %150 : vector<2x4x8x16xf32> to vector<8x8x16xf32>
    %152 = arith.truncf %151 : vector<8x8x16xf32> to vector<8x8x16xbf16>
    %153 = vector.shape_cast %131 : vector<2x4x16x8xf32> to vector<8x16x8xf32>
    %154 = arith.truncf %153 : vector<8x16x8xf32> to vector<8x16x8xbf16>
    "tpu.trace_start"() <{level = 10 : i32, message = "bqk,bkd->bqd"}> : () -> ()
    %cst_55 = arith.constant dense<0.000000e+00> : vector<8x8x8xf32>
    %155 = tpu.matmul %152, %154, %cst_55 {dimension_numbers = #tpu.dot_dimension_numbers<[2], [1], [1], [2], [0, 0, 0, 1, 1, 2], [0], [0]>} : vector<8x8x16xbf16>, vector<8x16x8xbf16>, vector<8x8x8xf32> -> vector<8x8x8xf32>
    "tpu.trace_stop"() : () -> ()
    %156 = vector.shape_cast %155 : vector<8x8x8xf32> to vector<2x4x8x8xf32>
    %157 = tpu.transpose %156, [0, 2, 1, 3] : vector<2x4x8x8xf32> -> vector<2x8x4x8xf32>
    %158 = vector.shape_cast %157 : vector<2x8x4x8xf32> to vector<16x32xf32>
    %159 = arith.truncf %158 : vector<16x32xf32> to vector<16x32xbf16>
    %cst_56 = arith.constant dense<0.000000e+00> : vector<16x32xf32>
    %160 = tpu.matmul %159, %7, %cst_56 {dimension_numbers = #tpu.dot_dimension_numbers<[1], [0], [0], [1], [0, 0, 1, 1], [], []>} : vector<16x32xbf16>, vector<32x32xbf16>, vector<16x32xf32> -> vector<16x32xf32>
    %161 = vector.broadcast %23 : vector<1x32xf32> to vector<16x32xf32>
    %162 = arith.addf %160, %161 : vector<16x32xf32>
    %163 = vector.extract_strided_slice %150 {offsets = [0, 0, 0, 0], sizes = [2, 1, 8, 16], strides = [1, 1, 1, 1]} : vector<2x4x8x16xf32> to vector<2x1x8x16xf32>
    %164 = vector.shape_cast %163 : vector<2x1x8x16xf32> to vector<2x8x16xf32>
    %165 = arith.addf %162, %93 : vector<16x32xf32>
    %cst_57 = arith.constant dense<0.000000e+00> : vector<16xf32>
    %166 = vector.multi_reduction <add>, %165, %cst_57 [1] : vector<16x32xf32> to vector<16xf32>
    %167 = vector.shape_cast %166 : vector<16xf32> to vector<16x1xf32>
    %cst_58 = arith.constant 3.200000e+01 : f32
    %168 = vector.broadcast %cst_58 : f32 to vector<16x1xf32>
    %169 = arith.divf %167, %168 : vector<16x1xf32>
    %170 = vector.broadcast %169 : vector<16x1xf32> to vector<16x32xf32>
    %171 = arith.subf %165, %170 : vector<16x32xf32>
    %172 = arith.mulf %171, %171 : vector<16x32xf32>
    %cst_59 = arith.constant dense<0.000000e+00> : vector<16xf32>
    %173 = vector.multi_reduction <add>, %172, %cst_59 [1] : vector<16x32xf32> to vector<16xf32>
    %174 = vector.shape_cast %173 : vector<16xf32> to vector<16x1xf32>
    %cst_60 = arith.constant 3.200000e+01 : f32
    %175 = vector.broadcast %cst_60 : f32 to vector<16x1xf32>
    %176 = arith.divf %174, %175 : vector<16x1xf32>
    %177 = vector.broadcast %169 : vector<16x1xf32> to vector<16x32xf32>
    %178 = arith.subf %165, %177 : vector<16x32xf32>
    %cst_61 = arith.constant 9.99999997E-7 : f32
    %179 = vector.broadcast %cst_61 : f32 to vector<16x1xf32>
    %180 = arith.addf %176, %179 : vector<16x1xf32>
    %181 = math.rsqrt %180 : vector<16x1xf32>
    %182 = vector.broadcast %181 : vector<16x1xf32> to vector<16x32xf32>
    %183 = arith.mulf %178, %182 : vector<16x32xf32>
    %184 = vector.broadcast %20 : vector<1x32xf32> to vector<16x32xf32>
    %185 = arith.mulf %183, %184 : vector<16x32xf32>
    %186 = vector.broadcast %21 : vector<1x32xf32> to vector<16x32xf32>
    %187 = arith.addf %185, %186 : vector<16x32xf32>
    %188 = arith.truncf %187 : vector<16x32xf32> to vector<16x32xbf16>
    %cst_62 = arith.constant dense<0.000000e+00> : vector<16x64xf32>
    %189 = tpu.matmul %188, %8, %cst_62 {dimension_numbers = #tpu.dot_dimension_numbers<[1], [0], [0], [1], [0, 0, 1, 1], [], []>} : vector<16x32xbf16>, vector<32x64xbf16>, vector<16x64xf32> -> vector<16x64xf32>
    %190 = vector.broadcast %9 : vector<1x64xf32> to vector<16x64xf32>
    %191 = arith.addf %189, %190 : vector<16x64xf32>
    %cst_63 = arith.constant 0.000000e+00 : f32
    %192 = vector.broadcast %cst_63 : f32 to vector<16x64xf32>
    %193 = arith.maximumf %191, %192 : vector<16x64xf32>
    %194 = arith.truncf %193 : vector<16x64xf32> to vector<16x64xbf16>
    %cst_64 = arith.constant dense<0.000000e+00> : vector<16x32xf32>
    %195 = tpu.matmul %194, %10, %cst_64 {dimension_numbers = #tpu.dot_dimension_numbers<[1], [0], [0], [1], [0, 0, 1, 1], [], []>} : vector<16x64xbf16>, vector<64x32xbf16>, vector<16x32xf32> -> vector<16x32xf32>
    %196 = vector.broadcast %24 : vector<1x32xf32> to vector<16x32xf32>
    %197 = arith.addf %195, %196 : vector<16x32xf32>
    %198 = arith.addf %197, %165 : vector<16x32xf32>
    %199 = vector.shape_cast %198 : vector<16x32xf32> to vector<2x8x32xf32>
    %c0_65 = arith.constant 0 : index
    %c0_66 = arith.constant 0 : index
    %c0_67 = arith.constant 0 : index
    %200 = vector.load %arg17[%c0_65, %c0_66, %c0_67] : memref<2x8x32xf32, #tpu.memory_space<vmem>>, vector<2x8x32xf32>
    tpu.vector_store %arg17[%c0_65, %c0_66, %c0_67], %199 {strides = array<i32>} : memref<2x8x32xf32, #tpu.memory_space<vmem>>, vector<2x8x32xf32>,
    %c0_68 = arith.constant 0 : index
    %c0_69 = arith.constant 0 : index
    %c0_70 = arith.constant 0 : index
    %201 = vector.load %arg18[%c0_68, %c0_69, %c0_70] : memref<2x8x16xf32, #tpu.memory_space<vmem>>, vector<2x8x16xf32>
    tpu.vector_store %arg18[%c0_68, %c0_69, %c0_70], %164 {strides = array<i32>} : memref<2x8x16xf32, #tpu.memory_space<vmem>>, vector<2x8x16xf32>,
    return
  }
  func.func @transform_0(%arg0: i32) -> (i32, i32, i32) {
    %c0_i32 = arith.constant 0 : i32
    %c0_i32_0 = arith.constant 0 : i32
    %c0_i32_1 = arith.constant 0 : i32
    return %arg0, %c0_i32, %c0_i32_0 : i32, i32, i32
  }
  func.func @transform_1(%arg0: i32) -> (i32, i32, i32) {
    %c0_i32 = arith.constant 0 : i32
    %c0_i32_0 = arith.constant 0 : i32
    %c0_i32_1 = arith.constant 0 : i32
    return %arg0, %c0_i32, %c0_i32_0 : i32, i32, i32
  }
  func.func @transform_2(%arg0: i32) -> (i32, i32, i32) {
    %c0_i32 = arith.constant 0 : i32
    %c0_i32_0 = arith.constant 0 : i32
    %c0_i32_1 = arith.constant 0 : i32
    return %arg0, %c0_i32, %c0_i32_0 : i32, i32, i32
  }
  func.func @transform_3(%arg0: i32) -> (i32, i32, i32) {
    %c0_i32 = arith.constant 0 : i32
    %c0_i32_0 = arith.constant 0 : i32
    %c0_i32_1 = arith.constant 0 : i32
    return %arg0, %c0_i32, %c0_i32_0 : i32, i32, i32
  }
  func.func @transform_4(%arg0: i32) -> (i32, i32) {
    %c0_i32 = arith.constant 0 : i32
    %c0_i32_0 = arith.constant 0 : i32
    %c0_i32_1 = arith.constant 0 : i32
    return %c0_i32, %c0_i32_0 : i32, i32
  }
  func.func @transform_5(%arg0: i32) -> (i32, i32) {
    %c0_i32 = arith.constant 0 : i32
    %c0_i32_0 = arith.constant 0 : i32
    %c0_i32_1 = arith.constant 0 : i32
    return %c0_i32, %c0_i32_0 : i32, i32
  }
  func.func @transform_6(%arg0: i32) -> (i32, i32) {
    %c0_i32 = arith.constant 0 : i32
    %c0_i32_0 = arith.constant 0 : i32
    %c0_i32_1 = arith.constant 0 : i32
    return %c0_i32, %c0_i32_0 : i32, i32
  }
  func.func @transform_7(%arg0: i32) -> (i32, i32) {
    %c0_i32 = arith.constant 0 : i32
    %c0_i32_0 = arith.constant 0 : i32
    %c0_i32_1 = arith.constant 0 : i32
    return %c0_i32, %c0_i32_0 : i32, i32
  }
  func.func @transform_8(%arg0: i32) -> (i32, i32) {
    %c0_i32 = arith.constant 0 : i32
    %c0_i32_0 = arith.constant 0 : i32
    %c0_i32_1 = arith.constant 0 : i32
    return %c0_i32, %c0_i32_0 : i32, i32
  }
  func.func @transform_9(%arg0: i32) -> (i32, i32) {
    %c0_i32 = arith.constant 0 : i32
    %c0_i32_0 = arith.constant 0 : i32
    %c0_i32_1 = arith.constant 0 : i32
    return %c0_i32, %c0_i32_0 : i32, i32
  }
  func.func @transform_10(%arg0: i32) -> (i32, i32) {
    %c0_i32 = arith.constant 0 : i32
    %c0_i32_0 = arith.constant 0 : i32
    %c0_i32_1 = arith.constant 0 : i32
    return %c0_i32, %c0_i32_0 : i32, i32
  }
  func.func @transform_11(%arg0: i32) -> (i32, i32) {
    %c0_i32 = arith.constant 0 : i32
    %c0_i32_0 = arith.constant 0 : i32
    %c0_i32_1 = arith.constant 0 : i32
    return %c0_i32, %c0_i32_0 : i32, i32
  }
  func.func @transform_12(%arg0: i32) -> (i32, i32) {
    %c0_i32 = arith.constant 0 : i32
    %c0_i32_0 = arith.constant 0 : i32
    %c0_i32_1 = arith.constant 0 : i32
    return %c0_i32, %c0_i32_0 : i32, i32
  }
  func.func @transform_13(%arg0: i32) -> (i32, i32) {
    %c0_i32 = arith.constant 0 : i32
    %c0_i32_0 = arith.constant 0 : i32
    %c0_i32_1 = arith.constant 0 : i32
    return %c0_i32, %c0_i32_0 : i32, i32
  }
  func.func @transform_14(%arg0: i32) -> (i32, i32) {
    %c0_i32 = arith.constant 0 : i32
    %c0_i32_0 = arith.constant 0 : i32
    %c0_i32_1 = arith.constant 0 : i32
    return %c0_i32, %c0_i32_0 : i32, i32
  }
  func.func @transform_15(%arg0: i32) -> (i32, i32) {
    %c0_i32 = arith.constant 0 : i32
    %c0_i32_0 = arith.constant 0 : i32
    %c0_i32_1 = arith.constant 0 : i32
    return %c0_i32, %c0_i32_0 : i32, i32
  }
  func.func @transform_16(%arg0: i32) -> (i32, i32, i32) {
    %c0_i32 = arith.constant 0 : i32
    %c0_i32_0 = arith.constant 0 : i32
    %c0_i32_1 = arith.constant 0 : i32
    return %arg0, %c0_i32, %c0_i32_0 : i32, i32, i32
  }
  func.func @transform_17(%arg0: i32) -> (i32, i32, i32) {
    %c0_i32 = arith.constant 0 : i32
    %c0_i32_0 = arith.constant 0 : i32
    %c0_i32_1 = arith.constant 0 : i32
    return %arg0, %c0_i32, %c0_i32_0 : i32, i32, i32
  }
}

</mosaic_0001>

<bundles_post_ra>
// kernel: tpu_custom_call.1
= control target key start
LH: loop header
LB: loop body
LE: loop exit
PB: predicated region body
PF: predicated region fallthrough
CT: control target
= control target key end

     0   :  { %s7707_s0 = inlined_call_operand.vmem [shape: f32[2,8,32], index: 0, kind: input, shape index: {}]   ;;  %s7708_s1 = inlined_call_operand.vmem [shape: f32[2,16,32], index: 1, kind: input, shape index: {}]   ;;  %s7709_s2 = inlined_call_operand.hbm [shape: f32[2,8,8], index: 2, kind: input, shape index: {}]   ;;  %s7710_s3 = inlined_call_operand.vmem [shape: f32[2,1,16], index: 3, kind: input, shape index: {}]   ;;  %s7711_s4 = inlined_call_operand.hbm [shape: bf16[32,96], index: 4, kind: input, shape index: {}]   ;;  %s7712_s5 = inlined_call_operand.vmem [shape: f32[1,96], index: 5, kind: input, shape index: {}]   ;;  %s7713_s6 = inlined_call_operand.hbm [shape: bf16[32,32], index: 6, kind: input, shape index: {}]   ;;  %s7714_s7 = inlined_call_operand.hbm [shape: bf16[32,32], index: 7, kind: input, shape index: {}]   ;;  %s7715_s8 = inlined_call_operand.vmem [shape: f32[1,32], index: 8, kind: input, shape index: {}]   ;;  %s7716_s9 = inlined_call_operand.hbm [shape: bf16[32,64], index: 9, kind: input, shape index: {}]   ;;  %s7717_s10 = inlined_call_operand.vmem [shape: f32[1,64], index: 10, kind: input, shape index: {}]   ;;  %s7718_s11 = inlined_call_operand.hbm [shape: bf16[32,32], index: 11, kind: input, shape index: {}]   ;;  %s7719_s12 = inlined_call_operand.hbm [shape: bf16[32,64], index: 12, kind: input, shape index: {}]   ;;  %s7720_s13 = inlined_call_operand.vmem [shape: f32[1,64], index: 13, kind: input, shape index: {}]   ;;  %s7721_s14 = inlined_call_operand.vmem [shape: bf16[64,32], index: 14, kind: input, shape index: {}]   ;;  %s7722_s15 = inlined_call_operand.hbm [shape: f32[9,32], index: 15, kind: input, shape index: {}]   ;;  %s7723_s16 = inlined_call_operand.hbm [shape: f32[2,8,32], index: 16, kind: output, shape index: {0}]   ;;  %s7724_s17 = inlined_call_operand.hbm [shape: f32[2,8,16], index: 17, kind: output, shape index: {1}]  }
   0x1   :  { %7727 = sst [smem:[#allocation26_spill]] %s7707_s0 }
   0x2   :  { %7728 = sst [smem:[#allocation27_spill]] %s7708_s1 }
   0x3   :  { %23 = vsyncpa [#allocation3], 0 }
   0x4   :  { %24 = vsyncpa [#allocation6], 0 }
   0x5   :  { %25 = vsyncpa [#allocation9], 0 }
   0x6   :  { %26 = vsyncpa [#allocation12], 0 }
   0x7   :  { %27 = vsyncpa [#allocation15], 0 }
   0x8   :  { %28 = vsyncpa [#allocation4], 0 }
   0x9   :  { %29 = vsyncpa [#allocation18], 0  ;;  %s6323_s24 = smov [#allocation5]  }
   0xa   :  { %s53_s25 = sshll.u32 %s6323_s24, 4  ;;  %s54_s25 = int_to_ptr.vmem [resolvable:$true] %s53_s25 }
   0xb   :  { %s6117_s26 = scalar_lea.vmem %s54_s25, 256  ;;  %p6122_p1 = scmp.lt.s32.totalorder %s54_s25, %s54_s25 }
   0xc   :  { %p6118_p0 = scmp.ne.s32.totalorder %s54_s25, %s6117_s26  ;;  %p6123_p2 = scmp.lt.s32.totalorder %s6117_s26, %s6117_s26 }
   0xe   :  { %p6124_p3 = por %p6123_p2, %p6122_p1 }
  0x10   :  { %p6125_p4 = pnand %p6124_p3, %p6118_p0 }
  0x12   :  { %6128 = shalt.err (!%p6125_p4)
}
  0x13   :  { %s6324_s27 = smov 64   ;;  %s6325_s28 = smov 4  }
  0x14   :  { %59 = dma.hbm_to_vmem [thread:$0]  %s7711_s4, 256, %s54_s25, [#allocation6], %s6324_s27, %s6324_s27, %s6325_s28  }
  0x15   :  { %s6326_s30 = smov [#allocation8]   ;;  %s6327_s19 = smov [#allocation11]  }
  0x16   :  { %s79_s18 = sshll.u32 %s6326_s30, 4  ;;  %s107_s1 = sshll.u32 %s6327_s19, 4  ;;  %s80_s18 = int_to_ptr.vmem [resolvable:$true] %s79_s18  ;;  %s108_s1 = int_to_ptr.vmem [resolvable:$true] %s107_s1 }
  0x17   :  { %s6137_s20 = scalar_lea.vmem %s80_s18, 256  ;;  %p6142_p6 = scmp.lt.s32.totalorder %s80_s18, %s80_s18 }
  0x18   :  { %p6138_p5 = scmp.ne.s32.totalorder %s80_s18, %s6137_s20  ;;  %p6143_p7 = scmp.lt.s32.totalorder %s6137_s20, %s6137_s20 }
  0x1a   :  { %p6144_p8 = por %p6143_p7, %p6142_p6 }
  0x1c   :  { %p6145_p9 = pnand %p6144_p8, %p6138_p5 }
  0x1e   :  { %6148 = shalt.err (!%p6145_p9)
}
  0x1f   :  { %85 = dma.hbm_to_vmem [thread:$0]  %s7714_s7, 256, %s80_s18, [#allocation9], %s6324_s27, %s6324_s27, %s6325_s28  }
  0x20   :  { %s6157_s4 = scalar_lea.vmem %s108_s1, 256  ;;  %p6162_p11 = scmp.lt.s32.totalorder %s108_s1, %s108_s1 }
  0x21   :  { %p6158_p10 = scmp.ne.s32.totalorder %s108_s1, %s6157_s4  ;;  %p6163_p12 = scmp.lt.s32.totalorder %s6157_s4, %s6157_s4 }
  0x23   :  { %p6164_p13 = por %p6163_p12, %p6162_p11 }
  0x25   :  { %p6165_p0 = pnand %p6164_p13, %p6158_p10 }
  0x27   :  { %6168 = shalt.err (!%p6165_p0)
}
  0x28   :  { %113 = dma.hbm_to_vmem [thread:$0]  %s7718_s11, 256, %s108_s1, [#allocation12], %s6324_s27, %s6324_s27, %s6325_s28  }
  0x29   :  { %s6328_s25 = smov [#allocation2]  }
  0x2a   :  { %s39_s26 = sshll.u32 %s6328_s25, 4  ;;  %s40_s26 = int_to_ptr.vmem [resolvable:$true] %s39_s26 }
  0x2b   :  { %s6177_s29 = scalar_lea.vmem %s40_s26, 256  ;;  %p6182_p2 = scmp.lt.s32.totalorder %s40_s26, %s40_s26 }
  0x2c   :  { %p6178_p1 = scmp.ne.s32.totalorder %s40_s26, %s6177_s29  ;;  %p6183_p3 = scmp.lt.s32.totalorder %s6177_s29, %s6177_s29 }
  0x2e   :  { %p6184_p4 = por %p6183_p3, %p6182_p2 }
  0x30   :  { %p6185_p5 = pnand %p6184_p4, %p6178_p1 }
  0x32   :  { %6188 = shalt.err (!%p6185_p5)
}
  0x33   :  { %s6329_s7 = smov 128   ;;  %s6330_s0 = smov 8  }
  0x34   :  { %45 = dma.hbm_to_vmem [thread:$0]  %s7709_s2, 256, %s40_s26, [#allocation3], %s6329_s7, %s6329_s7, %s6330_s0  }
  0x35   :  { %s6331_s11 = smov [#allocation7]   ;;  %s6332_s1 = smov [#allocation10]  }
  0x36   :  { %s67_s19 = sshll.u32 %s6331_s11, 4  ;;  %s93_s20 = sshll.u32 %s6332_s1, 4  ;;  %s68_s19 = int_to_ptr.vmem [resolvable:$true] %s67_s19  ;;  %s94_s20 = int_to_ptr.vmem [resolvable:$true] %s93_s20 }
  0x37   :  { %s6197_s21 = scalar_lea.vmem %s68_s19, 256  ;;  %p6202_p7 = scmp.lt.s32.totalorder %s68_s19, %s68_s19 }
  0x38   :  { %p6198_p6 = scmp.ne.s32.totalorder %s68_s19, %s6197_s21  ;;  %p6203_p8 = scmp.lt.s32.totalorder %s6197_s21, %s6197_s21 }
  0x3a   :  { %p6204_p9 = por %p6203_p8, %p6202_p7 }
  0x3c   :  { %p6205_p10 = pnand %p6204_p9, %p6198_p6 }
  0x3e   :  { %6208 = shalt.err (!%p6205_p10)
}
  0x3f   :  { %73 = dma.hbm_to_vmem [thread:$0]  %s7713_s6, 256, %s68_s19, [#allocation6], %s6324_s27, %s6324_s27, %s6325_s28  }
  0x40   :  { %s6217_s2 = scalar_lea.vmem %s94_s20, 256  ;;  %p6222_p12 = scmp.lt.s32.totalorder %s94_s20, %s94_s20 }
  0x41   :  { %p6218_p11 = scmp.ne.s32.totalorder %s94_s20, %s6217_s2  ;;  %p6223_p13 = scmp.lt.s32.totalorder %s6217_s2, %s6217_s2 }
  0x43   :  { %p6224_p0 = por %p6223_p13, %p6222_p12 }
  0x45   :  { %p6225_p1 = pnand %p6224_p0, %p6218_p11 }
  0x47   :  { %6228 = shalt.err (!%p6225_p1)
}
  0x48   :  { %99 = dma.hbm_to_vmem [thread:$0]  %s7716_s9, 256, %s94_s20, [#allocation9], %s6324_s27, %s6324_s27, %s6325_s28  }
  0x49   :  { %s6333_s25 = smov [#allocation13]   ;;  %s6334_s29 = smov [#allocation14]  }
  0x4a   :  { %s119_s26 = sshll.u32 %s6333_s25, 4  ;;  %s135_s30 = sshll.u32 %s6334_s29, 4  ;;  %s120_s26 = int_to_ptr.vmem [resolvable:$true] %s119_s26  ;;  %s136_s30 = int_to_ptr.vmem [resolvable:$true] %s135_s30 }
  0x4b   :  { %s6237_s6 = scalar_lea.vmem %s120_s26, 256  ;;  %p6242_p3 = scmp.lt.s32.totalorder %s120_s26, %s120_s26 }
  0x4c   :  { %p6238_p2 = scmp.ne.s32.totalorder %s120_s26, %s6237_s6  ;;  %p6243_p4 = scmp.lt.s32.totalorder %s6237_s6, %s6237_s6 }
  0x4e   :  { %p6244_p5 = por %p6243_p4, %p6242_p3 }
  0x50   :  { %p6245_p6 = pnand %p6244_p5, %p6238_p2 }
  0x52   :  { %6248 = shalt.err (!%p6245_p6)
}
  0x53   :  { %125 = dma.hbm_to_vmem [thread:$0]  %s7719_s12, 256, %s120_s26, [#allocation12], %s6324_s27, %s6324_s27, %s6325_s28  }
  0x54   :  { %s6257_s9 = scalar_lea.vmem %s136_s30, 256  ;;  %p6262_p8 = scmp.lt.s32.totalorder %s136_s30, %s136_s30 }
  0x55   :  { %p6258_p7 = scmp.ne.s32.totalorder %s136_s30, %s6257_s9  ;;  %p6263_p9 = scmp.lt.s32.totalorder %s6257_s9, %s6257_s9 }
  0x57   :  { %p6264_p10 = por %p6263_p9, %p6262_p8 }
  0x59   :  { %p6265_p11 = pnand %p6264_p10, %p6258_p7 }
  0x5b   :  { %6268 = shalt.err (!%p6265_p11)
}
  0x5c   :  { %141 = dma.hbm_to_vmem [thread:$0]  %s7722_s15, 256, %s136_s30, [#allocation15], %s6329_s7, %s6329_s7, %s6330_s0  }
  0x5d   :  { %6309 = dma.done.wait [#allocation3], 256  }
  0x5e   :  { %6310 = vsyncadd [#allocation3], 4294967040 }
  0x5f   :  { %6311 = dma.done.wait [#allocation6], 512  }
  0x60   :  { %6312 = vsyncadd [#allocation6], 4294966784 }
  0x61   :  { %6313 = dma.done.wait [#allocation9], 512  }
  0x62   :  { %6314 = vsyncadd [#allocation9], 4294966784 }
  0x63   :  { %6315 = dma.done.wait [#allocation12], 512  }
  0x64   :  { %6316 = vsyncadd [#allocation12], 4294966784 }
  0x65   :  { %6317 = dma.done.wait [#allocation15], 256  }
  0x66   :  { %6318 = vsyncadd [#allocation15], 4294967040  ;;  %vm215_vm0 = vcmask 261120   ;;  %s7729_s20 = sld [smem:[#allocation26_spill]]  ;;  %v6013_v14 = vld [vmem:[#allocation5 + $0x8] sm:$0xff]   ;;  %v6335_v15 = vmov 0.0   ;;  %v243_v23 = vlaneseq }
  0x67   :  { %5707 = vmatprep.subr.bf16.mxu1 %v6335_v15  ;;  %vm6336_vm1 = vmmov 0   ;;  %v6014_v16 = vld [vmem:[#allocation5] sm:$0xff]   ;;  %5721 = vmatprep.subr.bf16.mxu0 %v6335_v15  ;;  %v5516_v39 = vld [vmem:[%s7712_s5] ss:$0 sm:$0xff]  ;;  %s6337_s2 = smov 112   ;;  %s6338_s23 = smov 120  }
  0x68   :  { %5711 = vmatprep.mubr.msk.bf16.mxu1 %vm6336_vm1, %v6335_v15  ;;  %5708 = vmatpush3.bf16.msra.mxu1 %v6013_v14  ;;  %v6503_v24 = vshrl.u32 %v243_v23, 7  ;;  %v203_v26 = vld [vmem:[#allocation14] sm:$0xff]  ;;  %s6339_s24 = smov 104   ;;  %s6340_s5 = smov 96   ;;  %v6341_v52 = vmov 1983009808  }
  0x69   :  { %5709 = vmatprep.subr.bf16.mxu1 %v6335_v15  ;;  %5723 = vmatprep.mubr.msk.bf16.mxu0 %vm6336_vm1, %v6335_v15  ;;  %v341_v53 = vunpack.c.l.s4 %v6341_v52  ;;  %v6342_v55 = vmov 1934713408   ;;  %vm1218_vm2 = vcmask 64512   ;;  %vm1702_vm3 = vcmask 1043456   ;;  %s6344_s25 = smov 24   ;;  %s7730_s9 = sld [smem:[#allocation27_spill]] }
  0x6a   :  { %v245_v25 = vsub.s32 0, %v6503_v24  ;;  %v251_v30 = vsub.s32 1, %v6503_v24  ;;  %v373_v56 = vunpack.c.l.s4 %v6342_v55  ;;  %vm2366_vm4 = vcmask 130048  }
  0x6b   :  { %v342_v54 = vunpack.c.0.s8 %v341_v53  ;;  %vm2369_vm5 = vcmask 195584   ;;  %vm5428_vm6 = vcmask 523264  }
  0x6c   :  { %v205_v0 = vld [vmem:[%s7729_s20] sm:$0xff]  ;;  %v206_v1 = vld [vmem:[%s7729_s20 + $0x8] sm:$0xff]  ;;  %5710 = vmatpush3.bf16.msra.mxu1 %v6014_v16  ;;  %v246_v29 = vrot.slane %v203_v26, %v245_v25  ;;  %v252_v34 = vrot.slane %v203_v26, %v251_v30  ;;  %v374_v62 = vunpack.c.0.s8 %v373_v56 }
  0x6d   :  { %v216_v2 = vsel %vm215_vm0, %v205_v0, 0.0  ;;  %v219_v3 = vsel %vm215_vm0, %v206_v1, 0.0  ;;  %5715 = vmatprep.subr.bf16.mxu1 %v6335_v15  ;;  %v6562_v59 = vsub.s32 %v342_v54, %v6503_v24 }
  0x6e   :  { %217 = vadd.xlane.f32.xlu0 %v216_v2 }
  0x72   :  { %220 = vadd.xlane.f32.xlu0 %v219_v3  ;;  %v6573_v3 = vsub.s32 %v374_v62, %v6503_v24 }
  0xf7   :  { %v218_v4 = vpop.xlane.xlu0 %217 }
  0xf8   :  { %v223_v5 = vmul.f32 0.03125, %v218_v4 }
  0xfa   :  { %v225_v6 = vsub.f32 %v205_v0, %v223_v5 }
  0xfb   :  { %v221_v7 = vpop.xlane.xlu0 %220 }
  0xfc   :  { %v224_v8 = vmul.f32 0.03125, %v221_v7  ;;  %v227_v9 = vmul.f32 %v225_v6, %v225_v6 }
  0xfe   :  { %v226_v10 = vsub.f32 %v206_v1, %v224_v8  ;;  %v229_v11 = vsel %vm215_vm0, %v227_v9, 0.0 }
  0xff   :  { %230 = vadd.xlane.f32.xlu1 %v229_v11 }
 0x100   :  { %v228_v12 = vmul.f32 %v226_v10, %v226_v10 }
 0x102   :  { %v232_v13 = vsel %vm215_vm0, %v228_v12, 0.0 }
 0x103   :  { %233 = vadd.xlane.f32.xlu1 %v232_v13 }
 0x188   :  { %v231_v17 = vpop.xlane.xlu1 %230 }
 0x189   :  { %v235_v18 = vmul.f32 0.03125, %v231_v17 }
 0x18b   :  { %v237_v19 = vadd.f32 1e-06, %v235_v18 }
 0x18c   :  { %v234_v20 = vpop.xlane.xlu1 %233 }
 0x18d   :  { %6029 = vrsqrt.f32 %v237_v19  ;;  %v236_v21 = vmul.f32 0.03125, %v234_v20 }
 0x18f   :  { %v238_v22 = vadd.f32 1e-06, %v236_v21 }
 0x191   :  { %6031 = vrsqrt.f32 %v238_v22 }
 0x19a   :  { %v6030_v27 = vpop.eup %6029 }
 0x19b   :  { %v241_v28 = vmul.f32 %v6030_v27, %v225_v6 }
 0x19d   :  { %v247_v33 = vmul.f32 %v246_v29, %v241_v28 }
 0x19e   :  { %v6032_v31 = vpop.eup %6031 }
 0x19f   :  { %v242_v32 = vmul.f32 %v6032_v31, %v226_v10  ;;  %v253_v36 = vadd.f32 %v252_v34, %v247_v33 }
 0x1a1   :  { %v248_v35 = vmul.f32 %v246_v29, %v242_v32 }
 0x1a3   :  { %v254_v37 = vadd.f32 %v252_v34, %v248_v35 }
 0x1a5   :  { %v255_v38 = vpack.c.bf16 %v254_v37, %v253_v36 }
 0x1a7   :  { %5712 = vmatmul.mubr.msk.bf16.vlgmr.msra.gmra.mxu1 %vm215_vm0, %v255_v38 }
 0x1a8   :  { %5717 = vmatprep.mubr.msk.bf16.mxu1 %vm6336_vm1, %v6335_v15 }
 0x267   :  { %v311_v40 = vpop.f32.mrf.mxu1 }
 0x268   :  { %v6513_v41 = vadd.f32 %v5516_v39, %v311_v40 }
 0x269   :  { %v5713_v42 = vpop.f32.mrf.mxu1 }
 0x26a   :  { %326 = vrot.lane.b32.xlu1 %v6513_v41, %s6337_s2  ;;  %320 = vrot.lane.b32.xlu0 %v6513_v41, %s6338_s23 }
 0x26b   :  { %v314_v43 = vpop.f32.mrf.mxu1 }
 0x26c   :  { %v6519_v44 = vadd.f32 %v5516_v39, %v314_v43 }
 0x26d   :  { %v5714_v45 = vpop.f32.mrf.mxu1 }
 0x26e   :  { %332 = vrot.lane.b32.xlu1 %v6513_v41, %s6339_s24  ;;  %328 = vrot.lane.b32.xlu0 %v6519_v44, %s6337_s2 }
 0x272   :  { %610 = vrot.lane.b32.xlu0 %v6513_v41, %s6340_s5  ;;  %322 = vrot.lane.b32.xlu1 %v6519_v44, %s6338_s23 }
 0x276   :  { %334 = vrot.lane.b32.xlu1 %v6519_v44, %s6339_s24 }
 0x2dc   :  { %v6531_v46 = vpop.permute.xlu1 %326  ;;  %v6533_v47 = vpop.permute.xlu0 %320 }
 0x2dd   :  { %618 = vrot.lane.b32.xlu0 %v6531_v46, %s6340_s5  ;;  %614 = vrot.lane.b32.xlu1 %v6533_v47, %s6340_s5  ;;  %v338_v60 = vcombine.low %v6513_v41, %v6531_v46  ;;  %v339_v61 = vcombine.high %v6513_v41, %v6531_v46 }
 0x2df   :  { %v346_v1 = vrot.slane %v338_v60, %v6562_v59  ;;  %v353_v2 = vrot.slane %v339_v61, %v6562_v59 }
 0x2e0   :  { %v6539_v48 = vpop.permute.xlu1 %332  ;;  %v6545_v49 = vpop.permute.xlu0 %328 }
 0x2e1   :  { %612 = vrot.lane.b32.xlu0 %v6519_v44, %s6340_s5  ;;  %622 = vrot.lane.b32.xlu1 %v6539_v48, %s6340_s5  ;;  %v354_v57 = vcombine.low %v6533_v47, %v6539_v48  ;;  %v355_v58 = vcombine.high %v6533_v47, %v6539_v48  ;;  %v406_v20 = vcombine.low %v6519_v44, %v6545_v49 }
 0x2e2   :  { %v407_v21 = vcombine.high %v6519_v44, %v6545_v49 }
 0x2e3   :  { %v362_v63 = vrot.slane %v354_v57, %v6562_v59  ;;  %v369_v0 = vrot.slane %v355_v58, %v6562_v59  ;;  %v414_v35 = vrot.slane %v406_v20, %v6562_v59 }
 0x2e4   :  { %v6547_v50 = vpop.permute.xlu1 %322  ;;  %v611_v8 = vpop.permute.xlu0 %610  ;;  %v6601_v36 = vrot.slane %v407_v21, %v6562_v59 }
 0x2e5   :  { %620 = vrot.lane.b32.xlu0 %v6545_v49, %s6340_s5  ;;  %616 = vrot.lane.b32.xlu1 %v6547_v50, %s6340_s5  ;;  %v370_v4 = vcombine.low %v346_v1, %v362_v63  ;;  %v371_v5 = vcombine.high %v346_v1, %v362_v63  ;;  %v386_v6 = vcombine.low %v353_v2, %v369_v0 }
 0x2e6   :  { %v387_v7 = vcombine.high %v353_v2, %v369_v0 }
 0x2e7   :  { %v378_v9 = vrot.slane %v370_v4, %v6573_v3  ;;  %v385_v10 = vrot.slane %v371_v5, %v6573_v3  ;;  %v394_v11 = vrot.slane %v386_v6, %v6573_v3 }
 0x2e8   :  { %v6553_v51 = vpop.permute.xlu1 %334  ;;  %v401_v12 = vrot.slane %v387_v7, %v6573_v3 }
 0x2e9   :  { %624 = vrot.lane.b32.xlu1 %v6553_v51, %s6340_s5  ;;  %v474_v16 = vcombine.low %v378_v9, %v385_v10  ;;  %v5520_v17 = vcombine.high %v378_v9, %v385_v10  ;;  %v422_v22 = vcombine.low %v6547_v50, %v6553_v51  ;;  %v423_v23 = vcombine.high %v6547_v50, %v6553_v51 }
 0x2ea   :  { %v490_v18 = vcombine.low %v394_v11, %v401_v12  ;;  %v5521_v19 = vcombine.high %v394_v11, %v401_v12 }
 0x2eb   :  { %v6588_v29 = vrot.slane %v474_v16, %v6562_v59  ;;  %v6591_v30 = vrot.slane %v5520_v17, %v6562_v59  ;;  %v430_v37 = vrot.slane %v422_v22, %v6562_v59  ;;  %v6605_v38 = vrot.slane %v423_v23, %v6562_v59 }
 0x2ec   :  { %v6594_v31 = vrot.slane %v490_v18, %v6562_v59  ;;  %v6597_v32 = vrot.slane %v5521_v19, %v6562_v59 }
 0x2ed   :  { %v506_v52 = vcombine.low %v6588_v29, %v6591_v30  ;;  %v507_v54 = vcombine.high %v6588_v29, %v6591_v30  ;;  %v438_v62 = vcombine.low %v414_v35, %v430_v37  ;;  %v439_v63 = vcombine.high %v414_v35, %v430_v37 }
 0x2ee   :  { %v522_v53 = vcombine.low %v6594_v31, %v6597_v32  ;;  %v523_v55 = vcombine.high %v6594_v31, %v6597_v32  ;;  %v454_v0 = vcombine.low %v6601_v36, %v6605_v38  ;;  %v455_v1 = vcombine.high %v6601_v36, %v6605_v38 }
 0x2ef   :  { %v514_v10 = vrot.slane %v506_v52, %v6573_v3  ;;  %v6630_v17 = vrot.slane %v438_v62, %v6573_v3  ;;  %v6633_v18 = vrot.slane %v439_v63, %v6573_v3 }
 0x2f0   :  { %v530_v11 = vrot.slane %v522_v53, %v6573_v3  ;;  %v469_v62 = vrot.slane %v455_v1, %v6573_v3 }
 0x34f   :  { %v619_v13 = vpop.permute.xlu0 %618  ;;  %v615_v14 = vpop.permute.xlu1 %614 }
 0x350   :  { %v634_v25 = vcombine.low %v611_v8, %v619_v13  ;;  %v635_v26 = vcombine.high %v611_v8, %v619_v13 }
 0x352   :  { %v642_v39 = vrot.slane %v634_v25, %v6562_v59  ;;  %v649_v40 = vrot.slane %v635_v26, %v6562_v59 }
 0x353   :  { %v613_v27 = vpop.permute.xlu0 %612  ;;  %v623_v28 = vpop.permute.xlu1 %622 }
 0x354   :  { %v650_v33 = vcombine.low %v615_v14, %v623_v28  ;;  %v651_v34 = vcombine.high %v615_v14, %v623_v28 }
 0x356   :  { %v658_v42 = vrot.slane %v650_v33, %v6562_v59  ;;  %v665_v43 = vrot.slane %v651_v34, %v6562_v59 }
 0x357   :  { %v617_v45 = vpop.permute.xlu1 %616  ;;  %v621_v61 = vpop.permute.xlu0 %620 }
 0x358   :  { %v666_v56 = vcombine.low %v642_v39, %v658_v42  ;;  %v667_v57 = vcombine.high %v642_v39, %v658_v42  ;;  %v682_v58 = vcombine.low %v649_v40, %v665_v43  ;;  %v683_v60 = vcombine.high %v649_v40, %v665_v43 }
 0x359   :  { %v702_v7 = vcombine.low %v613_v27, %v621_v61  ;;  %v703_v8 = vcombine.high %v613_v27, %v621_v61  ;;  %v462_v61 = vrot.slane %v454_v0, %v6573_v3 }
 0x35a   :  { %v674_v2 = vrot.slane %v666_v56, %v6573_v3  ;;  %v681_v4 = vrot.slane %v667_v57, %v6573_v3  ;;  %v690_v5 = vrot.slane %v682_v58, %v6573_v3  ;;  %v697_v6 = vrot.slane %v683_v60, %v6573_v3 }
 0x35b   :  { %v625_v9 = vpop.permute.xlu1 %624  ;;  %v710_v26 = vrot.slane %v702_v7, %v6562_v59  ;;  %v717_v27 = vrot.slane %v703_v8, %v6562_v59 }
 0x35c   :  { %v770_v12 = vcombine.low %v674_v2, %v681_v4  ;;  %v5524_v13 = vcombine.high %v674_v2, %v681_v4  ;;  %v786_v14 = vcombine.low %v690_v5, %v697_v6  ;;  %v5525_v16 = vcombine.high %v690_v5, %v697_v6 }
 0x35d   :  { %v718_v19 = vcombine.low %v617_v45, %v625_v9  ;;  %v719_v20 = vcombine.high %v617_v45, %v625_v9 }
 0x35e   :  { %v777_v21 = vrot.slane %v770_v12, %v6562_v59  ;;  %v785_v22 = vrot.slane %v5524_v13, %v6562_v59  ;;  %v793_v23 = vrot.slane %v786_v14, %v6562_v59  ;;  %v801_v25 = vrot.slane %v5525_v16, %v6562_v59 }
 0x35f   :  { %v726_v28 = vrot.slane %v718_v19, %v6562_v59  ;;  %v733_v33 = vrot.slane %v719_v20, %v6562_v59  ;;  %v538_v12 = vcombine.low %v514_v10, %v530_v11 }
 0x360   :  { %v802_v34 = vcombine.low %v777_v21, %v785_v22  ;;  %v818_v35 = vcombine.low %v793_v23, %v801_v25  ;;  %v803_v36 = vcombine.high %v777_v21, %v785_v22  ;;  %v819_v37 = vcombine.high %v793_v23, %v801_v25 }
 0x361   :  { %v734_v38 = vcombine.low %v710_v26, %v726_v28  ;;  %v735_v39 = vcombine.high %v710_v26, %v726_v28  ;;  %v750_v40 = vcombine.low %v717_v27, %v733_v33  ;;  %v751_v42 = vcombine.high %v717_v27, %v733_v33 }
 0x362   :  { %v810_v43 = vrot.slane %v802_v34, %v6573_v3  ;;  %v826_v45 = vrot.slane %v818_v35, %v6573_v3  ;;  %v817_v52 = vrot.slane %v803_v36, %v6573_v3  ;;  %v833_v53 = vrot.slane %v819_v37, %v6573_v3 }
 0x363   :  { %v742_v56 = vrot.slane %v734_v38, %v6573_v3  ;;  %v749_v57 = vrot.slane %v735_v39, %v6573_v3  ;;  %v758_v58 = vrot.slane %v750_v40, %v6573_v3  ;;  %v765_v60 = vrot.slane %v751_v42, %v6573_v3 }
 0x364   :  { %v834_v63 = vcombine.low %v810_v43, %v826_v45  ;;  %v835_v2 = vcombine.high %v810_v43, %v826_v45  ;;  %v836_v13 = vcombine.low %v817_v52, %v833_v53  ;;  %v539_v21 = vcombine.high %v514_v10, %v530_v11 }
 0x365   :  { %v838_v4 = vcombine.low %v742_v56, %v749_v57  ;;  %v5526_v5 = vcombine.high %v742_v56, %v749_v57  ;;  %v854_v6 = vcombine.low %v758_v58, %v765_v60  ;;  %v5527_v7 = vcombine.high %v758_v58, %v765_v60 }
 0x366   :  { %v1210_v8 = vpack.c.bf16 %v834_v63, %v834_v63  ;;  %v1211_v9 = vpack.c.bf16 %v835_v2, %v835_v2  ;;  %v837_v22 = vcombine.high %v817_v52, %v833_v53  ;;  %v542_v23 = vcombine.low %v6630_v17, %v6633_v18 }
 0x367   :  { %v845_v14 = vrot.slane %v838_v4, %v6562_v59  ;;  %v853_v16 = vrot.slane %v5526_v5, %v6562_v59  ;;  %v861_v19 = vrot.slane %v854_v6, %v6562_v59  ;;  %v869_v0 = vrot.slane %v5527_v7, %v6562_v59 }
 0x368   :  { %v1223_v1 = vsel %vm1218_vm2, %v1210_v8, 0  ;;  %v1269_v20 = vsel %vm1218_vm2, %v1211_v9, 0  ;;  %v5522_v27 = vcombine.high %v6630_v17, %v6633_v18  ;;  %v558_v28 = vcombine.low %v462_v61, %v469_v62 }
 0x369   :  { %5716 = vmatpush3.bf16.xpose.msra.mxu1 %v1223_v1  ;;  %5722 = vmatpush3.bf16.xpose.msra.mxu0 %v1269_v20  ;;  %v870_v25 = vcombine.low %v845_v14, %v853_v16  ;;  %v886_v26 = vcombine.low %v861_v19, %v869_v0  ;;  %v5523_v33 = vcombine.high %v462_v61, %v469_v62 }
 0x36a   :  { %5727 = vmatprep.subr.bf16.mxu1 %v6335_v15  ;;  %5733 = vmatprep.subr.bf16.mxu0 %v6335_v15  ;;  %v1212_v34 = vpack.c.bf16 %v836_v13, %v836_v13  ;;  %v1213_v35 = vpack.c.bf16 %v837_v22, %v837_v22  ;;  %v1202_v36 = vpack.c.bf16 %v538_v12, %v538_v12 }
 0x36b   :  { %v878_v10 = vrot.slane %v870_v25, %v6573_v3  ;;  %v894_v11 = vrot.slane %v886_v26, %v6573_v3  ;;  %v1203_v37 = vpack.c.bf16 %v539_v21, %v539_v21  ;;  %v521_v38 = vrot.slane %v507_v54, %v6573_v3 }
 0x36c   :  { %v537_v17 = vrot.slane %v523_v55, %v6573_v3  ;;  %v549_v18 = vrot.slane %v542_v23, %v6562_v59  ;;  %v557_v39 = vrot.slane %v5522_v27, %v6562_v59  ;;  %v565_v40 = vrot.slane %v558_v28, %v6562_v59  ;;  %v211_v28 = vld [vmem:[#allocation2] sm:$0xff] }
 0x36d   :  { %v573_v42 = vrot.slane %v5523_v33, %v6562_v59  ;;  %v1315_v43 = vsel %vm1218_vm2, %v1212_v34, 0  ;;  %v871_v45 = vcombine.high %v845_v14, %v853_v16  ;;  %v1361_v29 = vsel %vm1218_vm2, %v1213_v35, 0 }
 0x36e   :  { %v902_v30 = vcombine.low %v878_v10, %v894_v11  ;;  %v903_v31 = vcombine.high %v878_v10, %v894_v11  ;;  %v887_v32 = vcombine.high %v861_v19, %v869_v0  ;;  %v540_v54 = vcombine.low %v521_v38, %v537_v17 }
 0x36f   :  { %v541_v55 = vcombine.high %v521_v38, %v537_v17  ;;  %v574_v52 = vcombine.low %v549_v18, %v557_v39  ;;  %v590_v53 = vcombine.low %v565_v40, %v573_v42  ;;  %v885_v58 = vrot.slane %v871_v45, %v6573_v3 }
 0x370   :  { %5718 = vmatmul.mubr.msk.bf16.vlgmr.msra.gmra.mxu1 %vm1218_vm2, %v1202_v36  ;;  %5724 = vmatmul.mubr.msk.bf16.vlgmr.msra.gmra.mxu0 %vm1218_vm2, %v1203_v37  ;;  %v1214_v56 = vpack.c.bf16 %v902_v30, %v902_v30  ;;  %v1215_v57 = vpack.c.bf16 %v903_v31, %v903_v31  ;;  %v901_v60 = vrot.slane %v887_v32, %v6573_v3 }
 0x371   :  { %5728 = vmatpush3.bf16.xpose.msra.mxu1 %v1315_v43  ;;  %5734 = vmatpush3.bf16.xpose.msra.mxu0 %v1361_v29  ;;  %v1204_v61 = vpack.c.bf16 %v540_v54, %v540_v54  ;;  %v1205_v62 = vpack.c.bf16 %v541_v55, %v541_v55  ;;  %v582_v63 = vrot.slane %v574_v52, %v6573_v3 }
 0x372   :  { %5729 = vmatprep.mubr.msk.bf16.mxu1 %vm6336_vm1, %v6335_v15  ;;  %5735 = vmatprep.mubr.msk.bf16.mxu0 %vm6336_vm1, %v6335_v15  ;;  %v598_v2 = vrot.slane %v590_v53, %v6573_v3  ;;  %v1407_v4 = vsel %vm1218_vm2, %v1214_v56, 0  ;;  %v1453_v5 = vsel %vm1218_vm2, %v1215_v57, 0  ;;  %v904_v6 = vcombine.low %v885_v58, %v901_v60  ;;  %v212_v56 = vld [vmem:[#allocation2 + $0x8] sm:$0xff] }
 0x373   :  { %5739 = vmatprep.subr.bf16.mxu1 %v6335_v15  ;;  %5745 = vmatprep.subr.bf16.mxu0 %v6335_v15  ;;  %v905_v7 = vcombine.high %v885_v58, %v901_v60  ;;  %v575_v8 = vcombine.high %v549_v18, %v557_v39  ;;  %v591_v13 = vcombine.high %v565_v40, %v573_v42 }
 0x374   :  { %v606_v9 = vcombine.low %v582_v63, %v598_v2  ;;  %v607_v12 = vcombine.high %v582_v63, %v598_v2  ;;  %v1216_v14 = vpack.c.bf16 %v904_v6, %v904_v6 }
 0x375   :  { %v1217_v16 = vpack.c.bf16 %v905_v7, %v905_v7  ;;  %v589_v1 = vrot.slane %v575_v8, %v6573_v3  ;;  %v605_v20 = vrot.slane %v591_v13, %v6573_v3 }
 0x376   :  { %v1206_v19 = vpack.c.bf16 %v606_v9, %v606_v9  ;;  %v1207_v0 = vpack.c.bf16 %v607_v12, %v607_v12  ;;  %v1499_v21 = vsel %vm1218_vm2, %v1216_v14, 0 }
 0x377   :  { %v1545_v22 = vsel %vm1218_vm2, %v1217_v16, 0  ;;  %v608_v23 = vcombine.low %v589_v1, %v605_v20  ;;  %v609_v25 = vcombine.high %v589_v1, %v605_v20 }
 0x378   :  { %5730 = vmatmul.mubr.msk.bf16.vlgmr.msra.gmra.mxu1 %vm1218_vm2, %v1204_v61  ;;  %5736 = vmatmul.mubr.msk.bf16.vlgmr.msra.gmra.mxu0 %vm1218_vm2, %v1205_v62 }
 0x379   :  { %5740 = vmatpush3.bf16.xpose.msra.mxu1 %v1407_v4  ;;  %5746 = vmatpush3.bf16.xpose.msra.mxu0 %v1453_v5  ;;  %v1208_v26 = vpack.c.bf16 %v608_v23, %v608_v23  ;;  %v1209_v27 = vpack.c.bf16 %v609_v25, %v609_v25 }
 0x37a   :  { %5741 = vmatprep.mubr.msk.bf16.mxu1 %vm6336_vm1, %v6335_v15  ;;  %5747 = vmatprep.mubr.msk.bf16.mxu0 %vm6336_vm1, %v6335_v15 }
 0x37b   :  { %5751 = vmatprep.subr.bf16.mxu1 %v6335_v15  ;;  %5757 = vmatprep.subr.bf16.mxu0 %v6335_v15 }
 0x380   :  { %5742 = vmatmul.mubr.msk.bf16.vlgmr.msra.gmra.mxu1 %vm1218_vm2, %v1206_v19  ;;  %5748 = vmatmul.mubr.msk.bf16.vlgmr.msra.gmra.mxu0 %vm1218_vm2, %v1207_v0 }
 0x381   :  { %5752 = vmatpush3.bf16.xpose.msra.mxu1 %v1499_v21  ;;  %5758 = vmatpush3.bf16.xpose.msra.mxu0 %v1545_v22 }
 0x382   :  { %5753 = vmatprep.mubr.msk.bf16.mxu1 %vm6336_vm1, %v6335_v15  ;;  %5759 = vmatprep.mubr.msk.bf16.mxu0 %vm6336_vm1, %v6335_v15 }
 0x383   :  { %5763 = vmatprep.subr.bf16.mxu1 %v6335_v15  ;;  %5769 = vmatprep.subr.bf16.mxu0 %v6335_v15 }
 0x388   :  { %5754 = vmatmul.mubr.msk.bf16.vlgmr.msra.gmra.mxu1 %vm1218_vm2, %v1208_v26  ;;  %5760 = vmatmul.mubr.msk.bf16.vlgmr.msra.gmra.mxu0 %vm1218_vm2, %v1209_v27 }
 0x389   :  { %5765 = vmatprep.mubr.msk.bf16.mxu1 %vm6336_vm1, %v6335_v15  ;;  %5771 = vmatprep.mubr.msk.bf16.mxu0 %vm6336_vm1, %v6335_v15 }
 0x430   :  { %v1259_v33 = vpop.f32.mrf.mxu1  ;;  %v1305_v34 = vpop.f32.mrf.mxu0 }
 0x431   :  { %v6721_v35 = vadd.f32 %v1259_v33, %v211_v28  ;;  %v1588_v10 = vadd.f32 %v1305_v34, %v211_v28 }
 0x432   :  { %v5719_v11 = vpop.f32.mrf.mxu1  ;;  %v5725_v36 = vpop.f32.mrf.mxu0 }
 0x433   :  { %v1598_v37 = vsel %vm1218_vm2, %v1588_v10, -inf  ;;  %v1595_v38 = vsel %vm1218_vm2, %v6721_v35, -inf }
 0x434   :  { %1599 = vmax.xlane.f32.xlu1 %v1598_v37  ;;  %v1308_v17 = vpop.f32.mrf.mxu0  ;;  %1596 = vmax.xlane.f32.xlu0 %v1595_v38  ;;  %v1262_v18 = vpop.f32.mrf.mxu1 }
 0x436   :  { %v5720_v39 = vpop.f32.mrf.mxu1  ;;  %v5726_v40 = vpop.f32.mrf.mxu0 }
 0x438   :  { %v1351_v42 = vpop.f32.mrf.mxu1  ;;  %v1397_v43 = vpop.f32.mrf.mxu0 }
 0x439   :  { %v1589_v45 = vadd.f32 %v1351_v42, %v211_v28  ;;  %v1590_v31 = vadd.f32 %v1397_v43, %v211_v28 }
 0x43a   :  { %v5731_v29 = vpop.f32.mrf.mxu1  ;;  %v5737_v30 = vpop.f32.mrf.mxu0 }
 0x43b   :  { %v1601_v32 = vsel %vm1218_vm2, %v1589_v45, -inf  ;;  %v1604_v57 = vsel %vm1218_vm2, %v1590_v31, -inf }
 0x43c   :  { %v1400_v54 = vpop.f32.mrf.mxu0  ;;  %1602 = vmax.xlane.f32.xlu0 %v1601_v32  ;;  %v1354_v55 = vpop.f32.mrf.mxu1 }
 0x43e   :  { %v5732_v52 = vpop.f32.mrf.mxu1  ;;  %v5738_v53 = vpop.f32.mrf.mxu0 }
 0x440   :  { %v1489_v58 = vpop.f32.mrf.mxu0  ;;  %1605 = vmax.xlane.f32.xlu0 %v1604_v57  ;;  %v1443_v60 = vpop.f32.mrf.mxu1 }
 0x441   :  { %v1592_v61 = vadd.f32 %v1489_v58, %v212_v56  ;;  %v1591_v62 = vadd.f32 %v1443_v60, %v212_v56 }
 0x442   :  { %v5743_v63 = vpop.f32.mrf.mxu1  ;;  %v5749_v2 = vpop.f32.mrf.mxu0 }
 0x443   :  { %v1610_v4 = vsel %vm1218_vm2, %v1592_v61, -inf  ;;  %v1607_v5 = vsel %vm1218_vm2, %v1591_v62, -inf }
 0x444   :  { %1611 = vmax.xlane.f32.xlu1 %v1610_v4  ;;  %v1492_v6 = vpop.f32.mrf.mxu0  ;;  %1608 = vmax.xlane.f32.xlu0 %v1607_v5  ;;  %v1446_v7 = vpop.f32.mrf.mxu1 }
 0x446   :  { %v5744_v8 = vpop.f32.mrf.mxu1  ;;  %v5750_v9 = vpop.f32.mrf.mxu0 }
 0x448   :  { %v1535_v12 = vpop.f32.mrf.mxu1  ;;  %v1581_v13 = vpop.f32.mrf.mxu0 }
 0x449   :  { %v6730_v14 = vadd.f32 %v1535_v12, %v212_v56  ;;  %v1594_v23 = vadd.f32 %v1581_v13, %v212_v56 }
 0x44a   :  { %v5755_v16 = vpop.f32.mrf.mxu1  ;;  %v5761_v19 = vpop.f32.mrf.mxu0 }
 0x44b   :  { %v1613_v0 = vsel %vm1218_vm2, %v6730_v14, -inf  ;;  %v1616_v25 = vsel %vm1218_vm2, %v1594_v23, -inf }
 0x44c   :  { %v1584_v1 = vpop.f32.mrf.mxu0  ;;  %1614 = vmax.xlane.f32.xlu0 %v1613_v0  ;;  %v1538_v20 = vpop.f32.mrf.mxu1 }
 0x44e   :  { %v5756_v21 = vpop.f32.mrf.mxu1  ;;  %v5762_v22 = vpop.f32.mrf.mxu0 }
 0x455   :  { %910 = vrot.lane.b32.xlu1 %v6533_v47, %s6324_s27 }
 0x459   :  { %914 = vrot.lane.b32.xlu1 %v6531_v46, %s6324_s27 }
 0x462   :  { %906 = vrot.lane.b32.xlu0 %v6513_v41, %s6324_s27 }
 0x47d   :  { %1617 = vmax.xlane.f32.xlu1 %v1616_v25 }
 0x48e   :  { %918 = vrot.lane.b32.xlu1 %v6539_v48, %s6324_s27 }
 0x4bd   :  { %v1600_v26 = vpop.xlane.xlu1 %1599  ;;  %v1597_v27 = vpop.xlane.xlu0 %1596 }
 0x4be   :  { %v1620_v28 = vsub.f32 %v1588_v10, %v1600_v26  ;;  %v1619_v33 = vsub.f32 %v6721_v35, %v1597_v27 }
 0x4c0   :  { %v1629_v34 = vmul.f32 1.442695, %v1620_v28  ;;  %v1627_v47 = vmul.f32 1.442695, %v1619_v33 }
 0x4c2   :  { %6033 = vpow2.f32 %v1629_v34 }
 0x4c3   :  { %6035 = vpow2.f32 %v1627_v47 }
 0x4c5   :  { %v1603_v46 = vpop.xlane.xlu0 %1602 }
 0x4c6   :  { %v1621_v11 = vsub.f32 %v1589_v45, %v1603_v46 }
 0x4c8   :  { %v1631_v36 = vmul.f32 1.442695, %v1621_v11 }
 0x4c9   :  { %v1606_v41 = vpop.xlane.xlu0 %1605 }
 0x4ca   :  { %6037 = vpow2.f32 %v1631_v36  ;;  %v1622_v37 = vsub.f32 %v1590_v31, %v1606_v41 }
 0x4cc   :  { %v1633_v38 = vmul.f32 1.442695, %v1622_v37 }
 0x4cd   :  { %v1612_v17 = vpop.xlane.xlu1 %1611  ;;  %v1609_v18 = vpop.xlane.xlu0 %1608 }
 0x4ce   :  { %6039 = vpow2.f32 %v1633_v38  ;;  %v1624_v48 = vsub.f32 %v1592_v61, %v1612_v17  ;;  %v1623_v39 = vsub.f32 %v1591_v62, %v1609_v18 }
 0x4cf   :  { %v6744_v40 = vpop.eup %6033 }
 0x4d0   :  { %v6746_v10 = vpop.eup %6035  ;;  %v1635_v35 = vmul.f32 1.442695, %v1623_v39  ;;  %v1646_v42 = vsel %vm1218_vm2, %v6744_v40, 0.0  ;;  %v1637_v43 = vmul.f32 1.442695, %v1624_v48 }
 0x4d1   :  { %1647 = vadd.xlane.f32.xlu1 %v1646_v42  ;;  %v1643_v45 = vsel %vm1218_vm2, %v6746_v10, 0.0  ;;  %v911_v56 = vpop.permute.xlu1 %910 }
 0x4d2   :  { %1644 = vadd.xlane.f32.xlu0 %v1643_v45  ;;  %6041 = vpow2.f32 %v1635_v35 }
 0x4d3   :  { %6043 = vpow2.f32 %v1637_v43 }
 0x4d5   :  { %v1615_v57 = vpop.xlane.xlu0 %1614  ;;  %v915_v58 = vpop.permute.xlu1 %914 }
 0x4d6   :  { %v1625_v60 = vsub.f32 %v6730_v14, %v1615_v57 }
 0x4d7   :  { %v6752_v29 = vpop.eup %6037 }
 0x4d8   :  { %v1649_v30 = vsel %vm1218_vm2, %v6752_v29, 0.0  ;;  %v1639_v61 = vmul.f32 1.442695, %v1625_v60 }
 0x4d9   :  { %1650 = vadd.xlane.f32.xlu0 %v1649_v30  ;;  %v907_v62 = vpop.permute.xlu0 %906 }
 0x4da   :  { %v930_v4 = vcombine.low %v907_v62, %v915_v58  ;;  %6045 = vpow2.f32 %v1639_v61 }
 0x4db   :  { %v6756_v31 = vpop.eup %6039 }
 0x4dc   :  { %v1652_v32 = vsel %vm1218_vm2, %v6756_v31, 0.0  ;;  %v938_v7 = vrot.slane %v930_v4, %v6562_v59 }
 0x4dd   :  { %1653 = vadd.xlane.f32.xlu1 %v1652_v32 }
 0x4df   :  { %v6760_v54 = vpop.eup %6041 }
 0x4e0   :  { %v1655_v55 = vsel %vm1218_vm2, %v6760_v54, 0.0  ;;  %v6764_v52 = vpop.eup %6043 }
 0x4e1   :  { %1656 = vadd.xlane.f32.xlu0 %v1655_v55  ;;  %v1658_v53 = vsel %vm1218_vm2, %v6764_v52, 0.0 }
 0x4e5   :  { %1659 = vadd.xlane.f32.xlu0 %v1658_v53 }
 0x4e7   :  { %v6789_v34 = vpop.eup %6045 }
 0x4e8   :  { %v1661_v48 = vsel %vm1218_vm2, %v6789_v34, 0.0 }
 0x4ee   :  { %912 = vrot.lane.b32.xlu1 %v6547_v50, %s6324_s27  ;;  %v931_v50 = vcombine.high %v907_v62, %v915_v58 }
 0x4f2   :  { %916 = vrot.lane.b32.xlu1 %v6545_v49, %s6324_s27 }
 0x4f6   :  { %920 = vrot.lane.b32.xlu1 %v6553_v51, %s6324_s27 }
 0x4fb   :  { %908 = vrot.lane.b32.xlu0 %v6519_v44, %s6324_s27  ;;  %v945_v44 = vrot.slane %v931_v50, %v6562_v59  ;;  %s6343_s27 = smov 16  }
 0x506   :  { %v1618_v63 = vpop.xlane.xlu1 %1617 }
 0x507   :  { %v1626_v2 = vsub.f32 %v1594_v23, %v1618_v63 }
 0x509   :  { %v1641_v5 = vmul.f32 1.442695, %v1626_v2 }
 0x50a   :  { %v919_v49 = vpop.permute.xlu1 %918 }
 0x50b   :  { %6047 = vpow2.f32 %v1641_v5  ;;  %v946_v6 = vcombine.low %v911_v56, %v919_v49  ;;  %v947_v51 = vcombine.high %v911_v56, %v919_v49 }
 0x50d   :  { %v954_v8 = vrot.slane %v946_v6, %v6562_v59  ;;  %v961_v9 = vrot.slane %v947_v51, %v6562_v59 }
 0x50f   :  { %v962_v12 = vcombine.low %v938_v7, %v954_v8  ;;  %v963_v13 = vcombine.high %v938_v7, %v954_v8  ;;  %v978_v14 = vcombine.low %v945_v44, %v961_v9  ;;  %v979_v16 = vcombine.high %v945_v44, %v961_v9 }
 0x511   :  { %v970_v19 = vrot.slane %v962_v12, %v6573_v3  ;;  %v977_v0 = vrot.slane %v963_v13, %v6573_v3  ;;  %v986_v1 = vrot.slane %v978_v14, %v6573_v3  ;;  %v993_v20 = vrot.slane %v979_v16, %v6573_v3 }
 0x513   :  { %v1066_v21 = vcombine.low %v970_v19, %v977_v0  ;;  %v5528_v22 = vcombine.high %v970_v19, %v977_v0  ;;  %v1082_v23 = vcombine.low %v986_v1, %v993_v20  ;;  %v5529_v25 = vcombine.high %v986_v1, %v993_v20 }
 0x515   :  { %v1073_v26 = vrot.slane %v1066_v21, %v6562_v59  ;;  %v1081_v27 = vrot.slane %v5528_v22, %v6562_v59  ;;  %v1089_v28 = vrot.slane %v1082_v23, %v6562_v59  ;;  %v1097_v33 = vrot.slane %v5529_v25, %v6562_v59 }
 0x517   :  { %v1098_v47 = vcombine.low %v1073_v26, %v1081_v27  ;;  %v1114_v46 = vcombine.low %v1089_v28, %v1097_v33  ;;  %v1099_v11 = vcombine.high %v1073_v26, %v1081_v27  ;;  %v1115_v36 = vcombine.high %v1089_v28, %v1097_v33 }
 0x518   :  { %v6791_v41 = vpop.eup %6047 }
 0x519   :  { %v1664_v37 = vsel %vm1218_vm2, %v6791_v41, 0.0  ;;  %v1106_v38 = vrot.slane %v1098_v47, %v6573_v3  ;;  %v1122_v17 = vrot.slane %v1114_v46, %v6573_v3  ;;  %v1113_v18 = vrot.slane %v1099_v11, %v6573_v3 }
 0x51a   :  { %1665 = vadd.xlane.f32.xlu1 %v1664_v37  ;;  %v1129_v39 = vrot.slane %v1115_v36, %v6573_v3  ;;  %1662 = vadd.xlane.f32.xlu0 %v1661_v48 }
 0x51b   :  { %v1130_v35 = vcombine.low %v1106_v38, %v1122_v17  ;;  %v1131_v42 = vcombine.high %v1106_v38, %v1122_v17 }
 0x51c   :  { %v1132_v43 = vcombine.low %v1113_v18, %v1129_v39  ;;  %v1133_v45 = vcombine.high %v1113_v18, %v1129_v39 }
 0x51d   :  { %v1691_v30 = vpack.c.bf16 %v1130_v35, %v1130_v35  ;;  %v1692_v32 = vpack.c.bf16 %v1131_v42, %v1131_v42 }
 0x51e   :  { %v1694_v2 = vpack.c.bf16 %v1133_v45, %v1133_v45  ;;  %v1693_v5 = vpack.c.bf16 %v1132_v43, %v1132_v43 }
 0x51f   :  { %v1704_v55 = vsel %vm1702_vm3, %v1691_v30, 0  ;;  %v1750_v53 = vsel %vm1702_vm3, %v1692_v32, 0 }
 0x520   :  { %5764 = vmatpush3.bf16.msra.mxu1 %v1704_v55  ;;  %5770 = vmatpush3.bf16.msra.mxu0 %v1750_v53  ;;  %v1842_v7 = vsel %vm1702_vm3, %v1694_v2, 0  ;;  %v1796_v44 = vsel %vm1702_vm3, %v1693_v5, 0 }
 0x521   :  { %5775 = vmatprep.subr.bf16.mxu1 %v6335_v15  ;;  %5781 = vmatprep.subr.bf16.mxu0 %v6335_v15 }
 0x55a   :  { %v1648_v56 = vpop.xlane.xlu1 %1647 }
 0x55b   :  { %6049 = vrcp.f32 %v1648_v56  ;;  %v1645_v57 = vpop.xlane.xlu0 %1644 }
 0x55c   :  { %6051 = vrcp.f32 %v1645_v57 }
 0x562   :  { %v1651_v58 = vpop.xlane.xlu0 %1650 }
 0x563   :  { %6053 = vrcp.f32 %v1651_v58 }
 0x566   :  { %v1654_v60 = vpop.xlane.xlu1 %1653 }
 0x567   :  { %6055 = vrcp.f32 %v1654_v60 }
 0x568   :  { %v6050_v61 = vpop.eup %6049 }
 0x569   :  { %v6052_v62 = vpop.eup %6051  ;;  %v1676_v63 = vmul.f32 %v6050_v61, %v6744_v40 }
 0x56a   :  { %v913_v4 = vpop.permute.xlu1 %912  ;;  %v1675_v50 = vmul.f32 %v6052_v62, %v6746_v10  ;;  %v1657_v49 = vpop.xlane.xlu0 %1656 }
 0x56b   :  { %v1684_v6 = vpack.c.bf16 %v1676_v63, %v1676_v63  ;;  %6057 = vrcp.f32 %v1657_v49 }
 0x56c   :  { %v1683_v51 = vpack.c.bf16 %v1675_v50, %v1675_v50 }
 0x56d   :  { %5772 = vmatmul.mubr.msk.bf16.vlgmr.msra.gmra.mxu0 %vm1218_vm2, %v1684_v6 }
 0x56e   :  { %5766 = vmatmul.mubr.msk.bf16.vlgmr.msra.gmra.mxu1 %vm1218_vm2, %v1683_v51  ;;  %5782 = vmatpush3.bf16.msra.mxu0 %v1842_v7  ;;  %v917_v8 = vpop.permute.xlu1 %916  ;;  %v1660_v40 = vpop.xlane.xlu0 %1659 }
 0x56f   :  { %5776 = vmatpush3.bf16.msra.mxu1 %v1796_v44  ;;  %5777 = vmatprep.mubr.msk.bf16.mxu1 %vm6336_vm1, %v6335_v15  ;;  %6059 = vrcp.f32 %v1660_v40 }
 0x570   :  { %v6054_v10 = vpop.eup %6053  ;;  %5783 = vmatprep.mubr.msk.bf16.mxu0 %vm6336_vm1, %v6335_v15  ;;  %5787 = vmatprep.subr.bf16.mxu1 %v6335_v15 }
 0x571   :  { %v1677_v9 = vmul.f32 %v6054_v10, %v6752_v29  ;;  %5793 = vmatprep.subr.bf16.mxu0 %v6335_v15 }
 0x572   :  { %v921_v12 = vpop.permute.xlu1 %920  ;;  %v909_v16 = vpop.permute.xlu0 %908 }
 0x573   :  { %v1014_v13 = vcombine.low %v913_v4, %v921_v12  ;;  %v1015_v14 = vcombine.high %v913_v4, %v921_v12  ;;  %v1685_v19 = vpack.c.bf16 %v1677_v9, %v1677_v9  ;;  %v998_v1 = vcombine.low %v909_v16, %v917_v8 }
 0x574   :  { %v6056_v0 = vpop.eup %6055  ;;  %v999_v20 = vcombine.high %v909_v16, %v917_v8 }
 0x575   :  { %v1022_v21 = vrot.slane %v1014_v13, %v6562_v59  ;;  %v1029_v22 = vrot.slane %v1015_v14, %v6562_v59  ;;  %v1678_v23 = vmul.f32 %v6056_v0, %v6756_v31  ;;  %v1006_v29 = vrot.slane %v998_v1, %v6562_v59 }
 0x576   :  { %v1013_v25 = vrot.slane %v999_v20, %v6562_v59  ;;  %5778 = vmatmul.mubr.msk.bf16.vlgmr.msra.gmra.mxu1 %vm1218_vm2, %v1685_v19 }
 0x577   :  { %v1686_v26 = vpack.c.bf16 %v1678_v23, %v1678_v23  ;;  %5789 = vmatprep.mubr.msk.bf16.mxu1 %vm6336_vm1, %v6335_v15  ;;  %v1030_v27 = vcombine.low %v1006_v29, %v1022_v21  ;;  %v1031_v28 = vcombine.high %v1006_v29, %v1022_v21 }
 0x578   :  { %v1046_v33 = vcombine.low %v1013_v25, %v1029_v22  ;;  %v1047_v47 = vcombine.high %v1013_v25, %v1029_v22  ;;  %v6058_v55 = vpop.eup %6057 }
 0x579   :  { %5784 = vmatmul.mubr.msk.bf16.vlgmr.msra.gmra.mxu0 %vm1218_vm2, %v1686_v26  ;;  %v1038_v46 = vrot.slane %v1030_v27, %v6573_v3  ;;  %v1045_v31 = vrot.slane %v1031_v28, %v6573_v3  ;;  %v1679_v5 = vmul.f32 %v6058_v55, %v6760_v54 }
 0x57a   :  { %v1054_v11 = vrot.slane %v1046_v33, %v6573_v3  ;;  %v1061_v36 = vrot.slane %v1047_v47, %v6573_v3  ;;  %5795 = vmatprep.mubr.msk.bf16.mxu0 %vm6336_vm1, %v6335_v15 }
 0x57b   :  { %v1134_v37 = vcombine.low %v1038_v46, %v1045_v31  ;;  %v5530_v38 = vcombine.high %v1038_v46, %v1045_v31  ;;  %v1687_v8 = vpack.c.bf16 %v1679_v5, %v1679_v5 }
 0x57c   :  { %v1150_v17 = vcombine.low %v1054_v11, %v1061_v36  ;;  %v5531_v18 = vcombine.high %v1054_v11, %v1061_v36  ;;  %v6060_v60 = vpop.eup %6059 }
 0x57d   :  { %v1141_v48 = vrot.slane %v1134_v37, %v6562_v59  ;;  %v1149_v39 = vrot.slane %v5530_v38, %v6562_v59  ;;  %v1680_v49 = vmul.f32 %v6060_v60, %v6764_v52 }
 0x57e   :  { %v1157_v35 = vrot.slane %v1150_v17, %v6562_v59  ;;  %v1165_v42 = vrot.slane %v5531_v18, %v6562_v59 }
 0x57f   :  { %v1166_v43 = vcombine.low %v1141_v48, %v1149_v39  ;;  %v1167_v30 = vcombine.high %v1141_v48, %v1149_v39  ;;  %v1688_v40 = vpack.c.bf16 %v1680_v49, %v1680_v49 }
 0x580   :  { %v1182_v45 = vcombine.low %v1157_v35, %v1165_v42  ;;  %v1183_v32 = vcombine.high %v1157_v35, %v1165_v42 }
 0x581   :  { %v1174_v53 = vrot.slane %v1166_v43, %v6573_v3  ;;  %v1181_v57 = vrot.slane %v1167_v30, %v6573_v3 }
 0x582   :  { %v1190_v56 = vrot.slane %v1182_v45, %v6573_v3  ;;  %v1197_v58 = vrot.slane %v1183_v32, %v6573_v3 }
 0x584   :  { %v1198_v61 = vcombine.low %v1174_v53, %v1190_v56  ;;  %v1199_v62 = vcombine.high %v1174_v53, %v1190_v56  ;;  %v1200_v63 = vcombine.low %v1181_v57, %v1197_v58  ;;  %v1201_v2 = vcombine.high %v1181_v57, %v1197_v58 }
 0x586   :  { %v1695_v4 = vpack.c.bf16 %v1198_v61, %v1198_v61  ;;  %v1696_v50 = vpack.c.bf16 %v1199_v62, %v1199_v62  ;;  %v1697_v7 = vpack.c.bf16 %v1200_v63, %v1200_v63  ;;  %v1698_v44 = vpack.c.bf16 %v1201_v2, %v1201_v2 }
 0x588   :  { %v1888_v6 = vsel %vm1702_vm3, %v1695_v4, 0  ;;  %v1934_v51 = vsel %vm1702_vm3, %v1696_v50, 0  ;;  %v1980_v54 = vsel %vm1702_vm3, %v1697_v7, 0  ;;  %v2026_v52 = vsel %vm1702_vm3, %v1698_v44, 0 }
 0x589   :  { %5788 = vmatpush3.bf16.msra.mxu1 %v1888_v6  ;;  %5794 = vmatpush3.bf16.msra.mxu0 %v1934_v51 }
 0x58a   :  { %5799 = vmatprep.subr.bf16.mxu1 %v6335_v15  ;;  %5805 = vmatprep.subr.bf16.mxu0 %v6335_v15 }
 0x58c   :  { %5790 = vmatmul.mubr.msk.bf16.vlgmr.msra.gmra.mxu1 %vm1218_vm2, %v1687_v8  ;;  %5796 = vmatmul.mubr.msk.bf16.vlgmr.msra.gmra.mxu0 %vm1218_vm2, %v1688_v40 }
 0x58d   :  { %5800 = vmatpush3.bf16.msra.mxu1 %v1980_v54  ;;  %5806 = vmatpush3.bf16.msra.mxu0 %v2026_v52 }
 0x58e   :  { %5801 = vmatprep.mubr.msk.bf16.mxu1 %vm6336_vm1, %v6335_v15  ;;  %5807 = vmatprep.mubr.msk.bf16.mxu0 %vm6336_vm1, %v6335_v15 }
 0x58f   :  { %5811 = vmatprep.subr.bf16.mxu1 %v6335_v15  ;;  %5819 = vmatprep.subr.bf16.mxu0 %v6335_v15 }
 0x5a3   :  { %v1666_v10 = vpop.xlane.xlu1 %1665  ;;  %v1663_v9 = vpop.xlane.xlu0 %1662 }
 0x5a4   :  { %6061 = vrcp.f32 %v1666_v10 }
 0x5a5   :  { %6063 = vrcp.f32 %v1663_v9 }
 0x5b1   :  { %v6062_v12 = vpop.eup %6061 }
 0x5b2   :  { %v6064_v13 = vpop.eup %6063  ;;  %v1682_v14 = vmul.f32 %v6062_v12, %v6791_v41 }
 0x5b3   :  { %v1681_v16 = vmul.f32 %v6064_v13, %v6789_v34 }
 0x5b4   :  { %v1690_v19 = vpack.c.bf16 %v1682_v14, %v1682_v14 }
 0x5b5   :  { %v1689_v0 = vpack.c.bf16 %v1681_v16, %v1681_v16 }
 0x5b6   :  { %5808 = vmatmul.mubr.msk.bf16.vlgmr.msra.gmra.mxu0 %vm1218_vm2, %v1690_v19 }
 0x5b7   :  { %5802 = vmatmul.mubr.msk.bf16.vlgmr.msra.gmra.mxu1 %vm1218_vm2, %v1689_v0  ;;  %5823 = vmatprep.mubr.msk.bf16.mxu0 %vm6336_vm1, %v6335_v15 }
 0x5b8   :  { %5815 = vmatprep.mubr.msk.bf16.mxu1 %vm6336_vm1, %v6335_v15 }
 0x62d   :  { %v1786_v1 = vpop.f32.mrf.mxu0 }
 0x62e   :  { %v1740_v20 = vpop.f32.mrf.mxu1 }
 0x62f   :  { %v5773_v21 = vpop.f32.mrf.mxu0 }
 0x630   :  { %v5767_v22 = vpop.f32.mrf.mxu1 }
 0x631   :  { %v1789_v23 = vpop.f32.mrf.mxu0 }
 0x632   :  { %v1743_v41 = vpop.f32.mrf.mxu1 }
 0x633   :  { %v5774_v29 = vpop.f32.mrf.mxu0 }
 0x634   :  { %v5768_v34 = vpop.f32.mrf.mxu1 }
 0x636   :  { %v1832_v25 = vpop.f32.mrf.mxu1 }
 0x637   :  { %v2068_v26 = vcombine.low %v1740_v20, %v1832_v25  ;;  %v2069_v27 = vcombine.high %v1740_v20, %v1832_v25 }
 0x638   :  { %v5779_v28 = vpop.f32.mrf.mxu1 }
 0x639   :  { %v1878_v33 = vpop.f32.mrf.mxu0  ;;  %v2076_v36 = vrot.slane %v2068_v26, %v6562_v59  ;;  %v2083_v37 = vrot.slane %v2069_v27, %v6562_v59 }
 0x63a   :  { %v1835_v47 = vpop.f32.mrf.mxu1  ;;  %v2084_v46 = vcombine.low %v1786_v1, %v1878_v33  ;;  %v2085_v31 = vcombine.high %v1786_v1, %v1878_v33 }
 0x63b   :  { %v5785_v11 = vpop.f32.mrf.mxu0 }
 0x63c   :  { %v2092_v38 = vrot.slane %v2084_v46, %v6562_v59  ;;  %v2099_v17 = vrot.slane %v2085_v31, %v6562_v59  ;;  %v5780_v18 = vpop.f32.mrf.mxu1 }
 0x63d   :  { %v1881_v48 = vpop.f32.mrf.mxu0 }
 0x63e   :  { %v2100_v39 = vcombine.low %v2076_v36, %v2092_v38  ;;  %v2101_v35 = vcombine.high %v2076_v36, %v2092_v38  ;;  %v2116_v42 = vcombine.low %v2083_v37, %v2099_v17  ;;  %v2117_v43 = vcombine.high %v2083_v37, %v2099_v17 }
 0x63f   :  { %v5786_v45 = vpop.f32.mrf.mxu0 }
 0x640   :  { %v2108_v30 = vrot.slane %v2100_v39, %v6573_v3  ;;  %v2115_v32 = vrot.slane %v2101_v35, %v6573_v3  ;;  %v2124_v55 = vrot.slane %v2116_v42, %v6573_v3  ;;  %v2131_v53 = vrot.slane %v2117_v43, %v6573_v3 }
 0x642   :  { %v2204_v56 = vcombine.low %v2108_v30, %v2115_v32  ;;  %v5548_v57 = vcombine.high %v2108_v30, %v2115_v32  ;;  %v2220_v58 = vcombine.low %v2124_v55, %v2131_v53  ;;  %v5549_v60 = vcombine.high %v2124_v55, %v2131_v53  ;;  %v6015_v30 = vld [vmem:[#allocation7 + $0x8] sm:$0xff]  }
 0x643   :  { %5812 = vmatpush3.bf16.msra.mxu1 %v6015_v30 }
 0x644   :  { %v2211_v61 = vrot.slane %v2204_v56, %v6562_v59  ;;  %v2219_v62 = vrot.slane %v5548_v57, %v6562_v59  ;;  %v2227_v63 = vrot.slane %v2220_v58, %v6562_v59  ;;  %v2235_v2 = vrot.slane %v5549_v60, %v6562_v59  ;;  %5813 = vmatprep.subr.bf16.mxu1 %v6335_v15 }
 0x646   :  { %v2237_v4 = vcombine.high %v2211_v61, %v2219_v62  ;;  %v2253_v50 = vcombine.high %v2227_v63, %v2235_v2  ;;  %v2236_v5 = vcombine.low %v2211_v61, %v2219_v62  ;;  %v2252_v49 = vcombine.low %v2227_v63, %v2235_v2  ;;  %v6016_v62 = vld [vmem:[#allocation7] sm:$0xff]  }
 0x647   :  { %5814 = vmatpush3.bf16.msra.mxu1 %v6016_v62 }
 0x648   :  { %v6878_v6 = vrot.slane %v2237_v4, %v6573_v3  ;;  %v6881_v51 = vrot.slane %v2253_v50, %v6573_v3  ;;  %v6884_v7 = vrot.slane %v2236_v5, %v6573_v3  ;;  %v6887_v44 = vrot.slane %v2252_v49, %v6573_v3 }
 0x64a   :  { %v2270_v8 = vcombine.low %v6878_v6, %v6881_v51  ;;  %v2268_v40 = vcombine.low %v6884_v7, %v6887_v44  ;;  %v2269_v54 = vcombine.high %v6884_v7, %v6887_v44  ;;  %v2271_v52 = vcombine.high %v6878_v6, %v6881_v51  ;;  %v6931_v44 = vld [vmem:[#allocation14] sm:$0xff] }
 0x64b   :  { %v2375_v7 = vsub.s32 6, %v6503_v24 }
 0x64c   :  { %v1924_v10 = vpop.f32.mrf.mxu1  ;;  %v1970_v9 = vpop.f32.mrf.mxu0 }
 0x64e   :  { %v5791_v12 = vpop.f32.mrf.mxu1  ;;  %v5797_v13 = vpop.f32.mrf.mxu0 }
 0x650   :  { %v1927_v14 = vpop.f32.mrf.mxu1  ;;  %v1973_v16 = vpop.f32.mrf.mxu0 }
 0x652   :  { %v5792_v19 = vpop.f32.mrf.mxu1  ;;  %v5798_v0 = vpop.f32.mrf.mxu0 }
 0x676   :  { %v2062_v1 = vpop.f32.mrf.mxu0 }
 0x677   :  { %v2016_v20 = vpop.f32.mrf.mxu1  ;;  %v2152_v21 = vcombine.low %v1970_v9, %v2062_v1  ;;  %v2153_v22 = vcombine.high %v1970_v9, %v2062_v1 }
 0x678   :  { %v2136_v23 = vcombine.low %v1924_v10, %v2016_v20  ;;  %v2137_v41 = vcombine.high %v1924_v10, %v2016_v20  ;;  %v5809_v29 = vpop.f32.mrf.mxu0 }
 0x679   :  { %v2160_v34 = vrot.slane %v2152_v21, %v6562_v59  ;;  %v2167_v25 = vrot.slane %v2153_v22, %v6562_v59  ;;  %v5803_v26 = vpop.f32.mrf.mxu1 }
 0x67a   :  { %v2144_v27 = vrot.slane %v2136_v23, %v6562_v59  ;;  %v2151_v28 = vrot.slane %v2137_v41, %v6562_v59  ;;  %v2065_v33 = vpop.f32.mrf.mxu0 }
 0x67b   :  { %v2019_v47 = vpop.f32.mrf.mxu1 }
 0x67c   :  { %v2168_v46 = vcombine.low %v2144_v27, %v2160_v34  ;;  %v2169_v31 = vcombine.high %v2144_v27, %v2160_v34  ;;  %v2184_v11 = vcombine.low %v2151_v28, %v2167_v25  ;;  %v2185_v36 = vcombine.high %v2151_v28, %v2167_v25  ;;  %v5810_v37 = vpop.f32.mrf.mxu0  ;;  %v6106_v28 = vld [vmem:[%s7729_s20] sm:$0xff] }
 0x67d   :  { %v5804_v38 = vpop.f32.mrf.mxu1 }
 0x67e   :  { %v2176_v17 = vrot.slane %v2168_v46, %v6573_v3  ;;  %v2183_v18 = vrot.slane %v2169_v31, %v6573_v3  ;;  %v2192_v48 = vrot.slane %v2184_v11, %v6573_v3  ;;  %v2199_v39 = vrot.slane %v2185_v36, %v6573_v3  ;;  %v6107_v36 = vld [vmem:[%s7729_s20 + $0x8] sm:$0xff] }
 0x680   :  { %v2272_v35 = vcombine.low %v2176_v17, %v2183_v18  ;;  %v5550_v42 = vcombine.high %v2176_v17, %v2183_v18  ;;  %v2288_v43 = vcombine.low %v2192_v48, %v2199_v39  ;;  %v5551_v45 = vcombine.high %v2192_v48, %v2199_v39  ;;  %v6017_v17 = vld [vmem:[#allocation10 + $0x8] sm:$0xff]   ;;  %v6018_v18 = vld [vmem:[#allocation10] sm:$0xff]  }
 0x681   :  { %v207_v48 = vld [vmem:[%s7730_s9] sm:$0xff]  ;;  %v208_v39 = vld [vmem:[%s7730_s9 + $0x8] sm:$0xff]  ;;  %5827 = vmatprep.subr.bf16.mxu1 %v6017_v17 }
 0x682   :  { %v2279_v32 = vrot.slane %v2272_v35, %v6562_v59  ;;  %v2287_v55 = vrot.slane %v5550_v42, %v6562_v59  ;;  %v2295_v53 = vrot.slane %v2288_v43, %v6562_v59  ;;  %v2303_v56 = vrot.slane %v5551_v45, %v6562_v59  ;;  %v209_v42 = vld [vmem:[%s7730_s9 + $0x10] sm:$0xff]  ;;  %v210_v43 = vld [vmem:[%s7730_s9 + $0x18] sm:$0xff]  ;;  %s6345_s9 = smov [#allocation17]  }
 0x683   :  { %v2828_v35 = vpack.c.bf16 %v208_v39, %v207_v48  ;;  %v2829_v45 = vpack.c.bf16 %v210_v43, %v209_v42 }
 0x684   :  { %v2305_v57 = vcombine.high %v2279_v32, %v2287_v55  ;;  %v2321_v58 = vcombine.high %v2295_v53, %v2303_v56  ;;  %v2304_v60 = vcombine.low %v2279_v32, %v2287_v55  ;;  %v2320_v61 = vcombine.low %v2295_v53, %v2303_v56 }
 0x686   :  { %v2319_v63 = vrot.slane %v2305_v57, %v6573_v3  ;;  %v2335_v2 = vrot.slane %v2321_v58, %v6573_v3  ;;  %v2312_v4 = vrot.slane %v2304_v60, %v6573_v3  ;;  %v2328_v50 = vrot.slane %v2320_v61, %v6573_v3 }
 0x688   :  { %v2338_v5 = vcombine.low %v2319_v63, %v2335_v2  ;;  %v2337_v49 = vcombine.high %v2312_v4, %v2328_v50  ;;  %v2336_v10 = vcombine.low %v2312_v4, %v2328_v50  ;;  %v2339_v13 = vcombine.high %v2319_v63, %v2335_v2  ;;  %v6019_v63 = vld [vmem:[#allocation8 + $0x8] sm:$0xff]   ;;  %v6020_v2 = vld [vmem:[#allocation8] sm:$0xff]   ;;  %v5563_v50 = vld [vmem:[%s7717_s10] ss:$0 sm:$0xff] }
 0x689   :  { %5820 = vmatpush3.bf16.msra.mxu0 %v6019_v63 }
 0x68a   :  { %v5988_v9 = vpack.i.bf16 %v2338_v5, %v2270_v8  ;;  %v5983_v12 = vpack.i.bf16 %v2337_v49, %v2269_v54  ;;  %v5993_v14 = vpack.i.bf16 %v2339_v13, %v2271_v52  ;;  %5821 = vmatprep.subr.bf16.mxu0 %v6335_v15 }
 0x68c   :  { %5989 = vrot.lane.b32.xlu1 %v5988_v9, %s6343_s27  ;;  %5984 = vrot.lane.b32.xlu0 %v5983_v12, %s6330_s0 }
 0x68d   :  { %5822 = vmatpush3.bf16.msra.mxu0 %v6020_v2 }
 0x68e   :  { %5835 = vmatprep.subr.bf16.mxu0 %v6335_v15 }
 0x690   :  { %5994 = vrot.lane.b32.xlu0 %v5993_v14, %s6344_s25 }
 0x6fe   :  { %v5990_v16 = vpop.permute.xlu1 %5989  ;;  %v5985_v19 = vpop.permute.xlu0 %5984 }
 0x6ff   :  { %v5987_v0 = vunpack.i.h.bf16 %v5985_v19  ;;  %v5986_v1 = vunpack.i.l.bf16 %v5985_v19  ;;  %v5992_v20 = vunpack.i.h.bf16 %v5990_v16  ;;  %v5991_v8 = vunpack.i.l.bf16 %v5990_v16 }
 0x701   :  { %v2364_v54 = vsel %vm1218_vm2, %v2268_v40, %v5986_v1  ;;  %v2365_v21 = vsel %vm1218_vm2, %v2336_v10, %v5987_v0  ;;  %v2376_v40 = vrot.slane %v6931_v44, %v2375_v7 }
 0x702   :  { %v5995_v6 = vpop.permute.xlu0 %5994  ;;  %v2367_v22 = vsel %vm2366_vm4, %v2364_v54, %v5991_v8  ;;  %v2368_v23 = vsel %vm2366_vm4, %v2365_v21, %v5992_v20  ;;  %v2463_v54 = vsub.s32 2, %v6503_v24 }
 0x703   :  { %v5997_v51 = vunpack.i.h.bf16 %v5995_v6  ;;  %v5996_v52 = vunpack.i.l.bf16 %v5995_v6 }
 0x705   :  { %v2370_v41 = vsel %vm2369_vm5, %v2367_v22, %v5996_v52  ;;  %v2371_v29 = vsel %vm2369_vm5, %v2368_v23, %v5997_v51  ;;  %v2464_v51 = vrot.slane %v6931_v44, %v2463_v54  ;;  %v2469_v52 = vsub.s32 3, %v6503_v24 }
 0x706   :  { %v2372_v34 = vpack.c.bf16 %v2371_v29, %v2370_v41 }
 0x707   :  { %v2470_v29 = vrot.slane %v6931_v44, %v2469_v52 }
 0x708   :  { %5816 = vmatmul.mubr.msk.bf16.vlgmr.msra.gmra.mxu1 %vm215_vm0, %v2372_v34 }
 0x709   :  { %5828 = vmatpush3.bf16.msra.mxu1 %v6017_v17  ;;  %5831 = vmatprep.mubr.msk.bf16.mxu1 %vm215_vm0, %v2828_v35 }
 0x70a   :  { %5829 = vmatprep.subr.bf16.mxu1 %v6018_v18 }
 0x70d   :  { %5830 = vmatpush3.bf16.msra.mxu1 %v6018_v18 }
 0x70e   :  { %5841 = vmatprep.subr.bf16.mxu1 %v6335_v15 }
 0x710   :  { %5832 = vmatmul.mubr.msk.bf16.vlgmr.msra.gmra.mxu1 %vm215_vm0, %v2829_v45 }
 0x711   :  { %5843 = vmatprep.mubr.msk.bf16.mxu1 %vm6336_vm1, %v6335_v15 }
 0x7c8   :  { %v2426_v25 = vpop.f32.mrf.mxu1 }
 0x7c9   :  { %v2427_v26 = vadd.f32 %v2426_v25, %v2376_v40 }
 0x7ca   :  { %v5817_v27 = vpop.f32.mrf.mxu1 }
 0x7cb   :  { %v6937_v33 = vadd.f32 %v6106_v28, %v2427_v26 }
 0x7cc   :  { %v2429_v47 = vpop.f32.mrf.mxu1 }
 0x7cd   :  { %v2430_v46 = vadd.f32 %v2429_v47, %v2376_v40  ;;  %v2435_v31 = vsel %vm215_vm0, %v6937_v33, 0.0 }
 0x7ce   :  { %2436 = vadd.xlane.f32.xlu1 %v2435_v31  ;;  %v5818_v11 = vpop.f32.mrf.mxu1 }
 0x7cf   :  { %v6944_v37 = vadd.f32 %v6107_v36, %v2430_v46 }
 0x7d0   :  { %v5833_v4 = vpop.f32.mrf.mxu1 }
 0x7d1   :  { %v2438_v38 = vsel %vm215_vm0, %v6944_v37, 0.0  ;;  %v6984_v13 = vadd.f32 %v5833_v4, %v5563_v50 }
 0x7d2   :  { %2439 = vadd.xlane.f32.xlu0 %v2438_v38  ;;  %v2888_v5 = vpop.f32.mrf.mxu1 }
 0x7d3   :  { %v6974_v49 = vadd.f32 %v5563_v50, %v2888_v5 }
 0x7d4   :  { %v5834_v10 = vpop.f32.mrf.mxu1 }
 0x7d5   :  { %v6990_v14 = vadd.f32 %v5834_v10, %v5563_v50 }
 0x7d6   :  { %v2891_v9 = vpop.f32.mrf.mxu1 }
 0x7d7   :  { %v6978_v12 = vadd.f32 %v5563_v50, %v2891_v9 }
 0x7df   :  { %2907 = vrot.lane.b32.xlu1 %v6974_v49, %s6338_s23 }
 0x7e3   :  { %2919 = vrot.lane.b32.xlu1 %v6974_v49, %s6337_s2 }
 0x7e7   :  { %2921 = vrot.lane.b32.xlu1 %v6978_v12, %s6337_s2 }
 0x7eb   :  { %2931 = vrot.lane.b32.xlu1 %v6974_v49, %s6339_s24 }
 0x7ef   :  { %2913 = vrot.lane.b32.xlu1 %v6990_v14, %s6338_s23 }
 0x857   :  { %v2437_v30 = vpop.xlane.xlu1 %2436 }
 0x858   :  { %v2441_v32 = vmul.f32 0.03125, %v2437_v30 }
 0x85a   :  { %v2443_v55 = vsub.f32 %v6937_v33, %v2441_v32 }
 0x85b   :  { %v2440_v53 = vpop.xlane.xlu0 %2439  ;;  %v7005_v26 = vpop.permute.xlu1 %2907 }
 0x85c   :  { %v2442_v56 = vmul.f32 0.03125, %v2440_v53  ;;  %v2445_v57 = vmul.f32 %v2443_v55, %v2443_v55 }
 0x85e   :  { %v2444_v58 = vsub.f32 %v6944_v37, %v2442_v56  ;;  %v2447_v60 = vsel %vm215_vm0, %v2445_v57, 0.0 }
 0x85f   :  { %2448 = vadd.xlane.f32.xlu0 %v2447_v60  ;;  %v7007_v27 = vpop.permute.xlu1 %2919 }
 0x860   :  { %v2446_v61 = vmul.f32 %v2444_v58, %v2444_v58  ;;  %v2943_v38 = vcombine.low %v6974_v49, %v7007_v27  ;;  %v2944_v17 = vcombine.high %v6974_v49, %v7007_v27 }
 0x862   :  { %v2450_v62 = vsel %vm215_vm0, %v2446_v61, 0.0  ;;  %v2951_v43 = vrot.slane %v2943_v38, %v6562_v59  ;;  %v2958_v45 = vrot.slane %v2944_v17, %v6562_v59 }
 0x863   :  { %2451 = vadd.xlane.f32.xlu0 %v2450_v62  ;;  %v7011_v47 = vpop.permute.xlu1 %2921 }
 0x864   :  { %v3011_v44 = vcombine.low %v6978_v12, %v7011_v47  ;;  %v3012_v31 = vcombine.high %v6978_v12, %v7011_v47 }
 0x866   :  { %v3019_v18 = vrot.slane %v3011_v44, %v6562_v59  ;;  %v3026_v48 = vrot.slane %v3012_v31, %v6562_v59 }
 0x867   :  { %v7031_v42 = vpop.permute.xlu1 %2931 }
 0x868   :  { %v2959_v30 = vcombine.low %v7005_v26, %v7031_v42  ;;  %v2960_v32 = vcombine.high %v7005_v26, %v7031_v42 }
 0x86a   :  { %v2974_v60 = vrot.slane %v2960_v32, %v6562_v59 }
 0x86c   :  { %v2991_v63 = vcombine.low %v2958_v45, %v2974_v60  ;;  %v2992_v2 = vcombine.high %v2958_v45, %v2974_v60 }
 0x879   :  { %2909 = vrot.lane.b32.xlu0 %v6978_v12, %s6338_s23 }
 0x87d   :  { %2933 = vrot.lane.b32.xlu0 %v6978_v12, %s6339_s24 }
 0x881   :  { %2911 = vrot.lane.b32.xlu0 %v6984_v13, %s6338_s23 }
 0x8e8   :  { %v2449_v16 = vpop.xlane.xlu0 %2448 }
 0x8e9   :  { %v2453_v19 = vmul.f32 0.03125, %v2449_v16 }
 0x8eb   :  { %v2455_v0 = vadd.f32 1e-06, %v2453_v19  ;;  %v2999_v19 = vrot.slane %v2991_v63, %v6573_v3 }
 0x8ec   :  { %v2452_v1 = vpop.xlane.xlu0 %2451 }
 0x8ed   :  { %6065 = vrsqrt.f32 %v2455_v0  ;;  %v2454_v20 = vmul.f32 0.03125, %v2452_v1  ;;  %v3006_v0 = vrot.slane %v2992_v2, %v6573_v3 }
 0x8ef   :  { %v2456_v8 = vadd.f32 1e-06, %v2454_v20  ;;  %v5569_v54 = vcombine.high %v2999_v19, %v3006_v0 }
 0x8f0   :  { %v7009_v28 = vpop.permute.xlu0 %2909 }
 0x8f1   :  { %6067 = vrsqrt.f32 %v2456_v8  ;;  %v3231_v8 = vcombine.low %v2999_v19, %v3006_v0  ;;  %v5555_v19 = vld [vmem:[%s7715_s8] ss:$0 sm:$0xff] }
 0x8f4   :  { %v7013_v46 = vpop.permute.xlu0 %2933 }
 0x8f5   :  { %v3027_v11 = vcombine.low %v7009_v28, %v7013_v46  ;;  %v3028_v36 = vcombine.high %v7009_v28, %v7013_v46 }
 0x8f7   :  { %v3035_v39 = vrot.slane %v3027_v11, %v6562_v59  ;;  %v3042_v35 = vrot.slane %v3028_v36, %v6562_v59 }
 0x8f9   :  { %v3044_v53 = vcombine.high %v3019_v18, %v3035_v39  ;;  %v3059_v56 = vcombine.low %v3026_v48, %v3042_v35  ;;  %v3060_v57 = vcombine.high %v3026_v48, %v3042_v35 }
 0x8fa   :  { %v6066_v21 = vpop.eup %6065 }
 0x8fb   :  { %v2459_v6 = vmul.f32 %v6066_v21, %v2443_v55  ;;  %v3043_v55 = vcombine.low %v3019_v18, %v3035_v39  ;;  %v3058_v50 = vrot.slane %v3044_v53, %v6573_v3  ;;  %v3067_v5 = vrot.slane %v3059_v56, %v6573_v3 }
 0x8fc   :  { %v3074_v10 = vrot.slane %v3060_v57, %v6573_v3 }
 0x8fd   :  { %v2465_v41 = vmul.f32 %v2464_v51, %v2459_v6  ;;  %v3051_v4 = vrot.slane %v3043_v55, %v6573_v3 }
 0x8fe   :  { %v6068_v22 = vpop.eup %6067  ;;  %v5571_v52 = vcombine.high %v3067_v5, %v3074_v10 }
 0x8ff   :  { %v2460_v23 = vmul.f32 %v6068_v22, %v2444_v58  ;;  %v2471_v7 = vadd.f32 %v2470_v29, %v2465_v41  ;;  %v2967_v58 = vrot.slane %v2959_v30, %v6562_v59  ;;  %v3283_v21 = vcombine.low %v3051_v4, %v3058_v50 }
 0x900   :  { %v5570_v6 = vcombine.high %v3051_v4, %v3058_v50  ;;  %v3238_v41 = vrot.slane %v3231_v8, %v6562_v59 }
 0x901   :  { %v2466_v34 = vmul.f32 %v2464_v51, %v2460_v23  ;;  %v2975_v61 = vcombine.low %v2951_v43, %v2967_v58  ;;  %v2976_v62 = vcombine.high %v2951_v43, %v2967_v58  ;;  %v3299_v51 = vcombine.low %v3067_v5, %v3074_v10 }
 0x903   :  { %v2472_v40 = vadd.f32 %v2470_v29, %v2466_v34  ;;  %v2983_v9 = vrot.slane %v2975_v61, %v6573_v3  ;;  %v2990_v16 = vrot.slane %v2976_v62, %v6573_v3  ;;  %v3246_v29 = vrot.slane %v5569_v54, %v6562_v59 }
 0x904   :  { %v3290_v34 = vrot.slane %v3283_v21, %v6562_v59 }
 0x905   :  { %v2473_v25 = vpack.c.bf16 %v2472_v40, %v2471_v7  ;;  %v3215_v1 = vcombine.low %v2983_v9, %v2990_v16  ;;  %v5568_v20 = vcombine.high %v2983_v9, %v2990_v16  ;;  %v3298_v7 = vrot.slane %v5570_v6, %v6562_v59 }
 0x906   :  { %v3306_v40 = vrot.slane %v3299_v51, %v6562_v59  ;;  %v3263_v31 = vcombine.low %v3238_v41, %v3246_v29  ;;  %v3264_v32 = vcombine.high %v3238_v41, %v3246_v29 }
 0x907   :  { %5824 = vmatmul.mubr.msk.bf16.vlgmr.msra.gmra.mxu0 %vm215_vm0, %v2473_v25  ;;  %v3222_v22 = vrot.slane %v3215_v1, %v6562_v59  ;;  %v3230_v23 = vrot.slane %v5568_v20, %v6562_v59  ;;  %v3314_v25 = vrot.slane %v5571_v52, %v6562_v59  ;;  %v3315_v11 = vcombine.low %v3290_v34, %v3298_v7 }
 0x908   :  { %5837 = vmatprep.mubr.msk.bf16.mxu0 %vm6336_vm1, %v6335_v15  ;;  %v3271_v17 = vrot.slane %v3263_v31, %v6573_v3  ;;  %v3316_v55 = vcombine.high %v3290_v34, %v3298_v7  ;;  %v3278_v60 = vrot.slane %v3264_v32, %v6573_v3 }
 0x909   :  { %v3247_v44 = vcombine.low %v3222_v22, %v3230_v23  ;;  %v3331_v36 = vcombine.low %v3306_v40, %v3314_v25  ;;  %v3323_v18 = vrot.slane %v3315_v11, %v6573_v3  ;;  %v3248_v30 = vcombine.high %v3222_v22, %v3230_v23 }
 0x90a   :  { %v3332_v53 = vcombine.high %v3306_v40, %v3314_v25  ;;  %v3330_v61 = vrot.slane %v3316_v55, %v6573_v3 }
 0x90b   :  { %v3255_v38 = vrot.slane %v3247_v44, %v6573_v3  ;;  %v3339_v48 = vrot.slane %v3331_v36, %v6573_v3  ;;  %v3262_v58 = vrot.slane %v3248_v30, %v6573_v3 }
 0x90c   :  { %v3346_v62 = vrot.slane %v3332_v53, %v6573_v3 }
 0x90d   :  { %v3279_v39 = vcombine.low %v3255_v38, %v3271_v17  ;;  %v3280_v35 = vcombine.high %v3255_v38, %v3271_v17  ;;  %v3347_v43 = vcombine.low %v3323_v18, %v3339_v48  ;;  %v3348_v45 = vcombine.high %v3323_v18, %v3339_v48 }
 0x90e   :  { %v3281_v4 = vcombine.low %v3262_v58, %v3278_v60  ;;  %v3349_v50 = vcombine.low %v3330_v61, %v3346_v62  ;;  %v3282_v5 = vcombine.high %v3262_v58, %v3278_v60  ;;  %v3350_v10 = vcombine.high %v3330_v61, %v3346_v62 }
 0x90f   :  { %v4087_v56 = vpack.c.bf16 %v3347_v43, %v3279_v39  ;;  %v4088_v57 = vpack.c.bf16 %v3348_v45, %v3280_v35 }
 0x910   :  { %v7069_v9 = vpack.c.bf16 %v3349_v50, %v3281_v4  ;;  %v7071_v16 = vpack.c.bf16 %v3350_v10, %v3282_v5 }
 0x911   :  { %v4099_v63 = vsel %vm1218_vm2, %v4087_v56, 0  ;;  %v4145_v2 = vsel %vm1218_vm2, %v4088_v57, 0 }
 0x912   :  { %5836 = vmatpush3.bf16.xpose.msra.mxu0 %v4099_v63  ;;  %5842 = vmatpush3.bf16.xpose.msra.mxu1 %v4145_v2 }
 0x913   :  { %5847 = vmatprep.subr.bf16.mxu0 %v6335_v15  ;;  %5853 = vmatprep.subr.bf16.mxu1 %v6335_v15 }
 0x9c7   :  { %v2529_v0 = vpop.f32.mrf.mxu0 }
 0x9c8   :  { %v2530_v1 = vadd.f32 %v5555_v19, %v2529_v0 }
 0x9c9   :  { %v5825_v20 = vpop.f32.mrf.mxu0 }
 0x9ca   :  { %2544 = vrot.lane.b32.xlu0 %v2530_v1, %s6337_s2  ;;  %2538 = vrot.lane.b32.xlu1 %v2530_v1, %s6338_s23 }
 0x9cb   :  { %v2532_v8 = vpop.f32.mrf.mxu0 }
 0x9cc   :  { %v7085_v21 = vadd.f32 %v5555_v19, %v2532_v8  ;;  %v7171_v8 = vsel %vm1218_vm2, %v7069_v9, 0 }
 0x9cd   :  { %v5826_v54 = vpop.f32.mrf.mxu0 }
 0x9ce   :  { %2923 = vrot.lane.b32.xlu0 %v6984_v13, %s6337_s2  ;;  %2550 = vrot.lane.b32.xlu1 %v2530_v1, %s6339_s24 }
 0x9d2   :  { %2935 = vrot.lane.b32.xlu0 %v6984_v13, %s6339_s24  ;;  %2925 = vrot.lane.b32.xlu1 %v6990_v14, %s6337_s2 }
 0x9d6   :  { %2540 = vrot.lane.b32.xlu0 %v7085_v21, %s6338_s23  ;;  %2937 = vrot.lane.b32.xlu1 %v6990_v14, %s6339_s24 }
 0x9da   :  { %2552 = vrot.lane.b32.xlu0 %v7085_v21, %s6339_s24  ;;  %2546 = vrot.lane.b32.xlu1 %v7085_v21, %s6337_s2 }
 0x9de   :  { %3489 = vrot.lane.b32.xlu0 %v6978_v12, %s6340_s5  ;;  %3487 = vrot.lane.b32.xlu1 %v6974_v49, %s6340_s5  ;;  %v2912_v49 = vpop.permute.xlu0 %2911  ;;  %v7116_v12 = vpop.permute.xlu1 %2913 }
 0x9e2   :  { %3495 = vrot.lane.b32.xlu1 %v7005_v26, %s6340_s5  ;;  %3505 = vrot.lane.b32.xlu0 %v7011_v47, %s6340_s5 }
 0x9e6   :  { %3497 = vrot.lane.b32.xlu1 %v7009_v28, %s6340_s5  ;;  %3513 = vrot.lane.b32.xlu0 %v7013_v46, %s6340_s5 }
 0x9ea   :  { %3503 = vrot.lane.b32.xlu1 %v7007_v27, %s6340_s5  ;;  %3493 = vrot.lane.b32.xlu0 %v6990_v14, %s6340_s5 }
 0x9ee   :  { %3511 = vrot.lane.b32.xlu1 %v7031_v42, %s6340_s5 }
 0x9f2   :  { %3491 = vrot.lane.b32.xlu1 %v6984_v13, %s6340_s5 }
 0x9f6   :  { %3499 = vrot.lane.b32.xlu1 %v2912_v49, %s6340_s5 }
 0x9fa   :  { %3501 = vrot.lane.b32.xlu1 %v7116_v12, %s6340_s5 }
 0xa3c   :  { %v2545_v26 = vpop.permute.xlu0 %2544  ;;  %v2539_v28 = vpop.permute.xlu1 %2538 }
 0xa3d   :  { %v2556_v27 = vcombine.low %v2530_v1, %v2545_v26  ;;  %v2557_v47 = vcombine.high %v2530_v1, %v2545_v26 }
 0xa3f   :  { %v2564_v23 = vrot.slane %v2556_v27, %v6562_v59  ;;  %v2571_v41 = vrot.slane %v2557_v47, %v6562_v59 }
 0xa40   :  { %v7120_v46 = vpop.permute.xlu0 %2923  ;;  %v2551_v6 = vpop.permute.xlu1 %2550 }
 0xa41   :  { %v2572_v51 = vcombine.low %v2539_v28, %v2551_v6  ;;  %v2573_v42 = vcombine.high %v2539_v28, %v2551_v6  ;;  %v3079_v52 = vcombine.low %v6984_v13, %v7120_v46  ;;  %v3080_v22 = vcombine.high %v6984_v13, %v7120_v46 }
 0xa43   :  { %v2580_v29 = vrot.slane %v2572_v51, %v6562_v59  ;;  %v2587_v34 = vrot.slane %v2573_v42, %v6562_v59  ;;  %v3087_v36 = vrot.slane %v3079_v52, %v6562_v59  ;;  %v3094_v13 = vrot.slane %v3080_v22, %v6562_v59 }
 0xa44   :  { %v7130_v7 = vpop.permute.xlu0 %2935  ;;  %v7132_v40 = vpop.permute.xlu1 %2925 }
 0xa45   :  { %v2588_v25 = vcombine.low %v2564_v23, %v2580_v29  ;;  %v2589_v44 = vcombine.high %v2564_v23, %v2580_v29  ;;  %v2604_v31 = vcombine.low %v2571_v41, %v2587_v34  ;;  %v2605_v11 = vcombine.high %v2571_v41, %v2587_v34 }
 0xa46   :  { %v3095_v38 = vcombine.low %v2912_v49, %v7130_v7  ;;  %v3096_v17 = vcombine.high %v2912_v49, %v7130_v7  ;;  %v3147_v30 = vcombine.low %v6990_v14, %v7132_v40  ;;  %v3148_v32 = vcombine.high %v6990_v14, %v7132_v40 }
 0xa47   :  { %v2596_v18 = vrot.slane %v2588_v25, %v6573_v3  ;;  %v2603_v48 = vrot.slane %v2589_v44, %v6573_v3  ;;  %v2612_v39 = vrot.slane %v2604_v31, %v6573_v3  ;;  %v2619_v35 = vrot.slane %v2605_v11, %v6573_v3 }
 0xa48   :  { %v3103_v43 = vrot.slane %v3095_v38, %v6562_v59  ;;  %v3110_v45 = vrot.slane %v3096_v17, %v6562_v59  ;;  %v2541_v55 = vpop.permute.xlu0 %2540  ;;  %v7148_v53 = vpop.permute.xlu1 %2937  ;;  %v3155_v0 = vrot.slane %v3147_v30, %v6562_v59  ;;  %v3162_v28 = vrot.slane %v3148_v32, %v6562_v59 }
 0xa49   :  { %v2692_v56 = vcombine.low %v2596_v18, %v2603_v48  ;;  %v5559_v57 = vcombine.high %v2596_v18, %v2603_v48  ;;  %v2708_v58 = vcombine.low %v2612_v39, %v2619_v35  ;;  %v5560_v60 = vcombine.high %v2612_v39, %v2619_v35 }
 0xa4a   :  { %v3111_v61 = vcombine.low %v3087_v36, %v3103_v43  ;;  %v3112_v62 = vcombine.high %v3087_v36, %v3103_v43  ;;  %v3127_v63 = vcombine.low %v3094_v13, %v3110_v45  ;;  %v3128_v2 = vcombine.high %v3094_v13, %v3110_v45 }
 0xa4b   :  { %v7151_v4 = vrot.slane %v2692_v56, %v6562_v59  ;;  %v7154_v50 = vrot.slane %v5559_v57, %v6562_v59  ;;  %v7157_v5 = vrot.slane %v2708_v58, %v6562_v59  ;;  %v7160_v14 = vrot.slane %v5560_v60, %v6562_v59 }
 0xa4c   :  { %v7163_v10 = vrot.slane %v3111_v61, %v6573_v3  ;;  %v7166_v19 = vrot.slane %v3112_v62, %v6573_v3  ;;  %v2553_v1 = vpop.permute.xlu0 %2552  ;;  %v2547_v20 = vpop.permute.xlu1 %2546  ;;  %v7178_v26 = vrot.slane %v3127_v63, %v6573_v3  ;;  %v7186_v9 = vrot.slane %v3128_v2, %v6573_v3 }
 0xa4d   :  { %v2724_v54 = vcombine.low %v7151_v4, %v7154_v50  ;;  %v2740_v49 = vcombine.low %v7157_v5, %v7160_v14  ;;  %v2725_v27 = vcombine.high %v7151_v4, %v7154_v50  ;;  %v2741_v47 = vcombine.high %v7157_v5, %v7160_v14 }
 0xa4e   :  { %v3351_v6 = vcombine.low %v7163_v10, %v7166_v19  ;;  %v3163_v51 = vcombine.low %v7116_v12, %v7148_v53  ;;  %v3164_v42 = vcombine.high %v7116_v12, %v7148_v53  ;;  %v2640_v52 = vcombine.low %v2541_v55, %v2553_v1 }
 0xa4f   :  { %v2641_v22 = vcombine.high %v2541_v55, %v2553_v1  ;;  %v2624_v23 = vcombine.low %v7085_v21, %v2547_v20  ;;  %v2625_v41 = vcombine.high %v7085_v21, %v2547_v20  ;;  %v2732_v25 = vrot.slane %v2724_v54, %v6573_v3 }
 0xa50   :  { %v3490_v29 = vpop.permute.xlu0 %3489  ;;  %v7196_v34 = vpop.permute.xlu1 %3487  ;;  %v2748_v44 = vrot.slane %v2740_v49, %v6573_v3  ;;  %v3171_v31 = vrot.slane %v3163_v51, %v6562_v59  ;;  %v3178_v11 = vrot.slane %v3164_v42, %v6562_v59  ;;  %v2648_v36 = vrot.slane %v2640_v52, %v6562_v59 }
 0xa51   :  { %v2655_v12 = vrot.slane %v2641_v22, %v6562_v59  ;;  %v5572_v13 = vcombine.high %v7163_v10, %v7166_v19  ;;  %v3367_v21 = vcombine.low %v7178_v26, %v7186_v9  ;;  %v2632_v38 = vrot.slane %v2624_v23, %v6562_v59 }
 0xa52   :  { %v2639_v17 = vrot.slane %v2625_v41, %v6562_v59  ;;  %v3179_v18 = vcombine.low %v3155_v0, %v3171_v31  ;;  %v3180_v48 = vcombine.high %v3155_v0, %v3171_v31  ;;  %v3195_v39 = vcombine.low %v3162_v28, %v3178_v11 }
 0xa53   :  { %v3196_v35 = vcombine.high %v3162_v28, %v3178_v11  ;;  %v2656_v43 = vcombine.low %v2632_v38, %v2648_v36  ;;  %v2657_v45 = vcombine.high %v2632_v38, %v2648_v36  ;;  %v2756_v60 = vcombine.low %v2732_v25, %v2748_v44 }
 0xa54   :  { %v2672_v30 = vcombine.low %v2639_v17, %v2655_v12  ;;  %v2673_v32 = vcombine.high %v2639_v17, %v2655_v12  ;;  %v3506_v55 = vpop.permute.xlu0 %3505  ;;  %v7210_v56 = vpop.permute.xlu1 %3495  ;;  %v7213_v57 = vrot.slane %v3179_v18, %v6573_v3  ;;  %v7216_v58 = vrot.slane %v3180_v48, %v6573_v3 }
 0xa55   :  { %v2757_v61 = vcombine.high %v2732_v25, %v2748_v44  ;;  %v2664_v62 = vrot.slane %v2656_v43, %v6573_v3  ;;  %v2671_v63 = vrot.slane %v2657_v45, %v6573_v3  ;;  %v5573_v1 = vcombine.high %v7178_v26, %v7186_v9 }
 0xa56   :  { %v2680_v2 = vrot.slane %v2672_v30, %v6573_v3  ;;  %v2687_v0 = vrot.slane %v2673_v32, %v6573_v3  ;;  %v7225_v20 = vrot.slane %v3195_v39, %v6573_v3  ;;  %v7228_v54 = vrot.slane %v3196_v35, %v6573_v3 }
 0xa57   :  { %v3419_v49 = vcombine.low %v7213_v57, %v7216_v58  ;;  %v2760_v28 = vcombine.low %v2664_v62, %v2671_v63  ;;  %v5561_v51 = vcombine.high %v2664_v62, %v2671_v63  ;;  %v3603_v41 = vcombine.low %v3490_v29, %v3506_v55 }
 0xa58   :  { %v2776_v42 = vcombine.low %v2680_v2, %v2687_v0  ;;  %v5562_v52 = vcombine.high %v2680_v2, %v2687_v0  ;;  %v3514_v22 = vpop.permute.xlu0 %3513  ;;  %v3498_v23 = vpop.permute.xlu1 %3497  ;;  %v3604_v25 = vcombine.high %v3490_v29, %v3506_v55  ;;  %v4079_v44 = vpack.c.bf16 %v2756_v60, %v2756_v60 }
 0xa59   :  { %v4080_v31 = vpack.c.bf16 %v2757_v61, %v2757_v61  ;;  %v7233_v11 = vrot.slane %v2760_v28, %v6562_v59  ;;  %v7236_v36 = vrot.slane %v5561_v51, %v6562_v59  ;;  %v5574_v17 = vcombine.high %v7213_v57, %v7216_v58 }
 0xa5a   :  { %v7239_v12 = vrot.slane %v2776_v42, %v6562_v59  ;;  %v7242_v38 = vrot.slane %v5562_v52, %v6562_v59  ;;  %v3435_v29 = vcombine.low %v7225_v20, %v7228_v54  ;;  %5838 = vmatmul.mubr.msk.bf16.vlgmr.msra.gmra.mxu0 %vm1218_vm2, %v4079_v44  ;;  %v4237_v18 = vsel %vm1218_vm2, %v7071_v16, 0 }
 0xa5b   :  { %5844 = vmatmul.mubr.msk.bf16.vlgmr.msra.gmra.mxu1 %vm1218_vm2, %v4080_v31  ;;  %v3619_v48 = vcombine.low %v3498_v23, %v3514_v22  ;;  %v5575_v39 = vcombine.high %v7225_v20, %v7228_v54  ;;  %v2792_v35 = vcombine.low %v7233_v11, %v7236_v36  ;;  %v3611_v43 = vrot.slane %v3603_v41, %v6562_v59 }
 0xa5c   :  { %v3618_v45 = vrot.slane %v3604_v25, %v6562_v59  ;;  %5848 = vmatpush3.bf16.xpose.msra.mxu0 %v7171_v8  ;;  %v3504_v30 = vpop.permute.xlu1 %3503  ;;  %v2793_v32 = vcombine.high %v7233_v11, %v7236_v36  ;;  %5854 = vmatpush3.bf16.xpose.msra.mxu1 %v4237_v18  ;;  %v3620_v55 = vcombine.high %v3498_v23, %v3514_v22 }
 0xa5d   :  { %v3627_v16 = vrot.slane %v3619_v48, %v6562_v59  ;;  %5849 = vmatprep.mubr.msk.bf16.mxu0 %vm6336_vm1, %v6335_v15  ;;  %v2808_v57 = vcombine.low %v7239_v12, %v7242_v38  ;;  %5855 = vmatprep.mubr.msk.bf16.mxu1 %vm6336_vm1, %v6335_v15  ;;  %v2739_v8 = vrot.slane %v2725_v27, %v6573_v3 }
 0xa5e   :  { %v2755_v58 = vrot.slane %v2741_v47, %v6573_v3  ;;  %5859 = vmatprep.subr.bf16.mxu0 %v6335_v15  ;;  %v3634_v60 = vrot.slane %v3620_v55, %v6562_v59  ;;  %v3535_v63 = vcombine.low %v7196_v34, %v3504_v30  ;;  %5865 = vmatprep.subr.bf16.mxu1 %v6335_v15 }
 0xa5f   :  { %v3635_v61 = vcombine.low %v3611_v43, %v3627_v16  ;;  %v3636_v62 = vcombine.high %v3611_v43, %v3627_v16  ;;  %v3536_v2 = vcombine.high %v7196_v34, %v3504_v30  ;;  %v7285_v50 = vrot.slane %v3351_v6, %v6562_v59 }
 0xa60   :  { %v2758_v0 = vcombine.low %v2739_v8, %v2755_v58  ;;  %v2759_v4 = vcombine.high %v2739_v8, %v2755_v58  ;;  %v3651_v27 = vcombine.low %v3618_v45, %v3634_v60  ;;  %v3652_v47 = vcombine.high %v3618_v45, %v3634_v60 }
 0xa61   :  { %v3643_v5 = vrot.slane %v3635_v61, %v6573_v3  ;;  %v3650_v14 = vrot.slane %v3636_v62, %v6573_v3  ;;  %v7293_v34 = vrot.slane %v5572_v13, %v6562_v59  ;;  %v7299_v6 = vrot.slane %v3367_v21, %v6562_v59  ;;  %v3512_v21 = vpop.permute.xlu1 %3511 }
 0xa62   :  { %v4081_v20 = vpack.c.bf16 %v2758_v0, %v2758_v0  ;;  %v4082_v54 = vpack.c.bf16 %v2759_v4, %v2759_v4  ;;  %v3659_v28 = vrot.slane %v3651_v27, %v6573_v3  ;;  %v3666_v51 = vrot.slane %v3652_v47, %v6573_v3 }
 0xa63   :  { %v3875_v42 = vcombine.low %v3643_v5, %v3650_v14  ;;  %v5578_v52 = vcombine.high %v3643_v5, %v3650_v14  ;;  %v7309_v10 = vrot.slane %v5573_v1, %v6562_v59  ;;  %v3383_v19 = vcombine.low %v7285_v50, %v7293_v34 }
 0xa64   :  { %5850 = vmatmul.mubr.msk.bf16.vlgmr.msra.gmra.mxu0 %vm1218_vm2, %v4081_v20  ;;  %5856 = vmatmul.mubr.msk.bf16.vlgmr.msra.gmra.mxu1 %vm1218_vm2, %v4082_v54  ;;  %v7314_v13 = vrot.slane %v3419_v49, %v6562_v59  ;;  %v2809_v22 = vcombine.high %v7239_v12, %v7242_v38  ;;  %v3891_v23 = vcombine.low %v3659_v28, %v3666_v51 }
 0xa65   :  { %v5579_v41 = vcombine.high %v3659_v28, %v3666_v51  ;;  %v3543_v25 = vrot.slane %v3535_v63, %v6562_v59  ;;  %5861 = vmatprep.mubr.msk.bf16.mxu0 %vm6336_vm1, %v6335_v15  ;;  %v3550_v26 = vrot.slane %v3536_v2, %v6562_v59  ;;  %v3399_v9 = vcombine.low %v7299_v6, %v7309_v10 }
 0xa66   :  { %v3434_v1 = vrot.slane %v5574_v17, %v6562_v59  ;;  %v3442_v49 = vrot.slane %v3435_v29, %v6562_v59  ;;  %5867 = vmatprep.mubr.msk.bf16.mxu1 %vm6336_vm1, %v6335_v15  ;;  %v7329_v44 = vrot.slane %v3875_v42, %v6562_v59  ;;  %v7332_v31 = vrot.slane %v5578_v52, %v6562_v59 }
 0xa67   :  { %v3450_v18 = vrot.slane %v5575_v39, %v6562_v59  ;;  %v3551_v48 = vcombine.low %v7210_v56, %v3512_v21  ;;  %v3391_v43 = vrot.slane %v3383_v19, %v6573_v3  ;;  %v3407_v45 = vrot.slane %v3399_v9, %v6573_v3 }
 0xa68   :  { %v3451_v17 = vcombine.low %v7314_v13, %v3434_v1  ;;  %v3552_v29 = vcombine.high %v7210_v56, %v3512_v21  ;;  %v7341_v30 = vrot.slane %v3891_v23, %v6562_v59  ;;  %v7344_v55 = vrot.slane %v5579_v41, %v6562_v59 }
 0xa69   :  { %v3467_v16 = vcombine.low %v3442_v49, %v3450_v18  ;;  %v3559_v8 = vrot.slane %v3551_v48, %v6562_v59  ;;  %v2800_v60 = vrot.slane %v2792_v35, %v6573_v3  ;;  %v2816_v56 = vrot.slane %v2808_v57, %v6573_v3 }
 0xa6a   :  { %v3459_v39 = vrot.slane %v3451_v17, %v6573_v3  ;;  %v3566_v58 = vrot.slane %v3552_v29, %v6562_v59  ;;  %v3384_v2 = vcombine.high %v7285_v50, %v7293_v34  ;;  %v3415_v0 = vcombine.low %v3391_v43, %v3407_v45 }
 0xa6b   :  { %v3475_v61 = vrot.slane %v3467_v16, %v6573_v3  ;;  %v3567_v62 = vcombine.low %v3543_v25, %v3559_v8  ;;  %v3568_v63 = vcombine.high %v3543_v25, %v3559_v8  ;;  %v3416_v4 = vcombine.high %v3391_v43, %v3407_v45 }
 0xa6c   :  { %v3583_v5 = vcombine.low %v3550_v26, %v3566_v58  ;;  %v3584_v14 = vcombine.high %v3550_v26, %v3566_v58  ;;  %v2824_v28 = vcombine.low %v2800_v60, %v2816_v56  ;;  %v2825_v51 = vcombine.high %v2800_v60, %v2816_v56 }
 0xa6d   :  { %v3483_v27 = vcombine.low %v3459_v39, %v3475_v61  ;;  %v3484_v47 = vcombine.high %v3459_v39, %v3475_v61  ;;  %v3575_v20 = vrot.slane %v3567_v62, %v6573_v3  ;;  %v3582_v54 = vrot.slane %v3568_v63, %v6573_v3 }
 0xa6e   :  { %v3591_v35 = vrot.slane %v3583_v5, %v6573_v3  ;;  %v3598_v57 = vrot.slane %v3584_v14, %v6573_v3  ;;  %v3400_v23 = vcombine.high %v7299_v6, %v7309_v10  ;;  %v3452_v41 = vcombine.high %v7314_v13, %v3434_v1 }
 0xa6f   :  { %v4091_v42 = vpack.c.bf16 %v3483_v27, %v3415_v0  ;;  %v4092_v52 = vpack.c.bf16 %v3484_v47, %v3416_v4  ;;  %v3807_v19 = vcombine.low %v3575_v20, %v3582_v54  ;;  %v5576_v50 = vcombine.high %v3575_v20, %v3582_v54 }
 0xa70   :  { %v3823_v34 = vcombine.low %v3591_v35, %v3598_v57  ;;  %v5577_v21 = vcombine.high %v3591_v35, %v3598_v57  ;;  %v3398_v17 = vrot.slane %v3384_v2, %v6573_v3  ;;  %v3414_v6 = vrot.slane %v3400_v23, %v6573_v3 }
 0xa71   :  { %v4283_v25 = vsel %vm1218_vm2, %v4091_v42, 0  ;;  %v4329_v26 = vsel %vm1218_vm2, %v4092_v52, 0  ;;  %v3814_v9 = vrot.slane %v3807_v19, %v6562_v59  ;;  %v3822_v48 = vrot.slane %v5576_v50, %v6562_v59 }
 0xa72   :  { %5860 = vmatpush3.bf16.xpose.msra.mxu0 %v4283_v25  ;;  %5866 = vmatpush3.bf16.xpose.msra.mxu1 %v4329_v26  ;;  %v3830_v43 = vrot.slane %v3823_v34, %v6562_v59  ;;  %v3838_v45 = vrot.slane %v5577_v21, %v6562_v59  ;;  %v3466_v10 = vrot.slane %v3452_v41, %v6573_v3  ;;  %v5592_v26 = vld [vmem:[%s7710_s3] ss:$0 sm:$0xff] }
 0xa73   :  { %5871 = vmatprep.subr.bf16.mxu0 %v6335_v15  ;;  %5877 = vmatprep.subr.bf16.mxu1 %v6335_v15  ;;  %v3468_v13 = vcombine.high %v3442_v49, %v3450_v18  ;;  %v4083_v1 = vpack.c.bf16 %v2824_v28, %v2824_v28  ;;  %v3839_v29 = vcombine.low %v3814_v9, %v3822_v48 }
 0xa74   :  { %v2807_v8 = vrot.slane %v2793_v32, %v6573_v3  ;;  %v2823_v39 = vrot.slane %v2809_v22, %v6573_v3  ;;  %v3855_v58 = vcombine.low %v3830_v43, %v3838_v45  ;;  %v4084_v60 = vpack.c.bf16 %v2825_v51, %v2825_v51 }
 0xa75   :  { %v3482_v16 = vrot.slane %v3468_v13, %v6573_v3  ;;  %v3907_v56 = vcombine.low %v7329_v44, %v7332_v31  ;;  %v3923_v49 = vcombine.low %v7341_v30, %v7344_v55  ;;  %v3840_v18 = vcombine.high %v3814_v9, %v3822_v48 }
 0xa76   :  { %v3417_v61 = vcombine.low %v3398_v17, %v3414_v6  ;;  %v3418_v63 = vcombine.high %v3398_v17, %v3414_v6  ;;  %v3847_v11 = vrot.slane %v3839_v29, %v6573_v3  ;;  %v3863_v36 = vrot.slane %v3855_v58, %v6573_v3 }
 0xa77   :  { %v3485_v62 = vcombine.low %v3466_v10, %v3482_v16  ;;  %v3486_v2 = vcombine.high %v3466_v10, %v3482_v16  ;;  %v2826_v32 = vcombine.low %v2807_v8, %v2823_v39  ;;  %v3915_v22 = vrot.slane %v3907_v56, %v6573_v3 }
 0xa78   :  { %v3931_v0 = vrot.slane %v3923_v49, %v6573_v3  ;;  %v3854_v4 = vrot.slane %v3840_v18, %v6573_v3  ;;  %v3856_v27 = vcombine.high %v3830_v43, %v3838_v45  ;;  %v3908_v47 = vcombine.high %v7329_v44, %v7332_v31 }
 0xa79   :  { %5862 = vmatmul.mubr.msk.bf16.vlgmr.msra.gmra.mxu0 %vm1218_vm2, %v4083_v1  ;;  %5868 = vmatmul.mubr.msk.bf16.vlgmr.msra.gmra.mxu1 %vm1218_vm2, %v4084_v60  ;;  %v4093_v12 = vpack.c.bf16 %v3485_v62, %v3417_v61  ;;  %v4094_v38 = vpack.c.bf16 %v3486_v2, %v3418_v63  ;;  %v3871_v20 = vcombine.low %v3847_v11, %v3863_v36 }
 0xa7a   :  { %5873 = vmatprep.mubr.msk.bf16.mxu0 %vm6336_vm1, %v6335_v15  ;;  %5879 = vmatprep.mubr.msk.bf16.mxu1 %vm6336_vm1, %v6335_v15  ;;  %v3872_v54 = vcombine.high %v3847_v11, %v3863_v36  ;;  %v3924_v35 = vcombine.high %v7341_v30, %v7344_v55  ;;  %v2827_v57 = vcombine.high %v2807_v8, %v2823_v39 }
 0xa7b   :  { %v4375_v5 = vsel %vm1218_vm2, %v4093_v12, 0  ;;  %v4421_v14 = vsel %vm1218_vm2, %v4094_v38, 0  ;;  %v3870_v28 = vrot.slane %v3856_v27, %v6573_v3  ;;  %v3922_v51 = vrot.slane %v3908_v47, %v6573_v3  ;;  %v5593_v12 = vld [vmem:[%s7710_s3 + $0x1] ss:$0 sm:$0xff] }
 0xa7c   :  { %5872 = vmatpush3.bf16.xpose.msra.mxu0 %v4375_v5  ;;  %5878 = vmatpush3.bf16.xpose.msra.mxu1 %v4421_v14  ;;  %v3939_v42 = vcombine.low %v3915_v22, %v3931_v0  ;;  %v3940_v52 = vcombine.high %v3915_v22, %v3931_v0  ;;  %v3938_v44 = vrot.slane %v3924_v35, %v6573_v3 }
 0xa7d   :  { %5883 = vmatprep.subr.bf16.mxu0 %v6335_v15  ;;  %5889 = vmatprep.subr.bf16.mxu1 %v6335_v15  ;;  %v3873_v31 = vcombine.low %v3854_v4, %v3870_v28  ;;  %v3874_v19 = vcombine.high %v3854_v4, %v3870_v28  ;;  %v4085_v30 = vpack.c.bf16 %v2826_v32, %v2826_v32 }
 0xa7e   :  { %v4579_v50 = vpack.c.bf16 %v3939_v42, %v3871_v20  ;;  %v4580_v34 = vpack.c.bf16 %v3940_v52, %v3872_v54  ;;  %v3941_v21 = vcombine.low %v3922_v51, %v3938_v44  ;;  %v3942_v23 = vcombine.high %v3922_v51, %v3938_v44 }
 0xa7f   :  { %v4086_v55 = vpack.c.bf16 %v2827_v57, %v2827_v57 }
 0xa80   :  { %v7410_v41 = vpack.c.bf16 %v3941_v21, %v3873_v31  ;;  %v7412_v25 = vpack.c.bf16 %v3942_v23, %v3874_v19 }
 0xa83   :  { %5874 = vmatmul.mubr.msk.bf16.vlgmr.msra.gmra.mxu0 %vm1218_vm2, %v4085_v30  ;;  %5880 = vmatmul.mubr.msk.bf16.vlgmr.msra.gmra.mxu1 %vm1218_vm2, %v4086_v55  ;;  %v7458_v30 = vpop.permute.xlu1 %3491 }
 0xa84   :  { %5884 = vmatpush3.bf16.msra.mxu0 %v4579_v50  ;;  %5890 = vmatpush3.bf16.msra.mxu1 %v4580_v34 }
 0xa85   :  { %5885 = vmatprep.mubr.msk.bf16.mxu0 %vm6336_vm1, %v6335_v15  ;;  %5891 = vmatprep.mubr.msk.bf16.mxu1 %vm6336_vm1, %v6335_v15 }
 0xa86   :  { %5895 = vmatprep.subr.bf16.mxu0 %v6335_v15  ;;  %5901 = vmatprep.subr.bf16.mxu1 %v6335_v15 }
 0xa87   :  { %v7460_v55 = vpop.permute.xlu1 %3499 }
 0xb1a   :  { %v4135_v9 = vpop.f32.mrf.mxu0 }
 0xb1b   :  { %v4181_v48 = vpop.f32.mrf.mxu1  ;;  %v7425_v43 = vadd.f32 %v5592_v26, %v4135_v9  ;;  %v7464_v9 = vpop.permute.xlu1 %3501 }
 0xb1c   :  { %v7427_v45 = vadd.f32 %v5592_v26, %v4181_v48  ;;  %v5839_v17 = vpop.f32.mrf.mxu0 }
 0xb1d   :  { %v5845_v6 = vpop.f32.mrf.mxu1  ;;  %v4483_v13 = vsel %vm2366_vm4, %v7425_v43, -inf }
 0xb1e   :  { %v4486_v10 = vsel %vm2366_vm4, %v7427_v45, -inf  ;;  %4484 = vmax.xlane.f32.xlu1 %v4483_v13  ;;  %v4138_v29 = vpop.f32.mrf.mxu0 }
 0xb1f   :  { %4487 = vmax.xlane.f32.xlu0 %v4486_v10  ;;  %v4184_v1 = vpop.f32.mrf.mxu1 }
 0xb20   :  { %v5840_v16 = vpop.f32.mrf.mxu0 }
 0xb21   :  { %v5846_v8 = vpop.f32.mrf.mxu1 }
 0xb24   :  { %v4227_v39 = vpop.f32.mrf.mxu0  ;;  %v4273_v58 = vpop.f32.mrf.mxu1 }
 0xb25   :  { %v4477_v60 = vadd.f32 %v5592_v26, %v4227_v39  ;;  %v4478_v18 = vadd.f32 %v5592_v26, %v4273_v58  ;;  %v7462_v26 = vpop.permute.xlu0 %3493 }
 0xb26   :  { %v5851_v56 = vpop.f32.mrf.mxu0  ;;  %v5857_v49 = vpop.f32.mrf.mxu1 }
 0xb27   :  { %v4489_v61 = vsel %vm2366_vm4, %v4477_v60, -inf  ;;  %v4492_v36 = vsel %vm2366_vm4, %v4478_v18, -inf }
 0xb28   :  { %v4276_v62 = vpop.f32.mrf.mxu1  ;;  %4490 = vmax.xlane.f32.xlu0 %v4489_v61  ;;  %v4230_v63 = vpop.f32.mrf.mxu0 }
 0xb2a   :  { %v5852_v2 = vpop.f32.mrf.mxu0  ;;  %v5858_v11 = vpop.f32.mrf.mxu1 }
 0xb2c   :  { %4493 = vmax.xlane.f32.xlu0 %v4492_v36 }
 0xb39   :  { %v4319_v38 = vpop.f32.mrf.mxu0  ;;  %v4365_v32 = vpop.f32.mrf.mxu1 }
 0xb3a   :  { %v7438_v22 = vadd.f32 %v5593_v12, %v4319_v38  ;;  %v7440_v0 = vadd.f32 %v5593_v12, %v4365_v32 }
 0xb3b   :  { %v5863_v4 = vpop.f32.mrf.mxu0  ;;  %v5869_v5 = vpop.f32.mrf.mxu1 }
 0xb3c   :  { %v4498_v14 = vsel %vm2366_vm4, %v7440_v0, -inf  ;;  %v4495_v27 = vsel %vm2366_vm4, %v7438_v22, -inf }
 0xb3d   :  { %4499 = vmax.xlane.f32.xlu0 %v4498_v14  ;;  %v4368_v47 = vpop.f32.mrf.mxu1  ;;  %4496 = vmax.xlane.f32.xlu1 %v4495_v27  ;;  %v4322_v20 = vpop.f32.mrf.mxu0 }
 0xb3f   :  { %v5864_v54 = vpop.f32.mrf.mxu0  ;;  %v5870_v35 = vpop.f32.mrf.mxu1 }
 0xb43   :  { %v4411_v57 = vpop.f32.mrf.mxu0  ;;  %v4457_v28 = vpop.f32.mrf.mxu1 }
 0xb44   :  { %v7446_v51 = vadd.f32 %v5593_v12, %v4411_v57  ;;  %v7448_v42 = vadd.f32 %v5593_v12, %v4457_v28 }
 0xb45   :  { %v5875_v52 = vpop.f32.mrf.mxu0  ;;  %v5881_v44 = vpop.f32.mrf.mxu1 }
 0xb46   :  { %v4504_v31 = vsel %vm2366_vm4, %v7448_v42, -inf  ;;  %v4501_v19 = vsel %vm2366_vm4, %v7446_v51, -inf }
 0xb47   :  { %4505 = vmax.xlane.f32.xlu0 %v4504_v31  ;;  %v4460_v50 = vpop.f32.mrf.mxu1  ;;  %4502 = vmax.xlane.f32.xlu1 %v4501_v19  ;;  %v4414_v34 = vpop.f32.mrf.mxu0 }
 0xb49   :  { %v5876_v21 = vpop.f32.mrf.mxu0  ;;  %v5882_v23 = vpop.f32.mrf.mxu1 }
 0xb58   :  { %3507 = vrot.lane.b32.xlu1 %v7120_v46, %s6340_s5 }
 0xb5d   :  { %3509 = vrot.lane.b32.xlu0 %v7132_v40, %s6340_s5 }
 0xba7   :  { %v4485_v17 = vpop.xlane.xlu1 %4484 }
 0xba8   :  { %v4488_v48 = vpop.xlane.xlu0 %4487  ;;  %v4507_v10 = vsub.f32 %v7425_v43, %v4485_v17 }
 0xba9   :  { %v4508_v6 = vsub.f32 %v7427_v45, %v4488_v48 }
 0xbaa   :  { %v4515_v1 = vmul.f32 1.442695, %v4507_v10 }
 0xbab   :  { %v4517_v13 = vmul.f32 1.442695, %v4508_v6 }
 0xbad   :  { %6069 = vpow2.f32 %v4517_v13 }
 0xbae   :  { %6071 = vpow2.f32 %v4515_v1 }
 0xbb1   :  { %v4491_v46 = vpop.xlane.xlu0 %4490 }
 0xbb2   :  { %v4509_v40 = vsub.f32 %v4477_v60, %v4491_v46 }
 0xbb4   :  { %v4519_v29 = vmul.f32 1.442695, %v4509_v40 }
 0xbb5   :  { %v4494_v16 = vpop.xlane.xlu0 %4493 }
 0xbb6   :  { %6073 = vpow2.f32 %v4519_v29  ;;  %v4510_v8 = vsub.f32 %v4478_v18, %v4494_v16 }
 0xbb8   :  { %v4521_v39 = vmul.f32 1.442695, %v4510_v8 }
 0xbba   :  { %v6070_v58 = vpop.eup %6069  ;;  %6075 = vpow2.f32 %v4521_v39 }
 0xbbb   :  { %v6072_v56 = vpop.eup %6071  ;;  %v4534_v49 = vsel %vm2366_vm4, %v6070_v58, 0.0 }
 0xbbc   :  { %4535 = vadd.xlane.f32.xlu0 %v4534_v49  ;;  %v4531_v45 = vsel %vm2366_vm4, %v6072_v56, 0.0 }
 0xbbd   :  { %4532 = vadd.xlane.f32.xlu1 %v4531_v45 }
 0xbc3   :  { %v7470_v43 = vpop.eup %6073 }
 0xbc4   :  { %v4537_v61 = vsel %vm2366_vm4, %v7470_v43, 0.0 }
 0xbc5   :  { %4538 = vadd.xlane.f32.xlu1 %v4537_v61 }
 0xbc6   :  { %v4500_v60 = vpop.xlane.xlu0 %4499  ;;  %v4497_v62 = vpop.xlane.xlu1 %4496 }
 0xbc7   :  { %v7474_v63 = vpop.eup %6075  ;;  %v4512_v18 = vsub.f32 %v7440_v0, %v4500_v60  ;;  %v4511_v2 = vsub.f32 %v7438_v22, %v4497_v62 }
 0xbc8   :  { %v4540_v11 = vsel %vm2366_vm4, %v7474_v63, 0.0 }
 0xbc9   :  { %v4523_v36 = vmul.f32 1.442695, %v4511_v2  ;;  %4541 = vadd.xlane.f32.xlu0 %v4540_v11  ;;  %v4525_v12 = vmul.f32 1.442695, %v4512_v18 }
 0xbcb   :  { %6077 = vpow2.f32 %v4523_v36 }
 0xbcc   :  { %6079 = vpow2.f32 %v4525_v12 }
 0xbd0   :  { %v4503_v22 = vpop.xlane.xlu1 %4502  ;;  %v4506_v27 = vpop.xlane.xlu0 %4505 }
 0xbd1   :  { %v4513_v5 = vsub.f32 %v7446_v51, %v4503_v22  ;;  %v4514_v20 = vsub.f32 %v7448_v42, %v4506_v27 }
 0xbd3   :  { %v4527_v14 = vmul.f32 1.442695, %v4513_v5  ;;  %v4529_v54 = vmul.f32 1.442695, %v4514_v20 }
 0xbd4   :  { %v7502_v28 = vpop.permute.xlu0 %3509 }
 0xbd5   :  { %6081 = vpow2.f32 %v4527_v14  ;;  %v3739_v18 = vcombine.low %v7462_v26, %v7502_v28  ;;  %v3740_v2 = vcombine.high %v7462_v26, %v7502_v28 }
 0xbd6   :  { %3515 = vrot.lane.b32.xlu1 %v7130_v7, %s6340_s5  ;;  %6083 = vpow2.f32 %v4529_v54 }
 0xbd7   :  { %v3747_v14 = vrot.slane %v3739_v18, %v6562_v59  ;;  %v3754_v27 = vrot.slane %v3740_v2, %v6562_v59 }
 0xbd8   :  { %v7482_v38 = vpop.eup %6077 }
 0xbd9   :  { %v4543_v32 = vsel %vm2366_vm4, %v7482_v38, 0.0  ;;  %v7486_v4 = vpop.eup %6079 }
 0xbda   :  { %4544 = vadd.xlane.f32.xlu0 %v4543_v32  ;;  %v4546_v0 = vsel %vm2366_vm4, %v7486_v4, 0.0 }
 0xbde   :  { %4547 = vadd.xlane.f32.xlu0 %v4546_v0 }
 0xbe2   :  { %v7493_v7 = vpop.eup %6081 }
 0xbe3   :  { %v4549_v47 = vsel %vm2366_vm4, %v7493_v7, 0.0  ;;  %v7498_v35 = vpop.eup %6083 }
 0xbe4   :  { %v4552_v57 = vsel %vm2366_vm4, %v7498_v35, 0.0 }
 0xbf4   :  { %3517 = vrot.lane.b32.xlu0 %v7148_v53, %s6340_s5  ;;  %v3508_v53 = vpop.permute.xlu1 %3507 }
 0xbf5   :  { %v3672_v13 = vcombine.high %v7458_v30, %v3508_v53 }
 0xbf7   :  { %v3686_v8 = vrot.slane %v3672_v13, %v6562_v59 }
 0xbfa   :  { %4550 = vadd.xlane.f32.xlu1 %v4549_v47 }
 0xc13   :  { %4553 = vadd.xlane.f32.xlu0 %v4552_v57 }
 0xc45   :  { %v4536_v51 = vpop.xlane.xlu0 %4535 }
 0xc46   :  { %6085 = vrcp.f32 %v4536_v51  ;;  %v4533_v52 = vpop.xlane.xlu1 %4532 }
 0xc47   :  { %6087 = vrcp.f32 %v4533_v52 }
 0xc4e   :  { %v4539_v44 = vpop.xlane.xlu1 %4538 }
 0xc4f   :  { %6089 = vrcp.f32 %v4539_v44 }
 0xc52   :  { %v4542_v31 = vpop.xlane.xlu0 %4541  ;;  %v3516_v48 = vpop.permute.xlu1 %3515 }
 0xc53   :  { %v6086_v19 = vpop.eup %6085  ;;  %6091 = vrcp.f32 %v4542_v31  ;;  %v3687_v6 = vcombine.low %v7460_v55, %v3516_v48  ;;  %v3688_v10 = vcombine.high %v7460_v55, %v3516_v48 }
 0xc54   :  { %v6088_v42 = vpop.eup %6087  ;;  %v4564_v50 = vmul.f32 %v6086_v19, %v6070_v58 }
 0xc55   :  { %v4563_v34 = vmul.f32 %v6088_v42, %v6072_v56  ;;  %v3702_v40 = vrot.slane %v3688_v10, %v6562_v59 }
 0xc56   :  { %v4572_v21 = vpack.c.bf16 %v4564_v50, %v4564_v50 }
 0xc57   :  { %5477 = vst.msk [vmem:[#allocation17] sm:$0xff] %vm2366_vm4, %v4563_v34  ;;  %v4571_v23 = vpack.c.bf16 %v4563_v34, %v4563_v34  ;;  %v3719_v56 = vcombine.low %v3686_v8, %v3702_v40  ;;  %v3720_v49 = vcombine.high %v3686_v8, %v3702_v40 }
 0xc58   :  { %5892 = vmatmul.mubr.msk.bf16.vlgmr.msra.gmra.mxu1 %vm2366_vm4, %v4572_v21 }
 0xc59   :  { %5902 = vmatpush3.bf16.msra.mxu1 %v7412_v25  ;;  %5886 = vmatmul.mubr.msk.bf16.vlgmr.msra.gmra.mxu0 %vm2366_vm4, %v4571_v23  ;;  %v3671_v25 = vcombine.low %v7458_v30, %v3508_v53  ;;  %v3727_v60 = vrot.slane %v3719_v56, %v6573_v3  ;;  %v3734_v62 = vrot.slane %v3720_v49, %v6573_v3 }
 0xc5a   :  { %5903 = vmatprep.mubr.msk.bf16.mxu1 %vm6336_vm1, %v6335_v15  ;;  %5896 = vmatpush3.bf16.msra.mxu0 %v7410_v41  ;;  %v3695_v41 = vrot.slane %v3687_v6, %v6562_v59 }
 0xc5b   :  { %5897 = vmatprep.mubr.msk.bf16.mxu0 %vm6336_vm1, %v6335_v15  ;;  %5907 = vmatprep.subr.bf16.mxu0 %v6335_v15  ;;  %v3679_v16 = vrot.slane %v3671_v25, %v6562_v59  ;;  %v3959_v12 = vcombine.low %v3727_v60, %v3734_v62  ;;  %v5581_v32 = vcombine.high %v3727_v60, %v3734_v62 }
 0xc5c   :  { %v6090_v17 = vpop.eup %6089  ;;  %5913 = vmatprep.subr.bf16.mxu1 %v6335_v15 }
 0xc5d   :  { %v4565_v1 = vmul.f32 %v6090_v17, %v7470_v43  ;;  %v3703_v30 = vcombine.low %v3679_v16, %v3695_v41  ;;  %v3704_v58 = vcombine.high %v3679_v16, %v3695_v41  ;;  %v3966_v57 = vrot.slane %v3959_v12, %v6562_v59 }
 0xc5e   :  { %v3974_v28 = vrot.slane %v5581_v32, %v6562_v59 }
 0xc5f   :  { %v4573_v29 = vpack.c.bf16 %v4565_v1, %v4565_v1  ;;  %v3711_v43 = vrot.slane %v3703_v30, %v6573_v3  ;;  %v3718_v61 = vrot.slane %v3704_v58, %v6573_v3 }
 0xc60   :  { %v6092_v46 = vpop.eup %6091  ;;  %v3991_v21 = vcombine.low %v3966_v57, %v3974_v28 }
 0xc61   :  { %v4566_v55 = vmul.f32 %v6092_v46, %v7474_v63  ;;  %5898 = vmatmul.mubr.msk.bf16.vlgmr.msra.gmra.mxu0 %vm2366_vm4, %v4573_v29  ;;  %v3943_v11 = vcombine.low %v3711_v43, %v3718_v61  ;;  %v5580_v36 = vcombine.high %v3711_v43, %v3718_v61 }
 0xc62   :  { %5909 = vmatprep.mubr.msk.bf16.mxu0 %vm6336_vm1, %v6335_v15  ;;  %v3999_v40 = vrot.slane %v3991_v21, %v6573_v3 }
 0xc63   :  { %v4574_v39 = vpack.c.bf16 %v4566_v55, %v4566_v55  ;;  %v4545_v45 = vpop.xlane.xlu0 %4544  ;;  %v3950_v26 = vrot.slane %v3943_v11, %v6562_v59  ;;  %v3958_v54 = vrot.slane %v5580_v36, %v6562_v59 }
 0xc64   :  { %6093 = vrcp.f32 %v4545_v45 }
 0xc65   :  { %5904 = vmatmul.mubr.msk.bf16.vlgmr.msra.gmra.mxu1 %vm2366_vm4, %v4574_v39  ;;  %v3975_v34 = vcombine.low %v3950_v26, %v3958_v54  ;;  %v3976_v29 = vcombine.high %v3950_v26, %v3958_v54 }
 0xc66   :  { %5915 = vmatprep.mubr.msk.bf16.mxu1 %vm6336_vm1, %v6335_v15 }
 0xc67   :  { %v4548_v63 = vpop.xlane.xlu0 %4547  ;;  %v3983_v41 = vrot.slane %v3975_v34, %v6573_v3  ;;  %v3990_v43 = vrot.slane %v3976_v29, %v6573_v3 }
 0xc68   :  { %6095 = vrcp.f32 %v4548_v63 }
 0xc69   :  { %v4007_v60 = vcombine.low %v3983_v41, %v3999_v40  ;;  %v4008_v63 = vcombine.high %v3983_v41, %v3999_v40 }
 0xc6b   :  { %v3518_v22 = vpop.permute.xlu0 %3517 }
 0xc6c   :  { %v3755_v0 = vcombine.low %v7464_v9, %v3518_v22  ;;  %v3756_v5 = vcombine.high %v7464_v9, %v3518_v22 }
 0xc6e   :  { %v3763_v47 = vrot.slane %v3755_v0, %v6562_v59  ;;  %v3770_v20 = vrot.slane %v3756_v5, %v6562_v59 }
 0xc70   :  { %v3771_v53 = vcombine.low %v3747_v14, %v3763_v47  ;;  %v3772_v51 = vcombine.high %v3747_v14, %v3763_v47  ;;  %v3787_v9 = vcombine.low %v3754_v27, %v3770_v20  ;;  %v3788_v52 = vcombine.high %v3754_v27, %v3770_v20 }
 0xc71   :  { %v6094_v44 = vpop.eup %6093 }
 0xc72   :  { %v3779_v31 = vrot.slane %v3771_v53, %v6573_v3  ;;  %v3786_v19 = vrot.slane %v3772_v51, %v6573_v3  ;;  %v3795_v42 = vrot.slane %v3787_v9, %v6573_v3  ;;  %v3802_v50 = vrot.slane %v3788_v52, %v6573_v3 }
 0xc73   :  { %v4567_v23 = vmul.f32 %v6094_v44, %v7482_v38  ;;  %v3992_v38 = vcombine.high %v3966_v57, %v3974_v28 }
 0xc74   :  { %v4011_v48 = vcombine.low %v3779_v31, %v3786_v19  ;;  %v5582_v17 = vcombine.high %v3779_v31, %v3786_v19  ;;  %v4027_v6 = vcombine.low %v3795_v42, %v3802_v50  ;;  %v5583_v10 = vcombine.high %v3795_v42, %v3802_v50 }
 0xc75   :  { %5478 = vst.msk [vmem:[#allocation17 + $0x8] sm:$0xff] %vm2366_vm4, %v4567_v23  ;;  %v6096_v30 = vpop.eup %6095  ;;  %v4006_v61 = vrot.slane %v3992_v38, %v6573_v3  ;;  %v4575_v5 = vpack.c.bf16 %v4567_v23, %v4567_v23 }
 0xc76   :  { %v4018_v25 = vrot.slane %v4011_v48, %v6562_v59  ;;  %v4026_v13 = vrot.slane %v5582_v17, %v6562_v59  ;;  %v4034_v1 = vrot.slane %v4027_v6, %v6562_v59  ;;  %v4042_v46 = vrot.slane %v5583_v10, %v6562_v59 }
 0xc77   :  { %v4568_v2 = vmul.f32 %v6096_v30, %v7486_v4  ;;  %v4009_v22 = vcombine.low %v3990_v43, %v4006_v61  ;;  %v4010_v0 = vcombine.high %v3990_v43, %v4006_v61 }
 0xc78   :  { %v4043_v55 = vcombine.low %v4018_v25, %v4026_v13  ;;  %v4059_v16 = vcombine.low %v4034_v1, %v4042_v46  ;;  %v4044_v8 = vcombine.high %v4018_v25, %v4026_v13  ;;  %v4060_v39 = vcombine.high %v4034_v1, %v4042_v46 }
 0xc79   :  { %v4576_v14 = vpack.c.bf16 %v4568_v2, %v4568_v2 }
 0xc7a   :  { %v4051_v58 = vrot.slane %v4043_v55, %v6573_v3  ;;  %v4067_v56 = vrot.slane %v4059_v16, %v6573_v3  ;;  %v4058_v49 = vrot.slane %v4044_v8, %v6573_v3  ;;  %v4074_v45 = vrot.slane %v4060_v39, %v6573_v3 }
 0xc7c   :  { %v4075_v62 = vcombine.low %v4051_v58, %v4067_v56  ;;  %v4076_v18 = vcombine.high %v4051_v58, %v4067_v56  ;;  %v4077_v12 = vcombine.low %v4058_v49, %v4074_v45  ;;  %v4078_v32 = vcombine.high %v4058_v49, %v4074_v45 }
 0xc7e   :  { %v4583_v11 = vpack.c.bf16 %v4075_v62, %v4007_v60  ;;  %v4584_v36 = vpack.c.bf16 %v4076_v18, %v4008_v63  ;;  %v4585_v27 = vpack.c.bf16 %v4077_v12, %v4009_v22  ;;  %v4586_v47 = vpack.c.bf16 %v4078_v32, %v4010_v0 }
 0xc80   :  { %5908 = vmatpush3.bf16.msra.mxu0 %v4583_v11  ;;  %5914 = vmatpush3.bf16.msra.mxu1 %v4584_v36 }
 0xc81   :  { %5919 = vmatprep.subr.bf16.mxu0 %v6335_v15  ;;  %5925 = vmatprep.subr.bf16.mxu1 %v6335_v15 }
 0xc83   :  { %v4551_v20 = vpop.xlane.xlu1 %4550  ;;  %5910 = vmatmul.mubr.msk.bf16.vlgmr.msra.gmra.mxu0 %vm2366_vm4, %v4575_v5  ;;  %5916 = vmatmul.mubr.msk.bf16.vlgmr.msra.gmra.mxu1 %vm2366_vm4, %v4576_v14 }
 0xc84   :  { %6097 = vrcp.f32 %v4551_v20  ;;  %5920 = vmatpush3.bf16.msra.mxu0 %v4585_v27  ;;  %5926 = vmatpush3.bf16.msra.mxu1 %v4586_v47 }
 0xc85   :  { %5921 = vmatprep.mubr.msk.bf16.mxu0 %vm6336_vm1, %v6335_v15  ;;  %5927 = vmatprep.mubr.msk.bf16.mxu1 %vm6336_vm1, %v6335_v15 }
 0xc86   :  { %5931 = vmatprep.subr.bf16.mxu0 %v6335_v15  ;;  %5939 = vmatprep.subr.bf16.mxu1 %v6335_v15 }
 0xc91   :  { %v6098_v4 = vpop.eup %6097 }
 0xc92   :  { %v4569_v26 = vmul.f32 %v6098_v4, %v7493_v7 }
 0xc94   :  { %v4577_v54 = vpack.c.bf16 %v4569_v26, %v4569_v26 }
 0xc96   :  { %5922 = vmatmul.mubr.msk.bf16.vlgmr.msra.gmra.mxu0 %vm2366_vm4, %v4577_v54 }
 0xc97   :  { %5935 = vmatprep.mubr.msk.bf16.mxu0 %vm6336_vm1, %v6335_v15 }
 0xc9c   :  { %v4554_v57 = vpop.xlane.xlu0 %4553 }
 0xc9d   :  { %6099 = vrcp.f32 %v4554_v57 }
 0xcaa   :  { %v6100_v28 = vpop.eup %6099 }
 0xcab   :  { %v4570_v53 = vmul.f32 %v6100_v28, %v7498_v35 }
 0xcad   :  { %v4578_v51 = vpack.c.bf16 %v4570_v53, %v4570_v53 }
 0xcaf   :  { %5928 = vmatmul.mubr.msk.bf16.vlgmr.msra.gmra.mxu1 %vm2366_vm4, %v4578_v51 }
 0xcb0   :  { %5943 = vmatprep.mubr.msk.bf16.mxu1 %vm6336_vm1, %v6335_v15 }
 0xd18   :  { %v4667_v9 = vpop.f32.mrf.mxu1 }
 0xd19   :  { %v4624_v52 = vpop.f32.mrf.mxu0 }
 0xd1a   :  { %v5893_v7 = vpop.f32.mrf.mxu1 }
 0xd1b   :  { %v5887_v44 = vpop.f32.mrf.mxu0 }
 0xd1c   :  { %v4670_v31 = vpop.f32.mrf.mxu1 }
 0xd1d   :  { %v4627_v19 = vpop.f32.mrf.mxu0 }
 0xd1e   :  { %v5894_v42 = vpop.f32.mrf.mxu1 }
 0xd1f   :  { %v5888_v50 = vpop.f32.mrf.mxu0 }
 0xd21   :  { %v4710_v34 = vpop.f32.mrf.mxu0 }
 0xd22   :  { %v4931_v21 = vcombine.low %v4624_v52, %v4710_v34  ;;  %v4932_v23 = vcombine.high %v4624_v52, %v4710_v34 }
 0xd23   :  { %v5899_v48 = vpop.f32.mrf.mxu0 }
 0xd24   :  { %v4939_v13 = vrot.slane %v4931_v21, %v6562_v59  ;;  %v4946_v1 = vrot.slane %v4932_v23, %v6562_v59 }
 0xd25   :  { %v4753_v17 = vpop.f32.mrf.mxu1  ;;  %v4713_v35 = vpop.f32.mrf.mxu0 }
 0xd26   :  { %v4947_v6 = vcombine.low %v4667_v9, %v4753_v17  ;;  %v4948_v10 = vcombine.high %v4667_v9, %v4753_v17 }
 0xd27   :  { %v5905_v25 = vpop.f32.mrf.mxu1  ;;  %v5900_v40 = vpop.f32.mrf.mxu0 }
 0xd28   :  { %v4955_v46 = vrot.slane %v4947_v6, %v6562_v59  ;;  %v4962_v41 = vrot.slane %v4948_v10, %v6562_v59 }
 0xd29   :  { %v4756_v29 = vpop.f32.mrf.mxu1 }
 0xd2a   :  { %v4963_v38 = vcombine.low %v4939_v13, %v4955_v46  ;;  %v4964_v55 = vcombine.high %v4939_v13, %v4955_v46  ;;  %v4979_v16 = vcombine.low %v4946_v1, %v4962_v41  ;;  %v4980_v8 = vcombine.high %v4946_v1, %v4962_v41 }
 0xd2b   :  { %v5906_v39 = vpop.f32.mrf.mxu1 }
 0xd2c   :  { %v4971_v30 = vrot.slane %v4963_v38, %v6573_v3  ;;  %v4978_v58 = vrot.slane %v4964_v55, %v6573_v3  ;;  %v4987_v56 = vrot.slane %v4979_v16, %v6573_v3  ;;  %v4994_v49 = vrot.slane %v4980_v8, %v6573_v3 }
 0xd2e   :  { %v5067_v45 = vcombine.low %v4971_v30, %v4978_v58  ;;  %v5602_v43 = vcombine.high %v4971_v30, %v4978_v58  ;;  %v5083_v61 = vcombine.low %v4987_v56, %v4994_v49  ;;  %v5603_v60 = vcombine.high %v4987_v56, %v4994_v49  ;;  %v6021_v56 = vld [vmem:[#allocation11 + $0x8] sm:$0xff]  }
 0xd2f   :  { %5932 = vmatpush3.bf16.msra.mxu0 %v6021_v56  ;;  %v6025_v56 = vld [vmem:[%s7721_s14 + $0x18] sm:$0xff]  }
 0xd30   :  { %v5074_v62 = vrot.slane %v5067_v45, %v6562_v59  ;;  %v5082_v63 = vrot.slane %v5602_v43, %v6562_v59  ;;  %v5090_v18 = vrot.slane %v5083_v61, %v6562_v59  ;;  %v5098_v2 = vrot.slane %v5603_v60, %v6562_v59  ;;  %5933 = vmatprep.subr.bf16.mxu0 %v6335_v15 }
 0xd32   :  { %v5100_v11 = vcombine.high %v5074_v62, %v5082_v63  ;;  %v5116_v36 = vcombine.high %v5090_v18, %v5098_v2  ;;  %v5099_v12 = vcombine.low %v5074_v62, %v5082_v63  ;;  %v5115_v32 = vcombine.low %v5090_v18, %v5098_v2 }
 0xd34   :  { %v7599_v22 = vrot.slane %v5100_v11, %v6573_v3  ;;  %v7602_v0 = vrot.slane %v5116_v36, %v6573_v3  ;;  %v7605_v5 = vrot.slane %v5099_v12, %v6573_v3  ;;  %v7608_v14 = vrot.slane %v5115_v32, %v6573_v3  ;;  %v6022_v32 = vld [vmem:[#allocation11] sm:$0xff]  }
 0xd35   :  { %5934 = vmatpush3.bf16.msra.mxu0 %v6022_v32 }
 0xd36   :  { %v5133_v27 = vcombine.low %v7599_v22, %v7602_v0  ;;  %v5131_v47 = vcombine.low %v7605_v5, %v7608_v14  ;;  %v5132_v20 = vcombine.high %v7605_v5, %v7608_v14  ;;  %v5134_v4 = vcombine.high %v7599_v22, %v7602_v0  ;;  %5947 = vmatprep.subr.bf16.mxu0 %v6335_v15  ;;  %v6108_v14 = vld [vmem:[#allocation14] sm:$0xff] }
 0xd37   :  { %v5236_v5 = vsub.s32 7, %v6503_v24 }
 0xd43   :  { %v4796_v26 = vpop.f32.mrf.mxu0  ;;  %v4839_v54 = vpop.f32.mrf.mxu1 }
 0xd45   :  { %v5911_v57 = vpop.f32.mrf.mxu0  ;;  %v5917_v28 = vpop.f32.mrf.mxu1 }
 0xd47   :  { %v4799_v53 = vpop.f32.mrf.mxu0  ;;  %v4842_v51 = vpop.f32.mrf.mxu1 }
 0xd49   :  { %v5912_v9 = vpop.f32.mrf.mxu0  ;;  %v5918_v52 = vpop.f32.mrf.mxu1 }
 0xd56   :  { %v4882_v7 = vpop.f32.mrf.mxu0 }
 0xd57   :  { %v4999_v42 = vcombine.low %v4796_v26, %v4882_v7  ;;  %v5000_v50 = vcombine.high %v4796_v26, %v4882_v7 }
 0xd58   :  { %v5923_v44 = vpop.f32.mrf.mxu0 }
 0xd59   :  { %v5007_v17 = vrot.slane %v4999_v42, %v6562_v59  ;;  %v5014_v35 = vrot.slane %v5000_v50, %v6562_v59 }
 0xd5a   :  { %v4885_v31 = vpop.f32.mrf.mxu0 }
 0xd5c   :  { %v5924_v19 = vpop.f32.mrf.mxu0 }
 0xd6f   :  { %v4925_v34 = vpop.f32.mrf.mxu1 }
 0xd70   :  { %v5015_v21 = vcombine.low %v4839_v54, %v4925_v34  ;;  %v5016_v23 = vcombine.high %v4839_v54, %v4925_v34 }
 0xd71   :  { %v5929_v48 = vpop.f32.mrf.mxu1 }
 0xd72   :  { %v5023_v6 = vrot.slane %v5015_v21, %v6562_v59  ;;  %v5030_v10 = vrot.slane %v5016_v23, %v6562_v59 }
 0xd73   :  { %v4928_v25 = vpop.f32.mrf.mxu1 }
 0xd74   :  { %v5031_v13 = vcombine.low %v5007_v17, %v5023_v6  ;;  %v5032_v1 = vcombine.high %v5007_v17, %v5023_v6  ;;  %v5047_v46 = vcombine.low %v5014_v35, %v5030_v10  ;;  %v5048_v41 = vcombine.high %v5014_v35, %v5030_v10 }
 0xd75   :  { %v5930_v40 = vpop.f32.mrf.mxu1 }
 0xd76   :  { %v5039_v29 = vrot.slane %v5031_v13, %v6573_v3  ;;  %v5046_v38 = vrot.slane %v5032_v1, %v6573_v3  ;;  %v5055_v55 = vrot.slane %v5047_v46, %v6573_v3  ;;  %v5062_v16 = vrot.slane %v5048_v41, %v6573_v3 }
 0xd78   :  { %v5135_v8 = vcombine.low %v5039_v29, %v5046_v38  ;;  %v5604_v39 = vcombine.high %v5039_v29, %v5046_v38  ;;  %v5151_v30 = vcombine.low %v5055_v55, %v5062_v16  ;;  %v5605_v58 = vcombine.high %v5055_v55, %v5062_v16 }
 0xd7a   :  { %v5142_v49 = vrot.slane %v5135_v8, %v6562_v59  ;;  %v5150_v45 = vrot.slane %v5604_v39, %v6562_v59  ;;  %v5158_v43 = vrot.slane %v5151_v30, %v6562_v59  ;;  %v5166_v61 = vrot.slane %v5605_v58, %v6562_v59  ;;  %v6023_v30 = vld [vmem:[#allocation13 + $0x8] sm:$0xff]   ;;  %v6024_v58 = vld [vmem:[#allocation13] sm:$0xff]  }
 0xd7b   :  { %5940 = vmatpush3.bf16.msra.mxu1 %v6023_v30 }
 0xd7c   :  { %v5168_v60 = vcombine.high %v5142_v49, %v5150_v45  ;;  %v5184_v62 = vcombine.high %v5158_v43, %v5166_v61  ;;  %v5167_v63 = vcombine.low %v5142_v49, %v5150_v45  ;;  %v5183_v18 = vcombine.low %v5158_v43, %v5166_v61  ;;  %5941 = vmatprep.subr.bf16.mxu1 %v6335_v15 }
 0xd7e   :  { %v5182_v2 = vrot.slane %v5168_v60, %v6573_v3  ;;  %v5198_v11 = vrot.slane %v5184_v62, %v6573_v3  ;;  %v5175_v36 = vrot.slane %v5167_v63, %v6573_v3  ;;  %v5191_v12 = vrot.slane %v5183_v18, %v6573_v3 }
 0xd7f   :  { %5942 = vmatpush3.bf16.msra.mxu1 %v6024_v58  ;;  %v5324_v63 = vsub.s32 4, %v6503_v24 }
 0xd80   :  { %v5201_v26 = vcombine.low %v5182_v2, %v5198_v11  ;;  %v5200_v54 = vcombine.high %v5175_v36, %v5191_v12  ;;  %v5199_v57 = vcombine.low %v5175_v36, %v5191_v12  ;;  %v5202_v53 = vcombine.high %v5182_v2, %v5198_v11 }
 0xd81   :  { %v5325_v11 = vrot.slane %v6108_v14, %v5324_v63  ;;  %v5330_v36 = vsub.s32 5, %v6503_v24  ;;  %v6027_v24 = vld [vmem:[%s7721_s14 + $0x8] sm:$0xff]  }
 0xd82   :  { %v6003_v59 = vpack.i.bf16 %v5201_v26, %v5133_v27  ;;  %v5998_v28 = vpack.i.bf16 %v5200_v54, %v5132_v20  ;;  %v6008_v51 = vpack.i.bf16 %v5202_v53, %v5134_v4 }
 0xd83   :  { %v5331_v54 = vrot.slane %v6108_v14, %v5330_v36 }
 0xd84   :  { %6004 = vrot.lane.b32.xlu1 %v6003_v59, %s6343_s27  ;;  %5999 = vrot.lane.b32.xlu0 %v5998_v28, %s6330_s0 }
 0xd88   :  { %6009 = vrot.lane.b32.xlu1 %v6008_v51, %s6344_s25  ;;  %v6026_v51 = vld [vmem:[%s7721_s14 + $0x10] sm:$0xff]  }
 0xdf6   :  { %v6005_v3 = vpop.permute.xlu1 %6004  ;;  %v6000_v9 = vpop.permute.xlu0 %5999 }
 0xdf7   :  { %v6002_v52 = vunpack.i.h.bf16 %v6000_v9  ;;  %v6001_v7 = vunpack.i.l.bf16 %v6000_v9  ;;  %v6007_v44 = vunpack.i.h.bf16 %v6005_v3  ;;  %v6006_v31 = vunpack.i.l.bf16 %v6005_v3  ;;  %v6028_v3 = vld [vmem:[%s7721_s14] sm:$0xff]   ;;  %s5496_s14 = sshll.u32 %s6345_s9, 4  ;;  %s5497_s14 = int_to_ptr.vmem [resolvable:$true] %s5496_s14 }
 0xdf8   :  { %v5609_v9 = vld [vmem:[%s7720_s13] ss:$0 sm:$0xff]  ;;  %s6269_s19 = scalar_lea.vmem %s5497_s14, 256  ;;  %p6274_p13 = scmp.lt.s32.totalorder %s5497_s14, %s5497_s14 }
 0xdf9   :  { %v5227_v27 = vsel %vm1218_vm2, %v5131_v47, %v6001_v7  ;;  %v5228_v20 = vsel %vm1218_vm2, %v5199_v57, %v6002_v52  ;;  %v5237_v47 = vrot.slane %v6108_v14, %v5236_v5  ;;  %p6270_p12 = scmp.ne.s32.totalorder %s5497_s14, %s6269_s19  ;;  %p6275_p0 = scmp.lt.s32.totalorder %s6269_s19, %s6269_s19 }
 0xdfa   :  { %v6010_v19 = vpop.permute.xlu1 %6009  ;;  %v5229_v22 = vsel %vm2366_vm4, %v5227_v27, %v6006_v31  ;;  %v5230_v0 = vsel %vm2366_vm4, %v5228_v20, %v6007_v44 }
 0xdfb   :  { %v6012_v42 = vunpack.i.h.bf16 %v6010_v19  ;;  %v6011_v50 = vunpack.i.l.bf16 %v6010_v19  ;;  %p6276_p1 = por %p6275_p0, %p6274_p13 }
 0xdfd   :  { %v5231_v4 = vsel %vm2369_vm5, %v5229_v22, %v6011_v50  ;;  %v5232_v34 = vsel %vm2369_vm5, %v5230_v0, %v6012_v42  ;;  %p6277_p2 = pnand %p6276_p1, %p6270_p12 }
 0xdfe   :  { %v5233_v21 = vpack.c.bf16 %v5232_v34, %v5231_v4 }
 0xe00   :  { %5936 = vmatmul.mubr.msk.bf16.vlgmr.msra.gmra.mxu0 %vm215_vm0, %v5233_v21 }
 0xe01   :  { %5955 = vmatprep.mubr.msk.bf16.mxu0 %vm6336_vm1, %v6335_v15  ;;  %5948 = vmatpush3.bf16.msra.mxu0 %v6025_v56 }
 0xe02   :  { %5949 = vmatprep.subr.bf16.mxu0 %v6335_v15 }
 0xe05   :  { %5950 = vmatpush3.bf16.msra.mxu0 %v6026_v51 }
 0xe06   :  { %5951 = vmatprep.subr.bf16.mxu0 %v6335_v15 }
 0xe09   :  { %5952 = vmatpush3.bf16.msra.mxu0 %v6027_v24 }
 0xe0a   :  { %5953 = vmatprep.subr.bf16.mxu0 %v6335_v15 }
 0xe0d   :  { %5954 = vmatpush3.bf16.msra.mxu0 %v6028_v3 }
 0xec0   :  { %v5287_v23 = vpop.f32.mrf.mxu0 }
 0xec1   :  { %v5288_v48 = vadd.f32 %v5287_v23, %v5237_v47 }
 0xec2   :  { %v5937_v17 = vpop.f32.mrf.mxu0 }
 0xec3   :  { %v7656_v35 = vadd.f32 %v5288_v48, %v6937_v33 }
 0xec4   :  { %v5290_v6 = vpop.f32.mrf.mxu0 }
 0xec5   :  { %v5291_v10 = vadd.f32 %v5290_v6, %v5237_v47  ;;  %v5296_v25 = vsel %vm215_vm0, %v7656_v35, 0.0 }
 0xec6   :  { %5297 = vadd.xlane.f32.xlu0 %v5296_v25  ;;  %v5938_v13 = vpop.f32.mrf.mxu0 }
 0xec7   :  { %v7661_v1 = vadd.f32 %v5291_v10, %v6944_v37 }
 0xec9   :  { %v5299_v46 = vsel %vm215_vm0, %v7661_v1, 0.0 }
 0xeca   :  { %5300 = vadd.xlane.f32.xlu1 %v5299_v46 }
 0xf4f   :  { %v5298_v41 = vpop.xlane.xlu0 %5297 }
 0xf50   :  { %v5302_v40 = vmul.f32 0.03125, %v5298_v41 }
 0xf52   :  { %v5304_v29 = vsub.f32 %v7656_v35, %v5302_v40 }
 0xf53   :  { %v5301_v33 = vpop.xlane.xlu1 %5300 }
 0xf54   :  { %v5303_v38 = vmul.f32 0.03125, %v5301_v33  ;;  %v5306_v55 = vmul.f32 %v5304_v29, %v5304_v29 }
 0xf56   :  { %v5305_v16 = vsub.f32 %v7661_v1, %v5303_v38  ;;  %v5308_v8 = vsel %vm215_vm0, %v5306_v55, 0.0 }
 0xf57   :  { %5309 = vadd.xlane.f32.xlu0 %v5308_v8 }
 0xf58   :  { %v5307_v39 = vmul.f32 %v5305_v16, %v5305_v16 }
 0xf5a   :  { %v5311_v37 = vsel %vm215_vm0, %v5307_v39, 0.0 }
 0xf5b   :  { %5312 = vadd.xlane.f32.xlu0 %v5311_v37 }
 0xfe0   :  { %v5310_v49 = vpop.xlane.xlu0 %5309 }
 0xfe1   :  { %v5314_v45 = vmul.f32 0.03125, %v5310_v49 }
 0xfe3   :  { %v5316_v43 = vadd.f32 1e-06, %v5314_v45 }
 0xfe4   :  { %v5313_v61 = vpop.xlane.xlu0 %5312 }
 0xfe5   :  { %6101 = vrsqrt.f32 %v5316_v43  ;;  %v5315_v60 = vmul.f32 0.03125, %v5313_v61 }
 0xfe7   :  { %v5317_v62 = vadd.f32 1e-06, %v5315_v60 }
 0xfe9   :  { %6103 = vrsqrt.f32 %v5317_v62 }
 0xff2   :  { %v6102_v18 = vpop.eup %6101 }
 0xff3   :  { %v5320_v2 = vmul.f32 %v6102_v18, %v5304_v29 }
 0xff5   :  { %v5326_v26 = vmul.f32 %v5325_v11, %v5320_v2 }
 0xff6   :  { %v6104_v12 = vpop.eup %6103 }
 0xff7   :  { %v5321_v32 = vmul.f32 %v6104_v12, %v5305_v16  ;;  %v5332_v59 = vadd.f32 %v5331_v54, %v5326_v26 }
 0xff9   :  { %v5327_v57 = vmul.f32 %v5325_v11, %v5321_v32 }
 0xffb   :  { %v5333_v28 = vadd.f32 %v5331_v54, %v5327_v57 }
 0xffd   :  { %v5334_v53 = vpack.c.bf16 %v5333_v28, %v5332_v59 }
 0xfff   :  { %5944 = vmatmul.mubr.msk.bf16.vlgmr.msra.gmra.mxu1 %vm215_vm0, %v5334_v53 }
0x10bf   :  { %v5390_v52 = vpop.f32.mrf.mxu1 }
0x10c0   :  { %v5391_v44 = vadd.f32 %v5609_v9, %v5390_v52 }
0x10c1   :  { %v5945_v7 = vpop.f32.mrf.mxu1 }
0x10c2   :  { %v5397_v19 = vmax.f32 %v5391_v44, 0.0 }
0x10c3   :  { %v5393_v31 = vpop.f32.mrf.mxu1 }
0x10c4   :  { %v5394_v27 = vadd.f32 %v5609_v9, %v5393_v31 }
0x10c5   :  { %v5946_v20 = vpop.f32.mrf.mxu1 }
0x10c6   :  { %v5398_v42 = vmax.f32 %v5394_v27, 0.0 }
0x10c8   :  { %v5399_v50 = vpack.c.bf16 %v5398_v42, %v5397_v19 }
0x10ca   :  { %5956 = vmatmul.mubr.msk.bf16.vlgmr.msra.gmra.mxu0 %vm5428_vm6, %v5399_v50 }
0x10cb   :  { %6280 = shalt.err (!%p6277_p2)
}
0x10cc   :  { %5502 = dma.vmem_to_hbm [thread:$0]  %s5497_s14, 256, %s7724_s17, [#allocation18], %s6329_s7, %s6329_s7, %s6330_s0   ;;  %v5613_v15 = vld [vmem:[#allocation14 + $0x8] ss:$0 sm:$0xff] }
0x10cd   :  { %s6346_s12 = smov [#allocation16]  }
0x10ce   :  { %s5484_s28 = sshll.u32 %s6346_s12, 4  ;;  %s5485_s28 = int_to_ptr.vmem [resolvable:$true] %s5484_s28 }
0x10cf   :  { %s6289_s20 = scalar_lea.vmem %s5485_s28, 256  ;;  %p6294_p4 = scmp.lt.s32.totalorder %s5485_s28, %s5485_s28 }
0x10d0   :  { %p6290_p3 = scmp.ne.s32.totalorder %s5485_s28, %s6289_s20  ;;  %p6295_p5 = scmp.lt.s32.totalorder %s6289_s20, %s6289_s20 }
0x10d2   :  { %p6296_p6 = por %p6295_p5, %p6294_p4 }
0x10d4   :  { %p6297_p7 = pnand %p6296_p6, %p6290_p3 }
0x118a   :  { %v5466_v22 = vpop.f32.mrf.mxu0 }
0x118b   :  { %v5467_v0 = vadd.f32 %v5613_v15, %v5466_v22 }
0x118c   :  { %v5957_v4 = vpop.f32.mrf.mxu0 }
0x118d   :  { %v5473_v34 = vadd.f32 %v5467_v0, %v7656_v35 }
0x118e   :  { %v5469_v21 = vpop.f32.mrf.mxu0 }
0x118f   :  { %5475 = vst.msk [vmem:[#allocation16] sm:$0xff] %vm215_vm0, %v5473_v34  ;;  %v5470_v5 = vadd.f32 %v5613_v15, %v5469_v21 }
0x1190   :  { %v5958_v14 = vpop.f32.mrf.mxu0 }
0x1191   :  { %v5474_v47 = vadd.f32 %v5470_v5, %v7661_v1 }
0x1193   :  { %5476 = vst.msk [vmem:[#allocation16 + $0x8] sm:$0xff] %vm215_vm0, %v5474_v47 }
0x1194   :  { %6300 = shalt.err (!%p6297_p7)
}
0x1195   :  { %5490 = dma.vmem_to_hbm [thread:$0]  %s5485_s28, 256, %s7723_s16, [#allocation4], %s6329_s7, %s6329_s7, %s6330_s0  }
0x1196   :  { %6319 = dma.done.wait [#allocation4], 256  }
0x1197   :  { %6320 = vsyncadd [#allocation4], 4294967040 }
0x1198   :  { %6321 = dma.done.wait [#allocation18], 256  }
0x1199   :  { %6322 = vsyncadd [#allocation18], 4294967040 }
0x119a   :  { %5509 = vsyncpa [#allocation3], 1 }
0x119b   :  { %5510 = vsyncpa [#allocation6], 1 }
0x119c   :  { %5511 = vsyncpa [#allocation9], 1 }
0x119d   :  { %5512 = vsyncpa [#allocation12], 1 }
0x119e   :  { %5513 = vsyncpa [#allocation15], 1 }
0x119f   :  { %5514 = vsyncpa [#allocation4], 1 }
0x11a0   :  { %5515 = vsyncpa [#allocation18], 1 }

</bundles_post_ra>
